<compile_context>
chip_gen: v7x
topology: tpu7x:2x2x1
jax: 0.10.0
libtpu: 0.0.40
codegen_flags: <defaults>
</compile_context>

<pallas_src>
import functools

import jax
import jax.numpy as jnp
from jax.experimental import pallas as pl
from jax.experimental.pallas import tpu as pltpu

LANE = 128
SUBLANE = 8


def _round_up(x, m):
    return (x + m - 1) // m * m


def _rvector_classifier_kernel(
    mfcc_ref,   # (tile_b, tile_t, F)   bf16
    len_ref,    # (tile_b, 1)           i32
    aux_ref,    # (tile_b, Ea_p)        bf16  concat([gender_emb, word_emb]) padded
    w1_ref,     # (F, H_p)              bf16  frame encoder
    b1_ref,     # (1, H_p)              f32
    w2_ref,     # (2*H_p + Ea_p, EMB)   bf16  fused embedding-head weight
    b2_ref,     # (1, EMB)              f32
    wc_ref,     # (EMB, C_p)            bf16  classifier
    bc_ref,     # (1, C_p)              f32
    out_ref,    # (tile_b, C_p)         f32
    sum_ref,    # (tile_b, H_p)         f32 scratch: running sum(h * mask)
    sq_ref,     # (tile_b, H_p)         f32 scratch: running sum(h * h * mask)
    *,
    chunk_t,
):
    t = pl.program_id(1)
    tile_b, tile_t, f = mfcc_ref.shape
    h_p = w1_ref.shape[1]
    n_chunks = tile_t // chunk_t

    @pl.when(t == 0)
    def _():
        sum_ref[...] = jnp.zeros_like(sum_ref)
        sq_ref[...] = jnp.zeros_like(sq_ref)

    lengths = len_ref[...]                                      # (tile_b, 1) i32
    w1 = w1_ref[...]
    b1 = b1_ref[...]

    # ---- frame encoder + masked running stats, chunk_t frames at a time ---
    # (bounds peak VMEM for the f32 temporaries to (tile_b, chunk_t, H_p))
    def chunk_body(c, carry):
        start = pl.multiple_of(c * chunk_t, chunk_t)
        x = mfcc_ref[:, pl.ds(start, chunk_t), :].reshape(tile_b * chunk_t, f)
        h = jnp.dot(x, w1, preferred_element_type=jnp.float32)  # K = F (unpadded)
        h = jnp.maximum(h + b1, 0.0).reshape(tile_b, chunk_t, h_p)
        t_idx = (jax.lax.broadcasted_iota(jnp.int32, (tile_b, chunk_t), 1)
                 + (t * tile_t + start))
        mask = (t_idx < lengths).astype(jnp.float32)[..., None]  # (tb, ct, 1)
        hm = h * mask
        sum_ref[...] += jnp.sum(hm, axis=1)
        sq_ref[...] += jnp.sum(hm * h, axis=1)
        return carry

    jax.lax.fori_loop(0, n_chunks, chunk_body, 0, unroll=True)

    # ---- finalize: pooled stats -> head matmuls -> classifier --------------
    @pl.when(t == pl.num_programs(1) - 1)
    def _():
        n = jnp.maximum(lengths.astype(jnp.float32), 1.0)        # (tb, 1)
        inv_n = pl.reciprocal(n, approx=True)                    # EUP, one recip
        mean = sum_ref[...] * inv_n                              # (tb, H_p)
        var = jnp.maximum(sq_ref[...] * inv_n - mean * mean, 1e-6)
        std = jnp.sqrt(var)
        # Head: [mean | std | aux] @ W2 done as three dots against static
        # slices of the fused weight (no lane concat / extra copy).
        pre = (
            jnp.dot(mean.astype(jnp.bfloat16), w2_ref[0:h_p, :],
                    preferred_element_type=jnp.float32)
            + jnp.dot(std.astype(jnp.bfloat16), w2_ref[h_p:2 * h_p, :],
                      preferred_element_type=jnp.float32)
            + jnp.dot(aux_ref[...], w2_ref[2 * h_p:, :],
                      preferred_element_type=jnp.float32)
            + b2_ref[...])
        emb = jnp.maximum(pre, 0.0).astype(jnp.bfloat16)         # (tb, EMB)
        logits = jnp.dot(emb, wc_ref[...],
                         preferred_element_type=jnp.float32) + bc_ref[...]
        out_ref[...] = logits.astype(out_ref.dtype)


def _vmem_limit_bytes(tile_b, tile_t, chunk_t, F, H_p, Ea_p, EMB, C_p):
    """Explicit scoped-VMEM budget derived from the tile sizes."""
    bf16, f32 = 2, 4
    # Double-buffered streamed blocks (mfcc / lengths / aux / output).
    stream = 2 * tile_b * (tile_t * F * bf16 + Ea_p * bf16 + LANE * f32 + C_p * f32)
    # Weight/bias blocks (budgeted x2 even though we request single-buffering).
    weights = 2 * ((F * H_p + (2 * H_p + Ea_p) * EMB + EMB * C_p) * bf16
                   + (H_p + EMB + C_p) * f32)
    # Accumulator scratch + live f32 temporaries of the chunked inner loop.
    scratch = 2 * tile_b * H_p * f32
    temps = 4 * tile_b * chunk_t * H_p * f32
    est = stream + weights + scratch + temps
    # At least the 32 MiB scoped default; capped at 56 MiB so it stays under
    # v7x's 64 MiB physical VMEM (v5e/v6e have 128 MiB and could go higher).
    return int(min(56 * 1024 * 1024, max(32 * 1024 * 1024, 2 * est)))


def rvector_classifier(mfcc, lengths, gender, word_id, params, *,
                       tile_b=64, tile_t=256, chunk_t=64):
    B, T, F = mfcc.shape
    H = params["w1"].shape[1]
    EMB = params["wc"].shape[0]
    C = params["wc"].shape[1]
    Eg = params["gtab"].shape[1]
    Ew = params["wtab"].shape[1]

    # Lane padding for matmul N dims only; the mfcc feature dim F stays
    # unpadded in HBM.  H -> multiple of 256 when H >= 256 (v6e/v7x MXU N),
    # else 128 (native on v5e).
    H_p = _round_up(H, 256) if H >= 256 else _round_up(H, LANE)
    C_p = _round_up(C, LANE)
    Ea_p = _round_up(Eg + Ew, LANE)
    assert EMB % LANE == 0, "embedding dim must be lane-aligned (256 here)"

    # Batch tiling: large tiles amortize MXU latency / step overhead, but keep
    # >= 2 batch tiles when the batch allows so the "parallel" axis can split
    # across v7x's two TensorCores.
    b_aligned = _round_up(B, SUBLANE)
    tile_b = _round_up(min(tile_b, b_aligned), SUBLANE)
    if b_aligned >= 2 * SUBLANE and tile_b > b_aligned // 2:
        tile_b = max(SUBLANE, _round_up(b_aligned // 2, SUBLANE))
    B_p = _round_up(B, tile_b)

    # Time tiling: tile_t is a multiple of chunk_t (in-kernel sub-chunk that
    # bounds the live f32 temporaries); both are multiples of the 8-row sublane.
    t_aligned = _round_up(T, SUBLANE)
    tile_t = min(tile_t, t_aligned)
    chunk_t = max(SUBLANE, min(chunk_t, tile_t))
    chunk_t -= chunk_t % SUBLANE
    tile_t = _round_up(tile_t, chunk_t)
    T_p = _round_up(T, tile_t)

    # ---- pad + cast activations (B/T only; F keeps its real size) ----------
    mfcc_p = jnp.pad(mfcc, ((0, B_p - B), (0, T_p - T), (0, 0))).astype(jnp.bfloat16)
    len_p = jnp.pad(lengths.astype(jnp.int32), (0, B_p - B)).reshape(B_p, 1)

    # Embedding lookups: plain gathers in the wrapper (no in-kernel one-hots).
    gemb = params["gtab"][gender]                                  # (B, Eg)
    wemb = params["wtab"][word_id]                                 # (B, Ew)
    aux = jnp.concatenate([gemb, wemb], axis=1)                    # (B, Eg+Ew)
    aux_p = jnp.pad(aux, ((0, B_p - B), (0, Ea_p - (Eg + Ew)))).astype(jnp.bfloat16)

    # ---- pad + fuse weights -------------------------------------------------
    w1_p = jnp.pad(params["w1"], ((0, 0), (0, H_p - H))).astype(jnp.bfloat16)
    b1_p = jnp.pad(params["b1"], ((0, 0), (0, H_p - H))).astype(jnp.float32)
    w2m = jnp.pad(params["w2m"], ((0, H_p - H), (0, 0)))
    w2s = jnp.pad(params["w2s"], ((0, H_p - H), (0, 0)))      # zero rows for padded
    w2a = jnp.pad(jnp.concatenate([params["w2g"], params["w2w"]], axis=0),
                  ((0, Ea_p - (Eg + Ew)), (0, 0)))             # std/aux columns
    w2_p = jnp.concatenate([w2m, w2s, w2a], axis=0).astype(jnp.bfloat16)
    b2_p = params["b2"].astype(jnp.float32)
    wc_p = jnp.pad(params["wc"], ((0, 0), (0, C_p - C))).astype(jnp.bfloat16)
    bc_p = jnp.pad(params["bc"], ((0, 0), (0, C_p - C))).astype(jnp.float32)

    grid = (B_p // tile_b, T_p // tile_t)
    kernel = functools.partial(_rvector_classifier_kernel, chunk_t=chunk_t)
    vmem_limit = _vmem_limit_bytes(tile_b, tile_t, chunk_t, F, H_p, Ea_p, EMB, C_p)

    def const_spec(shape, single_buffer):
        # Constant-index weight/bias blocks: single-buffer them so the default
        # double-buffering of never-changing weights doesn't eat VMEM.
        index_map = lambda b, t: (0,) * len(shape)
        if single_buffer and hasattr(pl, "Buffered"):
            try:
                return pl.BlockSpec(shape, index_map, pipeline_mode=pl.Buffered(1))
            except TypeError:
                pass
        return pl.BlockSpec(shape, index_map)

    def run(single_buffer_weights):
        return pl.pallas_call(
            kernel,
            out_shape=jax.ShapeDtypeStruct((B_p, C_p), jnp.float32),
            grid_spec=pltpu.PrefetchScalarGridSpec(
                num_scalar_prefetch=0,
                grid=grid,
                in_specs=[
                    pl.BlockSpec((tile_b, tile_t, F), lambda b, t: (b, t, 0)),
                    pl.BlockSpec((tile_b, 1), lambda b, t: (b, 0)),
                    pl.BlockSpec((tile_b, Ea_p), lambda b, t: (b, 0)),
                    const_spec((F, H_p), single_buffer_weights),
                    const_spec((1, H_p), single_buffer_weights),
                    const_spec((2 * H_p + Ea_p, EMB), single_buffer_weights),
                    const_spec((1, EMB), single_buffer_weights),
                    const_spec((EMB, C_p), single_buffer_weights),
                    const_spec((1, C_p), single_buffer_weights),
                ],
                out_specs=pl.BlockSpec((tile_b, C_p), lambda b, t: (b, 0)),
                scratch_shapes=[
                    pltpu.VMEM((tile_b, H_p), jnp.float32),
                    pltpu.VMEM((tile_b, H_p), jnp.float32),
                ],
            ),
            compiler_params=pltpu.CompilerParams(
                dimension_semantics=("parallel", "arbitrary"),
                vmem_limit_bytes=vmem_limit),
        )(mfcc_p, len_p, aux_p, w1_p, b1_p, w2_p, b2_p, wc_p, bc_p)

    try:
        out = run(single_buffer_weights=True)
    except Exception:
        # Installed Pallas doesn't accept pipeline_mode=pl.Buffered(1) on a
        # pallas_call BlockSpec: fall back to default double-buffered weights.
        out = run(single_buffer_weights=False)

    return out[:B, :C]


def rvector_classifier_ref(mfcc, lengths, gender, word_id, params):
    """Pure-JAX reference mirroring the kernel's bf16-operand / f32-accum math."""
    bf16 = jnp.bfloat16
    B, T, F = mfcc.shape
    h = jnp.dot(mfcc.astype(bf16).reshape(B * T, F), params["w1"].astype(bf16),
                preferred_element_type=jnp.float32) + params["b1"]
    h = jnp.maximum(h, 0.0).reshape(B, T, -1)
    lengths_f = lengths.reshape(B, 1).astype(jnp.float32)
    mask = (jnp.arange(T)[None, :] < lengths.reshape(B, 1))[..., None].astype(jnp.float32)
    n = jnp.maximum(lengths_f, 1.0)
    hm = h * mask
    mean = hm.sum(1) / n
    var = jnp.maximum((hm * h).sum(1) / n - mean * mean, 1e-6)
    std = jnp.sqrt(var)
    gemb = params["gtab"][gender]
    wemb = params["wtab"][word_id]
    feat = jnp.concatenate([mean, std, gemb, wemb], axis=1).astype(bf16)
    w2 = jnp.concatenate([params["w2m"], params["w2s"],
                          params["w2g"], params["w2w"]], axis=0).astype(bf16)
    pre = jnp.dot(feat, w2, preferred_element_type=jnp.float32) + params["b2"]
    emb = jnp.maximum(pre, 0.0).astype(bf16)
    return jnp.dot(emb, params["wc"].astype(bf16),
                   preferred_element_type=jnp.float32) + params["bc"]


def init_params(key, F, H, Eg, Ew, G, V, EMB=256, C=2):
    ks = jax.random.split(key, 10)
    s = lambda k, shape, fan: (jax.random.normal(k, shape, jnp.float32)
                               / jnp.sqrt(jnp.float32(fan)))
    return {
        "w1":  s(ks[0], (F, H), F),
        "b1":  jnp.zeros((1, H), jnp.float32),
        "gtab": s(ks[1], (G, Eg), Eg),
        "wtab": s(ks[2], (V, Ew), Ew),
        "w2m": s(ks[3], (H, EMB), 2 * H + Eg + Ew),
        "w2s": s(ks[4], (H, EMB), 2 * H + Eg + Ew),
        "w2g": s(ks[5], (Eg, EMB), 2 * H + Eg + Ew),
        "w2w": s(ks[6], (Ew, EMB), 2 * H + Eg + Ew),
        "b2":  jnp.zeros((1, EMB), jnp.float32),
        "wc":  s(ks[7], (EMB, C), EMB),
        "bc":  jnp.zeros((1, C), jnp.float32),
    }


if __name__ == "__main__":
    B, T, F = 12, 50, 32         # batch, frames, n_mfcc (B/T not tile-aligned)
    H, Eg, Ew = 64, 8, 16        # frame-encoder width, gender/word embedding dims
    G, V = 2, 16                 # gender classes, word vocab
    EMB, C = 256, 2              # rvector embedding dim, num_classes

    key = jax.random.PRNGKey(0)
    k_mfcc, k_len, k_g, k_w, k_p = jax.random.split(key, 5)

    mfcc = jax.random.normal(k_mfcc, (B, T, F), jnp.float32)
    lengths = jax.random.randint(k_len, (B,), 8, T + 1, jnp.int32)
    gender = jax.random.randint(k_g, (B,), 0, G, jnp.int32)
    word_id = jax.random.randint(k_w, (B,), 0, V, jnp.int32)
    params = init_params(k_p, F, H, Eg, Ew, G, V, EMB, C)

    # tile_t=32 / chunk_t=16 -> 2 time tiles x 2 in-kernel chunks per tile,
    # and B=12 -> 2 batch tiles: exercises the running-accumulator path, the
    # chunked inner loop, and the multi-batch-tile (megacore) path.
    logits = rvector_classifier(mfcc, lengths, gender, word_id, params,
                                tile_t=32, chunk_t=16)
    logits = jax.block_until_ready(logits)

    ref = rvector_classifier_ref(mfcc, lengths, gender, word_id, params)
    assert logits.shape == (B, C)
    assert jnp.allclose(logits, ref, rtol=1e-2, atol=1e-2), "mismatch vs reference"

    print("KERNEL_OK")
</pallas_src>

<mosaic_0001>
module attributes {stable_mosaic.version = 11 : i64} {
  func.func @_rvector_classifier_kernel(%arg0: i32, %arg1: i32, %arg2: memref<8x32x32xbf16, #tpu.memory_space<vmem>>, %arg3: memref<8x1xi32, #tpu.memory_space<vmem>>, %arg4: memref<8x128xbf16, #tpu.memory_space<vmem>>, %arg5: memref<32x128xbf16, #tpu.memory_space<vmem>>, %arg6: memref<1x128xf32, #tpu.memory_space<vmem>>, %arg7: memref<384x256xbf16, #tpu.memory_space<vmem>>, %arg8: memref<1x256xf32, #tpu.memory_space<vmem>>, %arg9: memref<256x128xbf16, #tpu.memory_space<vmem>>, %arg10: memref<1x128xf32, #tpu.memory_space<vmem>>, %arg11: memref<8x128xf32, #tpu.memory_space<vmem>>, %arg12: memref<8x128xf32, #tpu.memory_space<vmem>>, %arg13: memref<8x128xf32, #tpu.memory_space<vmem>>) attributes {dimension_semantics = [#tpu.dimension_semantics<parallel>, #tpu.dimension_semantics<arbitrary>], iteration_bounds = array<i64: 2, 2>, scalar_prefetch = 0 : i64, scratch_operands = 2 : i64, tpu.core_type = #tpu.core_type<tc>, window_params = [{transform_indices = @transform_0, window_bounds = array<i64: 8, 32, 32>}, {transform_indices = @transform_1, window_bounds = array<i64: 8, 1>}, {transform_indices = @transform_2, window_bounds = array<i64: 8, 128>}, {pipeline_mode = #tpu.pipeline_mode<synchronous>, transform_indices = @transform_3, window_bounds = array<i64: 32, 128>}, {pipeline_mode = #tpu.pipeline_mode<synchronous>, transform_indices = @transform_4, window_bounds = array<i64: 1, 128>}, {pipeline_mode = #tpu.pipeline_mode<synchronous>, transform_indices = @transform_5, window_bounds = array<i64: 384, 256>}, {pipeline_mode = #tpu.pipeline_mode<synchronous>, transform_indices = @transform_6, window_bounds = array<i64: 1, 256>}, {pipeline_mode = #tpu.pipeline_mode<synchronous>, transform_indices = @transform_7, window_bounds = array<i64: 256, 128>}, {pipeline_mode = #tpu.pipeline_mode<synchronous>, transform_indices = @transform_8, window_bounds = array<i64: 1, 128>}, {transform_indices = @transform_9, window_bounds = array<i64: 8, 128>}]} {
    %c0_i32 = arith.constant 0 : i32
    %0 = arith.cmpi eq, %arg1, %c0_i32 : i32
    %1 = arith.extui %0 : i1 to i32
    %c0_i32_0 = arith.constant 0 : i32
    %2 = arith.cmpi ne, %1, %c0_i32_0 : i32
    scf.if %2 {
      %cst_38 = arith.constant 0.000000e+00 : f32
      %73 = vector.broadcast %cst_38 : f32 to vector<8x128xf32>
      %c0_39 = arith.constant 0 : index
      %c0_40 = arith.constant 0 : index
      %74 = vector.load %arg12[%c0_39, %c0_40] : memref<8x128xf32, #tpu.memory_space<vmem>>, vector<8x128xf32>
      tpu.vector_store %arg12[%c0_39, %c0_40], %73 {strides = array<i32>} : memref<8x128xf32, #tpu.memory_space<vmem>>, vector<8x128xf32>,
      %cst_41 = arith.constant 0.000000e+00 : f32
      %75 = vector.broadcast %cst_41 : f32 to vector<8x128xf32>
      %c0_42 = arith.constant 0 : index
      %c0_43 = arith.constant 0 : index
      %76 = vector.load %arg13[%c0_42, %c0_43] : memref<8x128xf32, #tpu.memory_space<vmem>>, vector<8x128xf32>
      tpu.vector_store %arg13[%c0_42, %c0_43], %75 {strides = array<i32>} : memref<8x128xf32, #tpu.memory_space<vmem>>, vector<8x128xf32>,
    } else {
    }
    %c0 = arith.constant 0 : index
    %c0_1 = arith.constant 0 : index
    %3 = vector.load %arg3[%c0, %c0_1] : memref<8x1xi32, #tpu.memory_space<vmem>>, vector<8x1xi32>
    %c0_2 = arith.constant 0 : index
    %c0_3 = arith.constant 0 : index
    %4 = vector.load %arg5[%c0_2, %c0_3] : memref<32x128xbf16, #tpu.memory_space<vmem>>, vector<32x128xbf16>
    %c0_4 = arith.constant 0 : index
    %c0_5 = arith.constant 0 : index
    %5 = vector.load %arg6[%c0_4, %c0_5] : memref<1x128xf32, #tpu.memory_space<vmem>>, vector<1x128xf32>
    %c0_i32_6 = arith.constant 0 : i32
    %c16_i32 = arith.constant 16 : i32
    %6 = arith.muli %c0_i32_6, %c16_i32 : i32
    %7 = tpu.assume_multiple %6, 16 : i32
    %c0_7 = arith.constant 0 : index
    %8 = arith.index_cast %7 : i32 to index
    %c0_8 = arith.constant 0 : index
    %9 = vector.load %arg2[%c0_7, %8, %c0_8] : memref<8x32x32xbf16, #tpu.memory_space<vmem>>, vector<8x16x32xbf16>
    %10 = vector.shape_cast %9 : vector<8x16x32xbf16> to vector<128x32xbf16>
    %cst = arith.constant dense<0.000000e+00> : vector<128x128xf32>
    %11 = tpu.matmul %10, %4, %cst {dimension_numbers = #tpu.dot_dimension_numbers<[1], [0], [0], [1], [0, 0, 1, 1], [], []>} : vector<128x32xbf16>, vector<32x128xbf16>, vector<128x128xf32> -> vector<128x128xf32>
    %12 = vector.broadcast %5 : vector<1x128xf32> to vector<128x128xf32>
    %13 = arith.addf %11, %12 : vector<128x128xf32>
    %cst_9 = arith.constant 0.000000e+00 : f32
    %14 = vector.broadcast %cst_9 : f32 to vector<128x128xf32>
    %15 = arith.maximumf %13, %14 : vector<128x128xf32>
    %16 = vector.shape_cast %15 : vector<128x128xf32> to vector<8x16x128xf32>
    %17 = tpu.iota {dimensions = array<i32: 1>} : vector<8x16xi32>
    %c32_i32 = arith.constant 32 : i32
    %18 = arith.muli %arg1, %c32_i32 : i32
    %19 = arith.addi %18, %7 : i32
    %20 = vector.broadcast %19 : i32 to vector<8x16xi32>
    %21 = arith.addi %17, %20 : vector<8x16xi32>
    %22 = vector.broadcast %3 : vector<8x1xi32> to vector<8x16xi32>
    %23 = arith.cmpi slt, %21, %22 : vector<8x16xi32>
    %24 = arith.extui %23 : vector<8x16xi1> to vector<8x16xi32>
    %25 = arith.sitofp %24 : vector<8x16xi32> to vector<8x16xf32>
    %26 = vector.shape_cast %25 : vector<8x16xf32> to vector<8x16x1xf32>
    %27 = vector.broadcast %26 : vector<8x16x1xf32> to vector<8x16x128xf32>
    %28 = arith.mulf %16, %27 : vector<8x16x128xf32>
    %c0_10 = arith.constant 0 : index
    %c0_11 = arith.constant 0 : index
    %29 = vector.load %arg12[%c0_10, %c0_11] : memref<8x128xf32, #tpu.memory_space<vmem>>, vector<8x128xf32>
    %cst_12 = arith.constant dense<0.000000e+00> : vector<8x128xf32>
    %30 = vector.multi_reduction <add>, %28, %cst_12 [1] : vector<8x16x128xf32> to vector<8x128xf32>
    %31 = arith.addf %29, %30 : vector<8x128xf32>
    %c0_13 = arith.constant 0 : index
    %c0_14 = arith.constant 0 : index
    %32 = vector.load %arg12[%c0_13, %c0_14] : memref<8x128xf32, #tpu.memory_space<vmem>>, vector<8x128xf32>
    tpu.vector_store %arg12[%c0_13, %c0_14], %31 {strides = array<i32>} : memref<8x128xf32, #tpu.memory_space<vmem>>, vector<8x128xf32>,
    %c0_15 = arith.constant 0 : index
    %c0_16 = arith.constant 0 : index
    %33 = vector.load %arg13[%c0_15, %c0_16] : memref<8x128xf32, #tpu.memory_space<vmem>>, vector<8x128xf32>
    %34 = arith.mulf %28, %16 : vector<8x16x128xf32>
    %cst_17 = arith.constant dense<0.000000e+00> : vector<8x128xf32>
    %35 = vector.multi_reduction <add>, %34, %cst_17 [1] : vector<8x16x128xf32> to vector<8x128xf32>
    %36 = arith.addf %33, %35 : vector<8x128xf32>
    %c0_18 = arith.constant 0 : index
    %c0_19 = arith.constant 0 : index
    %37 = vector.load %arg13[%c0_18, %c0_19] : memref<8x128xf32, #tpu.memory_space<vmem>>, vector<8x128xf32>
    tpu.vector_store %arg13[%c0_18, %c0_19], %36 {strides = array<i32>} : memref<8x128xf32, #tpu.memory_space<vmem>>, vector<8x128xf32>,
    %c1_i32 = arith.constant 1 : i32
    %c16_i32_20 = arith.constant 16 : i32
    %38 = arith.muli %c1_i32, %c16_i32_20 : i32
    %39 = tpu.assume_multiple %38, 16 : i32
    %c0_21 = arith.constant 0 : index
    %40 = arith.index_cast %39 : i32 to index
    %c0_22 = arith.constant 0 : index
    %41 = vector.load %arg2[%c0_21, %40, %c0_22] : memref<8x32x32xbf16, #tpu.memory_space<vmem>>, vector<8x16x32xbf16>
    %42 = vector.shape_cast %41 : vector<8x16x32xbf16> to vector<128x32xbf16>
    %cst_23 = arith.constant dense<0.000000e+00> : vector<128x128xf32>
    %43 = tpu.matmul %42, %4, %cst_23 {dimension_numbers = #tpu.dot_dimension_numbers<[1], [0], [0], [1], [0, 0, 1, 1], [], []>} : vector<128x32xbf16>, vector<32x128xbf16>, vector<128x128xf32> -> vector<128x128xf32>
    %44 = vector.broadcast %5 : vector<1x128xf32> to vector<128x128xf32>
    %45 = arith.addf %43, %44 : vector<128x128xf32>
    %cst_24 = arith.constant 0.000000e+00 : f32
    %46 = vector.broadcast %cst_24 : f32 to vector<128x128xf32>
    %47 = arith.maximumf %45, %46 : vector<128x128xf32>
    %48 = vector.shape_cast %47 : vector<128x128xf32> to vector<8x16x128xf32>
    %49 = tpu.iota {dimensions = array<i32: 1>} : vector<8x16xi32>
    %c32_i32_25 = arith.constant 32 : i32
    %50 = arith.muli %arg1, %c32_i32_25 : i32
    %51 = arith.addi %50, %39 : i32
    %52 = vector.broadcast %51 : i32 to vector<8x16xi32>
    %53 = arith.addi %49, %52 : vector<8x16xi32>
    %54 = vector.broadcast %3 : vector<8x1xi32> to vector<8x16xi32>
    %55 = arith.cmpi slt, %53, %54 : vector<8x16xi32>
    %56 = arith.extui %55 : vector<8x16xi1> to vector<8x16xi32>
    %57 = arith.sitofp %56 : vector<8x16xi32> to vector<8x16xf32>
    %58 = vector.shape_cast %57 : vector<8x16xf32> to vector<8x16x1xf32>
    %59 = vector.broadcast %58 : vector<8x16x1xf32> to vector<8x16x128xf32>
    %60 = arith.mulf %48, %59 : vector<8x16x128xf32>
    %c0_26 = arith.constant 0 : index
    %c0_27 = arith.constant 0 : index
    %61 = vector.load %arg12[%c0_26, %c0_27] : memref<8x128xf32, #tpu.memory_space<vmem>>, vector<8x128xf32>
    %cst_28 = arith.constant dense<0.000000e+00> : vector<8x128xf32>
    %62 = vector.multi_reduction <add>, %60, %cst_28 [1] : vector<8x16x128xf32> to vector<8x128xf32>
    %63 = arith.addf %61, %62 : vector<8x128xf32>
    %c0_29 = arith.constant 0 : index
    %c0_30 = arith.constant 0 : index
    %64 = vector.load %arg12[%c0_29, %c0_30] : memref<8x128xf32, #tpu.memory_space<vmem>>, vector<8x128xf32>
    tpu.vector_store %arg12[%c0_29, %c0_30], %63 {strides = array<i32>} : memref<8x128xf32, #tpu.memory_space<vmem>>, vector<8x128xf32>,
    %c0_31 = arith.constant 0 : index
    %c0_32 = arith.constant 0 : index
    %65 = vector.load %arg13[%c0_31, %c0_32] : memref<8x128xf32, #tpu.memory_space<vmem>>, vector<8x128xf32>
    %66 = arith.mulf %60, %48 : vector<8x16x128xf32>
    %cst_33 = arith.constant dense<0.000000e+00> : vector<8x128xf32>
    %67 = vector.multi_reduction <add>, %66, %cst_33 [1] : vector<8x16x128xf32> to vector<8x128xf32>
    %68 = arith.addf %65, %67 : vector<8x128xf32>
    %c0_34 = arith.constant 0 : index
    %c0_35 = arith.constant 0 : index
    %69 = vector.load %arg13[%c0_34, %c0_35] : memref<8x128xf32, #tpu.memory_space<vmem>>, vector<8x128xf32>
    tpu.vector_store %arg13[%c0_34, %c0_35], %68 {strides = array<i32>} : memref<8x128xf32, #tpu.memory_space<vmem>>, vector<8x128xf32>,
    %c2_i32 = arith.constant 2 : i32
    %c1_i32_36 = arith.constant 1 : i32
    %70 = arith.cmpi eq, %arg1, %c1_i32_36 : i32
    %71 = arith.extui %70 : i1 to i32
    %c0_i32_37 = arith.constant 0 : i32
    %72 = arith.cmpi ne, %71, %c0_i32_37 : i32
    scf.if %72 {
      %73 = arith.sitofp %3 : vector<8x1xi32> to vector<8x1xf32>
      %cst_38 = arith.constant 1.000000e+00 : f32
      %74 = vector.broadcast %cst_38 : f32 to vector<8x1xf32>
      %75 = arith.maximumf %73, %74 : vector<8x1xf32>
      %76 = tpu.reciprocal %75 {approx = true} : vector<8x1xf32> -> vector<8x1xf32>
      %c0_39 = arith.constant 0 : index
      %c0_40 = arith.constant 0 : index
      %77 = vector.load %arg12[%c0_39, %c0_40] : memref<8x128xf32, #tpu.memory_space<vmem>>, vector<8x128xf32>
      %78 = vector.broadcast %76 : vector<8x1xf32> to vector<8x128xf32>
      %79 = arith.mulf %77, %78 : vector<8x128xf32>
      %c0_41 = arith.constant 0 : index
      %c0_42 = arith.constant 0 : index
      %80 = vector.load %arg13[%c0_41, %c0_42] : memref<8x128xf32, #tpu.memory_space<vmem>>, vector<8x128xf32>
      %81 = vector.broadcast %76 : vector<8x1xf32> to vector<8x128xf32>
      %82 = arith.mulf %80, %81 : vector<8x128xf32>
      %83 = arith.mulf %79, %79 : vector<8x128xf32>
      %84 = arith.subf %82, %83 : vector<8x128xf32>
      %cst_43 = arith.constant 9.99999997E-7 : f32
      %85 = vector.broadcast %cst_43 : f32 to vector<8x128xf32>
      %86 = arith.maximumf %84, %85 : vector<8x128xf32>
      %87 = math.sqrt %86 : vector<8x128xf32>
      %88 = arith.truncf %79 : vector<8x128xf32> to vector<8x128xbf16>
      %c0_44 = arith.constant 0 : index
      %c0_45 = arith.constant 0 : index
      %89 = vector.load %arg7[%c0_44, %c0_45] : memref<384x256xbf16, #tpu.memory_space<vmem>>, vector<128x256xbf16>
      %cst_46 = arith.constant dense<0.000000e+00> : vector<8x256xf32>
      %90 = tpu.matmul %88, %89, %cst_46 {dimension_numbers = #tpu.dot_dimension_numbers<[1], [0], [0], [1], [0, 0, 1, 1], [], []>} : vector<8x128xbf16>, vector<128x256xbf16>, vector<8x256xf32> -> vector<8x256xf32>
      %91 = arith.truncf %87 : vector<8x128xf32> to vector<8x128xbf16>
      %c128 = arith.constant 128 : index
      %c0_47 = arith.constant 0 : index
      %92 = vector.load %arg7[%c128, %c0_47] : memref<384x256xbf16, #tpu.memory_space<vmem>>, vector<128x256xbf16>
      %cst_48 = arith.constant dense<0.000000e+00> : vector<8x256xf32>
      %93 = tpu.matmul %91, %92, %cst_48 {dimension_numbers = #tpu.dot_dimension_numbers<[1], [0], [0], [1], [0, 0, 1, 1], [], []>} : vector<8x128xbf16>, vector<128x256xbf16>, vector<8x256xf32> -> vector<8x256xf32>
      %94 = arith.addf %90, %93 : vector<8x256xf32>
      %c0_49 = arith.constant 0 : index
      %c0_50 = arith.constant 0 : index
      %95 = vector.load %arg4[%c0_49, %c0_50] : memref<8x128xbf16, #tpu.memory_space<vmem>>, vector<8x128xbf16>
      %c256 = arith.constant 256 : index
      %c0_51 = arith.constant 0 : index
      %96 = vector.load %arg7[%c256, %c0_51] : memref<384x256xbf16, #tpu.memory_space<vmem>>, vector<128x256xbf16>
      %cst_52 = arith.constant dense<0.000000e+00> : vector<8x256xf32>
      %97 = tpu.matmul %95, %96, %cst_52 {dimension_numbers = #tpu.dot_dimension_numbers<[1], [0], [0], [1], [0, 0, 1, 1], [], []>} : vector<8x128xbf16>, vector<128x256xbf16>, vector<8x256xf32> -> vector<8x256xf32>
      %98 = arith.addf %94, %97 : vector<8x256xf32>
      %c0_53 = arith.constant 0 : index
      %c0_54 = arith.constant 0 : index
      %99 = vector.load %arg8[%c0_53, %c0_54] : memref<1x256xf32, #tpu.memory_space<vmem>>, vector<1x256xf32>
      %100 = vector.broadcast %99 : vector<1x256xf32> to vector<8x256xf32>
      %101 = arith.addf %98, %100 : vector<8x256xf32>
      %cst_55 = arith.constant 0.000000e+00 : f32
      %102 = vector.broadcast %cst_55 : f32 to vector<8x256xf32>
      %103 = arith.maximumf %101, %102 : vector<8x256xf32>
      %104 = arith.truncf %103 : vector<8x256xf32> to vector<8x256xbf16>
      %c0_56 = arith.constant 0 : index
      %c0_57 = arith.constant 0 : index
      %105 = vector.load %arg9[%c0_56, %c0_57] : memref<256x128xbf16, #tpu.memory_space<vmem>>, vector<256x128xbf16>
      %cst_58 = arith.constant dense<0.000000e+00> : vector<8x128xf32>
      %106 = tpu.matmul %104, %105, %cst_58 {dimension_numbers = #tpu.dot_dimension_numbers<[1], [0], [0], [1], [0, 0, 1, 1], [], []>} : vector<8x256xbf16>, vector<256x128xbf16>, vector<8x128xf32> -> vector<8x128xf32>
      %c0_59 = arith.constant 0 : index
      %c0_60 = arith.constant 0 : index
      %107 = vector.load %arg10[%c0_59, %c0_60] : memref<1x128xf32, #tpu.memory_space<vmem>>, vector<1x128xf32>
      %108 = vector.broadcast %107 : vector<1x128xf32> to vector<8x128xf32>
      %109 = arith.addf %106, %108 : vector<8x128xf32>
      %c0_61 = arith.constant 0 : index
      %c0_62 = arith.constant 0 : index
      %110 = vector.load %arg11[%c0_61, %c0_62] : memref<8x128xf32, #tpu.memory_space<vmem>>, vector<8x128xf32>
      tpu.vector_store %arg11[%c0_61, %c0_62], %109 {strides = array<i32>} : memref<8x128xf32, #tpu.memory_space<vmem>>, vector<8x128xf32>,
    } else {
    }
    return
  }
  func.func @transform_0(%arg0: i32, %arg1: i32) -> (i32, i32, i32) {
    %c0_i32 = arith.constant 0 : i32
    %c0_i32_0 = arith.constant 0 : i32
    return %arg0, %arg1, %c0_i32 : i32, i32, i32
  }
  func.func @transform_1(%arg0: i32, %arg1: i32) -> (i32, i32) {
    %c0_i32 = arith.constant 0 : i32
    %c0_i32_0 = arith.constant 0 : i32
    return %arg0, %c0_i32 : i32, i32
  }
  func.func @transform_2(%arg0: i32, %arg1: i32) -> (i32, i32) {
    %c0_i32 = arith.constant 0 : i32
    %c0_i32_0 = arith.constant 0 : i32
    return %arg0, %c0_i32 : i32, i32
  }
  func.func @transform_3(%arg0: i32, %arg1: i32) -> (i32, i32) {
    %c0_i32 = arith.constant 0 : i32
    %c0_i32_0 = arith.constant 0 : i32
    %c0_i32_1 = arith.constant 0 : i32
    return %c0_i32, %c0_i32_0 : i32, i32
  }
  func.func @transform_4(%arg0: i32, %arg1: i32) -> (i32, i32) {
    %c0_i32 = arith.constant 0 : i32
    %c0_i32_0 = arith.constant 0 : i32
    %c0_i32_1 = arith.constant 0 : i32
    return %c0_i32, %c0_i32_0 : i32, i32
  }
  func.func @transform_5(%arg0: i32, %arg1: i32) -> (i32, i32) {
    %c0_i32 = arith.constant 0 : i32
    %c0_i32_0 = arith.constant 0 : i32
    %c0_i32_1 = arith.constant 0 : i32
    return %c0_i32, %c0_i32_0 : i32, i32
  }
  func.func @transform_6(%arg0: i32, %arg1: i32) -> (i32, i32) {
    %c0_i32 = arith.constant 0 : i32
    %c0_i32_0 = arith.constant 0 : i32
    %c0_i32_1 = arith.constant 0 : i32
    return %c0_i32, %c0_i32_0 : i32, i32
  }
  func.func @transform_7(%arg0: i32, %arg1: i32) -> (i32, i32) {
    %c0_i32 = arith.constant 0 : i32
    %c0_i32_0 = arith.constant 0 : i32
    %c0_i32_1 = arith.constant 0 : i32
    return %c0_i32, %c0_i32_0 : i32, i32
  }
  func.func @transform_8(%arg0: i32, %arg1: i32) -> (i32, i32) {
    %c0_i32 = arith.constant 0 : i32
    %c0_i32_0 = arith.constant 0 : i32
    %c0_i32_1 = arith.constant 0 : i32
    return %c0_i32, %c0_i32_0 : i32, i32
  }
  func.func @transform_9(%arg0: i32, %arg1: i32) -> (i32, i32) {
    %c0_i32 = arith.constant 0 : i32
    %c0_i32_0 = arith.constant 0 : i32
    return %arg0, %c0_i32 : i32, i32
  }
}

module attributes {stable_mosaic.version = 11 : i64} {
  func.func @_rvector_classifier_kernel(%arg0: i32, %arg1: i32, %arg2: memref<8x32x32xbf16, #tpu.memory_space<vmem>>, %arg3: memref<8x1xi32, #tpu.memory_space<vmem>>, %arg4: memref<8x128xbf16, #tpu.memory_space<vmem>>, %arg5: memref<32x128xbf16, #tpu.memory_space<vmem>>, %arg6: memref<1x128xf32, #tpu.memory_space<vmem>>, %arg7: memref<384x256xbf16, #tpu.memory_space<vmem>>, %arg8: memref<1x256xf32, #tpu.memory_space<vmem>>, %arg9: memref<256x128xbf16, #tpu.memory_space<vmem>>, %arg10: memref<1x128xf32, #tpu.memory_space<vmem>>, %arg11: memref<8x128xf32, #tpu.memory_space<vmem>>, %arg12: memref<8x128xf32, #tpu.memory_space<vmem>>, %arg13: memref<8x128xf32, #tpu.memory_space<vmem>>) attributes {dimension_semantics = [#tpu.dimension_semantics<parallel>, #tpu.dimension_semantics<arbitrary>], iteration_bounds = array<i64: 2, 2>, scalar_prefetch = 0 : i64, scratch_operands = 2 : i64, tpu.core_type = #tpu.core_type<tc>, window_params = [{transform_indices = @transform_0, window_bounds = array<i64: 8, 32, 32>}, {transform_indices = @transform_1, window_bounds = array<i64: 8, 1>}, {transform_indices = @transform_2, window_bounds = array<i64: 8, 128>}, {pipeline_mode = #tpu.pipeline_mode<synchronous>, transform_indices = @transform_3, window_bounds = array<i64: 32, 128>}, {pipeline_mode = #tpu.pipeline_mode<synchronous>, transform_indices = @transform_4, window_bounds = array<i64: 1, 128>}, {pipeline_mode = #tpu.pipeline_mode<synchronous>, transform_indices = @transform_5, window_bounds = array<i64: 384, 256>}, {pipeline_mode = #tpu.pipeline_mode<synchronous>, transform_indices = @transform_6, window_bounds = array<i64: 1, 256>}, {pipeline_mode = #tpu.pipeline_mode<synchronous>, transform_indices = @transform_7, window_bounds = array<i64: 256, 128>}, {pipeline_mode = #tpu.pipeline_mode<synchronous>, transform_indices = @transform_8, window_bounds = array<i64: 1, 128>}, {transform_indices = @transform_9, window_bounds = array<i64: 8, 128>}]} {
    %c0_i32 = arith.constant 0 : i32
    %0 = arith.cmpi eq, %arg1, %c0_i32 : i32
    %1 = arith.extui %0 : i1 to i32
    %c0_i32_0 = arith.constant 0 : i32
    %2 = arith.cmpi ne, %1, %c0_i32_0 : i32
    scf.if %2 {
      %cst_38 = arith.constant 0.000000e+00 : f32
      %73 = vector.broadcast %cst_38 : f32 to vector<8x128xf32>
      %c0_39 = arith.constant 0 : index
      %c0_40 = arith.constant 0 : index
      %74 = vector.load %arg12[%c0_39, %c0_40] : memref<8x128xf32, #tpu.memory_space<vmem>>, vector<8x128xf32>
      tpu.vector_store %arg12[%c0_39, %c0_40], %73 {strides = array<i32>} : memref<8x128xf32, #tpu.memory_space<vmem>>, vector<8x128xf32>,
      %cst_41 = arith.constant 0.000000e+00 : f32
      %75 = vector.broadcast %cst_41 : f32 to vector<8x128xf32>
      %c0_42 = arith.constant 0 : index
      %c0_43 = arith.constant 0 : index
      %76 = vector.load %arg13[%c0_42, %c0_43] : memref<8x128xf32, #tpu.memory_space<vmem>>, vector<8x128xf32>
      tpu.vector_store %arg13[%c0_42, %c0_43], %75 {strides = array<i32>} : memref<8x128xf32, #tpu.memory_space<vmem>>, vector<8x128xf32>,
    } else {
    }
    %c0 = arith.constant 0 : index
    %c0_1 = arith.constant 0 : index
    %3 = vector.load %arg3[%c0, %c0_1] : memref<8x1xi32, #tpu.memory_space<vmem>>, vector<8x1xi32>
    %c0_2 = arith.constant 0 : index
    %c0_3 = arith.constant 0 : index
    %4 = vector.load %arg5[%c0_2, %c0_3] : memref<32x128xbf16, #tpu.memory_space<vmem>>, vector<32x128xbf16>
    %c0_4 = arith.constant 0 : index
    %c0_5 = arith.constant 0 : index
    %5 = vector.load %arg6[%c0_4, %c0_5] : memref<1x128xf32, #tpu.memory_space<vmem>>, vector<1x128xf32>
    %c0_i32_6 = arith.constant 0 : i32
    %c16_i32 = arith.constant 16 : i32
    %6 = arith.muli %c0_i32_6, %c16_i32 : i32
    %7 = tpu.assume_multiple %6, 16 : i32
    %c0_7 = arith.constant 0 : index
    %8 = arith.index_cast %7 : i32 to index
    %c0_8 = arith.constant 0 : index
    %9 = vector.load %arg2[%c0_7, %8, %c0_8] : memref<8x32x32xbf16, #tpu.memory_space<vmem>>, vector<8x16x32xbf16>
    %10 = vector.shape_cast %9 : vector<8x16x32xbf16> to vector<128x32xbf16>
    %cst = arith.constant dense<0.000000e+00> : vector<128x128xf32>
    %11 = tpu.matmul %10, %4, %cst {dimension_numbers = #tpu.dot_dimension_numbers<[1], [0], [0], [1], [0, 0, 1, 1], [], []>} : vector<128x32xbf16>, vector<32x128xbf16>, vector<128x128xf32> -> vector<128x128xf32>
    %12 = vector.broadcast %5 : vector<1x128xf32> to vector<128x128xf32>
    %13 = arith.addf %11, %12 : vector<128x128xf32>
    %cst_9 = arith.constant 0.000000e+00 : f32
    %14 = vector.broadcast %cst_9 : f32 to vector<128x128xf32>
    %15 = arith.maximumf %13, %14 : vector<128x128xf32>
    %16 = vector.shape_cast %15 : vector<128x128xf32> to vector<8x16x128xf32>
    %17 = tpu.iota {dimensions = array<i32: 1>} : vector<8x16xi32>
    %c32_i32 = arith.constant 32 : i32
    %18 = arith.muli %arg1, %c32_i32 : i32
    %19 = arith.addi %18, %7 : i32
    %20 = vector.broadcast %19 : i32 to vector<8x16xi32>
    %21 = arith.addi %17, %20 : vector<8x16xi32>
    %22 = vector.broadcast %3 : vector<8x1xi32> to vector<8x16xi32>
    %23 = arith.cmpi slt, %21, %22 : vector<8x16xi32>
    %24 = arith.extui %23 : vector<8x16xi1> to vector<8x16xi32>
    %25 = arith.sitofp %24 : vector<8x16xi32> to vector<8x16xf32>
    %26 = vector.shape_cast %25 : vector<8x16xf32> to vector<8x16x1xf32>
    %27 = vector.broadcast %26 : vector<8x16x1xf32> to vector<8x16x128xf32>
    %28 = arith.mulf %16, %27 : vector<8x16x128xf32>
    %c0_10 = arith.constant 0 : index
    %c0_11 = arith.constant 0 : index
    %29 = vector.load %arg12[%c0_10, %c0_11] : memref<8x128xf32, #tpu.memory_space<vmem>>, vector<8x128xf32>
    %cst_12 = arith.constant dense<0.000000e+00> : vector<8x128xf32>
    %30 = vector.multi_reduction <add>, %28, %cst_12 [1] : vector<8x16x128xf32> to vector<8x128xf32>
    %31 = arith.addf %29, %30 : vector<8x128xf32>
    %c0_13 = arith.constant 0 : index
    %c0_14 = arith.constant 0 : index
    %32 = vector.load %arg12[%c0_13, %c0_14] : memref<8x128xf32, #tpu.memory_space<vmem>>, vector<8x128xf32>
    tpu.vector_store %arg12[%c0_13, %c0_14], %31 {strides = array<i32>} : memref<8x128xf32, #tpu.memory_space<vmem>>, vector<8x128xf32>,
    %c0_15 = arith.constant 0 : index
    %c0_16 = arith.constant 0 : index
    %33 = vector.load %arg13[%c0_15, %c0_16] : memref<8x128xf32, #tpu.memory_space<vmem>>, vector<8x128xf32>
    %34 = arith.mulf %28, %16 : vector<8x16x128xf32>
    %cst_17 = arith.constant dense<0.000000e+00> : vector<8x128xf32>
    %35 = vector.multi_reduction <add>, %34, %cst_17 [1] : vector<8x16x128xf32> to vector<8x128xf32>
    %36 = arith.addf %33, %35 : vector<8x128xf32>
    %c0_18 = arith.constant 0 : index
    %c0_19 = arith.constant 0 : index
    %37 = vector.load %arg13[%c0_18, %c0_19] : memref<8x128xf32, #tpu.memory_space<vmem>>, vector<8x128xf32>
    tpu.vector_store %arg13[%c0_18, %c0_19], %36 {strides = array<i32>} : memref<8x128xf32, #tpu.memory_space<vmem>>, vector<8x128xf32>,
    %c1_i32 = arith.constant 1 : i32
    %c16_i32_20 = arith.constant 16 : i32
    %38 = arith.muli %c1_i32, %c16_i32_20 : i32
    %39 = tpu.assume_multiple %38, 16 : i32
    %c0_21 = arith.constant 0 : index
    %40 = arith.index_cast %39 : i32 to index
    %c0_22 = arith.constant 0 : index
    %41 = vector.load %arg2[%c0_21, %40, %c0_22] : memref<8x32x32xbf16, #tpu.memory_space<vmem>>, vector<8x16x32xbf16>
    %42 = vector.shape_cast %41 : vector<8x16x32xbf16> to vector<128x32xbf16>
    %cst_23 = arith.constant dense<0.000000e+00> : vector<128x128xf32>
    %43 = tpu.matmul %42, %4, %cst_23 {dimension_numbers = #tpu.dot_dimension_numbers<[1], [0], [0], [1], [0, 0, 1, 1], [], []>} : vector<128x32xbf16>, vector<32x128xbf16>, vector<128x128xf32> -> vector<128x128xf32>
    %44 = vector.broadcast %5 : vector<1x128xf32> to vector<128x128xf32>
    %45 = arith.addf %43, %44 : vector<128x128xf32>
    %cst_24 = arith.constant 0.000000e+00 : f32
    %46 = vector.broadcast %cst_24 : f32 to vector<128x128xf32>
    %47 = arith.maximumf %45, %46 : vector<128x128xf32>
    %48 = vector.shape_cast %47 : vector<128x128xf32> to vector<8x16x128xf32>
    %49 = tpu.iota {dimensions = array<i32: 1>} : vector<8x16xi32>
    %c32_i32_25 = arith.constant 32 : i32
    %50 = arith.muli %arg1, %c32_i32_25 : i32
    %51 = arith.addi %50, %39 : i32
    %52 = vector.broadcast %51 : i32 to vector<8x16xi32>
    %53 = arith.addi %49, %52 : vector<8x16xi32>
    %54 = vector.broadcast %3 : vector<8x1xi32> to vector<8x16xi32>
    %55 = arith.cmpi slt, %53, %54 : vector<8x16xi32>
    %56 = arith.extui %55 : vector<8x16xi1> to vector<8x16xi32>
    %57 = arith.sitofp %56 : vector<8x16xi32> to vector<8x16xf32>
    %58 = vector.shape_cast %57 : vector<8x16xf32> to vector<8x16x1xf32>
    %59 = vector.broadcast %58 : vector<8x16x1xf32> to vector<8x16x128xf32>
    %60 = arith.mulf %48, %59 : vector<8x16x128xf32>
    %c0_26 = arith.constant 0 : index
    %c0_27 = arith.constant 0 : index
    %61 = vector.load %arg12[%c0_26, %c0_27] : memref<8x128xf32, #tpu.memory_space<vmem>>, vector<8x128xf32>
    %cst_28 = arith.constant dense<0.000000e+00> : vector<8x128xf32>
    %62 = vector.multi_reduction <add>, %60, %cst_28 [1] : vector<8x16x128xf32> to vector<8x128xf32>
    %63 = arith.addf %61, %62 : vector<8x128xf32>
    %c0_29 = arith.constant 0 : index
    %c0_30 = arith.constant 0 : index
    %64 = vector.load %arg12[%c0_29, %c0_30] : memref<8x128xf32, #tpu.memory_space<vmem>>, vector<8x128xf32>
    tpu.vector_store %arg12[%c0_29, %c0_30], %63 {strides = array<i32>} : memref<8x128xf32, #tpu.memory_space<vmem>>, vector<8x128xf32>,
    %c0_31 = arith.constant 0 : index
    %c0_32 = arith.constant 0 : index
    %65 = vector.load %arg13[%c0_31, %c0_32] : memref<8x128xf32, #tpu.memory_space<vmem>>, vector<8x128xf32>
    %66 = arith.mulf %60, %48 : vector<8x16x128xf32>
    %cst_33 = arith.constant dense<0.000000e+00> : vector<8x128xf32>
    %67 = vector.multi_reduction <add>, %66, %cst_33 [1] : vector<8x16x128xf32> to vector<8x128xf32>
    %68 = arith.addf %65, %67 : vector<8x128xf32>
    %c0_34 = arith.constant 0 : index
    %c0_35 = arith.constant 0 : index
    %69 = vector.load %arg13[%c0_34, %c0_35] : memref<8x128xf32, #tpu.memory_space<vmem>>, vector<8x128xf32>
    tpu.vector_store %arg13[%c0_34, %c0_35], %68 {strides = array<i32>} : memref<8x128xf32, #tpu.memory_space<vmem>>, vector<8x128xf32>,
    %c2_i32 = arith.constant 2 : i32
    %c1_i32_36 = arith.constant 1 : i32
    %70 = arith.cmpi eq, %arg1, %c1_i32_36 : i32
    %71 = arith.extui %70 : i1 to i32
    %c0_i32_37 = arith.constant 0 : i32
    %72 = arith.cmpi ne, %71, %c0_i32_37 : i32
    scf.if %72 {
      %73 = arith.sitofp %3 : vector<8x1xi32> to vector<8x1xf32>
      %cst_38 = arith.constant 1.000000e+00 : f32
      %74 = vector.broadcast %cst_38 : f32 to vector<8x1xf32>
      %75 = arith.maximumf %73, %74 : vector<8x1xf32>
      %76 = tpu.reciprocal %75 {approx = true} : vector<8x1xf32> -> vector<8x1xf32>
      %c0_39 = arith.constant 0 : index
      %c0_40 = arith.constant 0 : index
      %77 = vector.load %arg12[%c0_39, %c0_40] : memref<8x128xf32, #tpu.memory_space<vmem>>, vector<8x128xf32>
      %78 = vector.broadcast %76 : vector<8x1xf32> to vector<8x128xf32>
      %79 = arith.mulf %77, %78 : vector<8x128xf32>
      %c0_41 = arith.constant 0 : index
      %c0_42 = arith.constant 0 : index
      %80 = vector.load %arg13[%c0_41, %c0_42] : memref<8x128xf32, #tpu.memory_space<vmem>>, vector<8x128xf32>
      %81 = vector.broadcast %76 : vector<8x1xf32> to vector<8x128xf32>
      %82 = arith.mulf %80, %81 : vector<8x128xf32>
      %83 = arith.mulf %79, %79 : vector<8x128xf32>
      %84 = arith.subf %82, %83 : vector<8x128xf32>
      %cst_43 = arith.constant 9.99999997E-7 : f32
      %85 = vector.broadcast %cst_43 : f32 to vector<8x128xf32>
      %86 = arith.maximumf %84, %85 : vector<8x128xf32>
      %87 = math.sqrt %86 : vector<8x128xf32>
      %88 = arith.truncf %79 : vector<8x128xf32> to vector<8x128xbf16>
      %c0_44 = arith.constant 0 : index
      %c0_45 = arith.constant 0 : index
      %89 = vector.load %arg7[%c0_44, %c0_45] : memref<384x256xbf16, #tpu.memory_space<vmem>>, vector<128x256xbf16>
      %cst_46 = arith.constant dense<0.000000e+00> : vector<8x256xf32>
      %90 = tpu.matmul %88, %89, %cst_46 {dimension_numbers = #tpu.dot_dimension_numbers<[1], [0], [0], [1], [0, 0, 1, 1], [], []>} : vector<8x128xbf16>, vector<128x256xbf16>, vector<8x256xf32> -> vector<8x256xf32>
      %91 = arith.truncf %87 : vector<8x128xf32> to vector<8x128xbf16>
      %c128 = arith.constant 128 : index
      %c0_47 = arith.constant 0 : index
      %92 = vector.load %arg7[%c128, %c0_47] : memref<384x256xbf16, #tpu.memory_space<vmem>>, vector<128x256xbf16>
      %cst_48 = arith.constant dense<0.000000e+00> : vector<8x256xf32>
      %93 = tpu.matmul %91, %92, %cst_48 {dimension_numbers = #tpu.dot_dimension_numbers<[1], [0], [0], [1], [0, 0, 1, 1], [], []>} : vector<8x128xbf16>, vector<128x256xbf16>, vector<8x256xf32> -> vector<8x256xf32>
      %94 = arith.addf %90, %93 : vector<8x256xf32>
      %c0_49 = arith.constant 0 : index
      %c0_50 = arith.constant 0 : index
      %95 = vector.load %arg4[%c0_49, %c0_50] : memref<8x128xbf16, #tpu.memory_space<vmem>>, vector<8x128xbf16>
      %c256 = arith.constant 256 : index
      %c0_51 = arith.constant 0 : index
      %96 = vector.load %arg7[%c256, %c0_51] : memref<384x256xbf16, #tpu.memory_space<vmem>>, vector<128x256xbf16>
      %cst_52 = arith.constant dense<0.000000e+00> : vector<8x256xf32>
      %97 = tpu.matmul %95, %96, %cst_52 {dimension_numbers = #tpu.dot_dimension_numbers<[1], [0], [0], [1], [0, 0, 1, 1], [], []>} : vector<8x128xbf16>, vector<128x256xbf16>, vector<8x256xf32> -> vector<8x256xf32>
      %98 = arith.addf %94, %97 : vector<8x256xf32>
      %c0_53 = arith.constant 0 : index
      %c0_54 = arith.constant 0 : index
      %99 = vector.load %arg8[%c0_53, %c0_54] : memref<1x256xf32, #tpu.memory_space<vmem>>, vector<1x256xf32>
      %100 = vector.broadcast %99 : vector<1x256xf32> to vector<8x256xf32>
      %101 = arith.addf %98, %100 : vector<8x256xf32>
      %cst_55 = arith.constant 0.000000e+00 : f32
      %102 = vector.broadcast %cst_55 : f32 to vector<8x256xf32>
      %103 = arith.maximumf %101, %102 : vector<8x256xf32>
      %104 = arith.truncf %103 : vector<8x256xf32> to vector<8x256xbf16>
      %c0_56 = arith.constant 0 : index
      %c0_57 = arith.constant 0 : index
      %105 = vector.load %arg9[%c0_56, %c0_57] : memref<256x128xbf16, #tpu.memory_space<vmem>>, vector<256x128xbf16>
      %cst_58 = arith.constant dense<0.000000e+00> : vector<8x128xf32>
      %106 = tpu.matmul %104, %105, %cst_58 {dimension_numbers = #tpu.dot_dimension_numbers<[1], [0], [0], [1], [0, 0, 1, 1], [], []>} : vector<8x256xbf16>, vector<256x128xbf16>, vector<8x128xf32> -> vector<8x128xf32>
      %c0_59 = arith.constant 0 : index
      %c0_60 = arith.constant 0 : index
      %107 = vector.load %arg10[%c0_59, %c0_60] : memref<1x128xf32, #tpu.memory_space<vmem>>, vector<1x128xf32>
      %108 = vector.broadcast %107 : vector<1x128xf32> to vector<8x128xf32>
      %109 = arith.addf %106, %108 : vector<8x128xf32>
      %c0_61 = arith.constant 0 : index
      %c0_62 = arith.constant 0 : index
      %110 = vector.load %arg11[%c0_61, %c0_62] : memref<8x128xf32, #tpu.memory_space<vmem>>, vector<8x128xf32>
      tpu.vector_store %arg11[%c0_61, %c0_62], %109 {strides = array<i32>} : memref<8x128xf32, #tpu.memory_space<vmem>>, vector<8x128xf32>,
    } else {
    }
    return
  }
  func.func @transform_0(%arg0: i32, %arg1: i32) -> (i32, i32, i32) {
    %c0_i32 = arith.constant 0 : i32
    %c0_i32_0 = arith.constant 0 : i32
    return %arg0, %arg1, %c0_i32 : i32, i32, i32
  }
  func.func @transform_1(%arg0: i32, %arg1: i32) -> (i32, i32) {
    %c0_i32 = arith.constant 0 : i32
    %c0_i32_0 = arith.constant 0 : i32
    return %arg0, %c0_i32 : i32, i32
  }
  func.func @transform_2(%arg0: i32, %arg1: i32) -> (i32, i32) {
    %c0_i32 = arith.constant 0 : i32
    %c0_i32_0 = arith.constant 0 : i32
    return %arg0, %c0_i32 : i32, i32
  }
  func.func @transform_3(%arg0: i32, %arg1: i32) -> (i32, i32) {
    %c0_i32 = arith.constant 0 : i32
    %c0_i32_0 = arith.constant 0 : i32
    %c0_i32_1 = arith.constant 0 : i32
    return %c0_i32, %c0_i32_0 : i32, i32
  }
  func.func @transform_4(%arg0: i32, %arg1: i32) -> (i32, i32) {
    %c0_i32 = arith.constant 0 : i32
    %c0_i32_0 = arith.constant 0 : i32
    %c0_i32_1 = arith.constant 0 : i32
    return %c0_i32, %c0_i32_0 : i32, i32
  }
  func.func @transform_5(%arg0: i32, %arg1: i32) -> (i32, i32) {
    %c0_i32 = arith.constant 0 : i32
    %c0_i32_0 = arith.constant 0 : i32
    %c0_i32_1 = arith.constant 0 : i32
    return %c0_i32, %c0_i32_0 : i32, i32
  }
  func.func @transform_6(%arg0: i32, %arg1: i32) -> (i32, i32) {
    %c0_i32 = arith.constant 0 : i32
    %c0_i32_0 = arith.constant 0 : i32
    %c0_i32_1 = arith.constant 0 : i32
    return %c0_i32, %c0_i32_0 : i32, i32
  }
  func.func @transform_7(%arg0: i32, %arg1: i32) -> (i32, i32) {
    %c0_i32 = arith.constant 0 : i32
    %c0_i32_0 = arith.constant 0 : i32
    %c0_i32_1 = arith.constant 0 : i32
    return %c0_i32, %c0_i32_0 : i32, i32
  }
  func.func @transform_8(%arg0: i32, %arg1: i32) -> (i32, i32) {
    %c0_i32 = arith.constant 0 : i32
    %c0_i32_0 = arith.constant 0 : i32
    %c0_i32_1 = arith.constant 0 : i32
    return %c0_i32, %c0_i32_0 : i32, i32
  }
  func.func @transform_9(%arg0: i32, %arg1: i32) -> (i32, i32) {
    %c0_i32 = arith.constant 0 : i32
    %c0_i32_0 = arith.constant 0 : i32
    return %arg0, %c0_i32 : i32, i32
  }
}

</mosaic_0001>

<bundles_post_ra>
// kernel: tpu_custom_call.1
= control target key start
LH: loop header
LB: loop body
LE: loop exit
PB: predicated region body
PF: predicated region fallthrough
CT: control target
= control target key end

     0   :  { %s3635_s0 = inlined_call_operand.vmem [shape: bf16[16,64,32], index: 0, kind: input, shape index: {}]   ;;  %s3636_s1 = inlined_call_operand.vmem [shape: s32[16,1], index: 1, kind: input, shape index: {}]   ;;  %s3637_s2 = inlined_call_operand.vmem [shape: bf16[16,128], index: 2, kind: input, shape index: {}]   ;;  %s3638_s3 = inlined_call_operand.vmem [shape: bf16[32,128], index: 3, kind: input, shape index: {}]   ;;  %s3639_s4 = inlined_call_operand.vmem [shape: f32[1,128], index: 4, kind: input, shape index: {}]   ;;  %s3640_s5 = inlined_call_operand.vmem [shape: bf16[384,256], index: 5, kind: input, shape index: {}]   ;;  %s3641_s6 = inlined_call_operand.vmem [shape: f32[1,256], index: 6, kind: input, shape index: {}]   ;;  %s3642_s7 = inlined_call_operand.vmem [shape: bf16[256,128], index: 7, kind: input, shape index: {}]   ;;  %s3643_s8 = inlined_call_operand.vmem [shape: f32[1,128], index: 8, kind: input, shape index: {}]   ;;  %s3644_s9 = inlined_call_operand.hbm [shape: f32[16,128], index: 9, kind: output, shape index: {}]  }
   0x1   :  { %3652 = sst [smem:[#allocation14_spill]] %s3635_s0 }
   0x2   :  { %3653 = sst [smem:[#allocation15_spill]] %s3644_s9 }
   0x3   :  { %14 = vsyncpa [#allocation6], 0 }
   0x4   :  { %16 = vsyncpa [#allocation6 + $0x1], 0  ;;  %s2879_s30 = smov 0   ;;  %s2881_s10 = smov 0  }
   0x5   :  { %s2883_s11 = smov 0   ;;  %s2885_s12 = smov 0  }
   0x6   :  { %s2887_s13 = smov 0   ;;  %s2889_s14 = smov 0  }
   0x7   :  { %s2891_s15 = smov 0   ;;  %s2893_s16 = smov 0  }
   0x8   :  { %s2895_s17 = smov 0   ;;  %s2897_s18 = smov 0  }
   0x9 LB: > { %3654 = sst [smem:[#allocation8_spill]] %s2786_s30  ;;  %s2287_s19 = sadd.s32 4294967295, %s2822_s18   ;;  %s2822_s18 = sphi %s2897_s18, %s22_s18   ;;  %s2818_s17 = sphi %s2895_s17, %s3702_s17   ;;  %s2814_s16 = sphi %s2893_s16, %s3701_s16   ;;  %s2810_s15 = sphi %s2891_s15, %s3700_s15   ;;  %s2806_s14 = sphi %s2889_s14, %s3699_s14   ;;  %s2802_s13 = sphi %s2887_s13, %s3707_s13   ;;  %s2798_s12 = sphi %s2885_s12, %s3706_s12   ;;  %s2794_s11 = sphi %s2883_s11, %s3705_s11   ;;  %s2790_s10 = sphi %s2881_s10, %s3704_s10   ;;  %s2786_s30 = sphi %s2879_s30, %s3703_s30  }
   0xa   : > { %3655 = sst [smem:[#allocation9_spill]] %s2814_s16  ;;  %s2288_s20 = sadd.s32 4294967294, %s2822_s18  }
   0xb   : > { %3656 = sst [smem:[#allocation10_spill]] %s2818_s17  ;;  %s31_s21 = sadd.s32 1, %s2814_s16 }
   0xc   : > { %s34_s22 = sadd.s32 1, %s2818_s17  ;;  %p32_p0 = scmp.ge.s32.totalorder %s31_s21, 2 }
   0xd   : > { %s43_s23 = sadd.s32 1, %s2802_s13  ;;  %p50_p1 = scmp.ne.s32.totalorder %s2802_s13, %s2798_s12 }
   0xe   : > { %p51_p2 = scmp.eq.s32.totalorder %s2822_s18, 0  ;;  %s3709_s21 = smov (%p32_p0, %s31_s21), 0 }
   0xf   : > { %3657 = sst [smem:[#allocation11_spill]] %s3709_s21  ;;  %s3711_s22 = smov (!%p32_p0, %s34_s22), %s2818_s17 }
  0x10   : > { %s39_s24 = ssub.s32 %s2814_s16, %s3709_s21  ;;  %p2942_p3 = por %p51_p2, %p50_p1 }
  0x11   : > { %p36_p4 = scmp.ge.s32.totalorder %s3711_s22, 2  ;;  %s247_s26 = sadd.s32 1, %s2794_s11 }
  0x12   : > { %p257_p5 = scmp.ne.s32.totalorder %s2794_s11, %s2790_s10  ;;  %p258_p6 = scmp.eq.s32.totalorder %s2287_s19, 3 }
  0x13   : > { %s3713_s22 = smov (%p36_p4, %s3711_s22), 0  ;;  %p263_p8 = scmp.ne.s32.totalorder %s2790_s10, %s2786_s30 }
  0x14   : > { %3659 = sst [smem:[#allocation12_spill]] %s3713_s22  ;;  %p2951_p7 = por %p258_p6, %p257_p5 }
  0x15   : > { %s38_s28 = ssub.s32 %s2818_s17, %s3713_s22  ;;  %p264_p9 = scmp.eq.s32.totalorder %s2288_s20, 3 }
  0x16   : > { %s40_s29 = sor.u32 %s39_s24, %s38_s28  ;;  %p245_p10 = scmp.eq.s32.totalorder %s38_s28, 0 }
  0x17   : > { %p41_p11 = scmp.eq.s32.totalorder %s40_s29, 0  ;;  %p2959_p12 = por %p264_p9, %p263_p8 }
  0x18   : > { %s2964_s9 = scalar_select %p245_p10, %s2794_s11, %s247_s26  }
  0x19   : > { %s3661_s21 = scalar_select %p2959_p12, 1, 0 }
  0x1a   : > { %s2967_s19 = scalar_select %p41_p11, %s2802_s13, %s43_s23  }
  0x1b   : > { %3662 = sst [smem:[#allocation13_spill]] %s3661_s21  ;;  %p2290_p13 = scmp.ge.s32.totalorder %s2822_s18, 4 }
  0x1d   : > { %298 = sbr.rel (%p2290_p13) target bundleno = 54 (0x36), region = 40 }
  0x24   : > { %301 = sbr.rel (!%p2942_p3) target bundleno = 54 (0x36), region = 44  ;;  %s303_s20 = sand.u32 (%p2942_p3), 1, %s2802_s13  }
  0x25   : > { %s2293_s24 = sshll.u32 (%p2942_p3), %s2814_s16, 2  ;;  %s2291_s28 = sshll.u32 (%p2942_p3), %s303_s20, 7 }
  0x26   : > { %s2426_s29 = sshll.u32 (%p2942_p3), %s2818_s17, 6  ;;  %s3663_s0 = sld [smem:[#allocation14_spill]] (%p2942_p3) }
  0x27   : > { %s309_s22 = sadd.s32 (%p2942_p3), %s2426_s29, %s2293_s24  ;;  %s305_s25 = scalar_lea.vmem (%p2942_p3), [#allocation4], %s2291_s28 }
  0x28   : > { %s2295_s30 = sshll.u32 (%p2942_p3), %s309_s22, 2 }
  0x2c   : > { %s2978_s23 = scalar_lea.vmem %s3663_s0, %s2295_s30 }
  0x2d   : > { %v327_v0 = vld [vmem:[%s2978_s23] sm:$0xff]   ;;  %v331_v1 = vld [vmem:[%s2978_s23 + $0x8] sm:$0xff]  }
  0x2e   : > { %v335_v2 = vld [vmem:[%s2978_s23 + $0x20] sm:$0xff]   ;;  %328 = vst [vmem:[%s305_s25] sm:$0xff] %v327_v0   ;;  %332 = vst [vmem:[%s305_s25 + $0x8] sm:$0xff] %v331_v1   ;;  %v339_v3 = vld [vmem:[%s2978_s23 + $0x28] sm:$0xff]  }
  0x2f   : > { %336 = vst [vmem:[%s305_s25 + $0x10] sm:$0xff] %v335_v2   ;;  %v343_v4 = vld [vmem:[%s2978_s23 + $0x40] sm:$0xff]   ;;  %v347_v5 = vld [vmem:[%s2978_s23 + $0x48] sm:$0xff]   ;;  %340 = vst [vmem:[%s305_s25 + $0x18] sm:$0xff] %v339_v3  }
  0x30   : > { %344 = vst [vmem:[%s305_s25 + $0x20] sm:$0xff] %v343_v4   ;;  %348 = vst [vmem:[%s305_s25 + $0x28] sm:$0xff] %v347_v5   ;;  %v351_v6 = vld [vmem:[%s2978_s23 + $0x60] sm:$0xff]   ;;  %v355_v7 = vld [vmem:[%s2978_s23 + $0x68] sm:$0xff]  }
  0x31   : > { %v359_v8 = vld [vmem:[%s2978_s23 + $0x80] sm:$0xff]   ;;  %352 = vst [vmem:[%s305_s25 + $0x30] sm:$0xff] %v351_v6   ;;  %356 = vst [vmem:[%s305_s25 + $0x38] sm:$0xff] %v355_v7   ;;  %v363_v9 = vld [vmem:[%s2978_s23 + $0x88] sm:$0xff]  }
  0x32   : > { %360 = vst [vmem:[%s305_s25 + $0x40] sm:$0xff] %v359_v8   ;;  %v367_v10 = vld [vmem:[%s2978_s23 + $0xa0] sm:$0xff]   ;;  %v371_v11 = vld [vmem:[%s2978_s23 + $0xa8] sm:$0xff]   ;;  %364 = vst [vmem:[%s305_s25 + $0x48] sm:$0xff] %v363_v9  }
  0x33   : > { %368 = vst [vmem:[%s305_s25 + $0x50] sm:$0xff] %v367_v10   ;;  %372 = vst [vmem:[%s305_s25 + $0x58] sm:$0xff] %v371_v11   ;;  %v375_v12 = vld [vmem:[%s2978_s23 + $0xc0] sm:$0xff]   ;;  %v379_v13 = vld [vmem:[%s2978_s23 + $0xc8] sm:$0xff]  }
  0x34   : > { %v383_v14 = vld [vmem:[%s2978_s23 + $0xe0] sm:$0xff]   ;;  %376 = vst [vmem:[%s305_s25 + $0x60] sm:$0xff] %v375_v12   ;;  %380 = vst [vmem:[%s305_s25 + $0x68] sm:$0xff] %v379_v13   ;;  %v387_v15 = vld [vmem:[%s2978_s23 + $0xe8] sm:$0xff]  }
  0x35   : > { %384 = vst [vmem:[%s305_s25 + $0x70] sm:$0xff] %v383_v14   ;;  %388 = vst [vmem:[%s305_s25 + $0x78] sm:$0xff] %v387_v15  }
  0x36 PF: > { %p2296_p0 = scmp.ge.s32.totalorder %s2822_s18, 1  ;;  %p490_p1 = scmp.lt.s32.totalorder %s2822_s18, 5 }
  0x38   : > { %p491_p2 = pnand %p2296_p0, %p490_p1 }
  0x39   : > { %s497_s30 = sand.u32 (!%p491_p2), 1, %s2798_s12   ;;  %s537_s21 = sand.u32 (!%p491_p2), 1, %s2790_s10  }
  0x3a   : > { %494 = sbr.rel (%p491_p2) target bundleno = 1074 (0x432), region = 93  ;;  %s2297_s22 = sshll.u32 (!%p491_p2), %s497_s30, 7 }
  0x3b   : > { %s3002_s20 = sshll.u32 (!%p491_p2), %s537_s21, 3  ;;  %p542_p3 = scmp.lt.s32.totalorder (!%p491_p2), %s2810_s15, 1 }
  0x3c   : > { %s3014_s12 = scalar_lea.vmem (!%p491_p2), [#allocation4], %s2297_s22  ;;  %s539_s30 = scalar_lea.vmem (!%p491_p2), [#allocation5], %s3002_s20 }
  0x3d   : > { %p2301_p4 = scmp.ne.s32.totalorder (!%p491_p2), %s2806_s14, 0 }
  0x41   : > { %s543_s24 = scalar_select %p542_p3, %s2810_s15, 1 }
  0x42   : > { %554 = sbr.rel (%p2301_p4) target bundleno = 73 (0x49), region = 101  ;;  %v2824_v16 = vmov (!%p2301_p4), 0.0  }
  0x43   : > { %s2299_s28 = sshll.u32 %s543_s24, 3  ;;  %s2300_s29 = sshll.u32 %s543_s24, 2  ;;  %555 = vst [vmem:[#allocation2] sm:$0xff] (!%p2301_p4), %v2824_v16  ;;  %556 = vst [vmem:[#allocation3] sm:$0xff] (!%p2301_p4), %v2824_v16 }
  0x44   : > { %s545_s25 = scalar_lea.vmem %s3636_s1, %s2299_s28  ;;  %s3012_s16 = scalar_lea.vmem %s3637_s2, %s2300_s29 }
  0x49 PF: > { %v3018_v17 = vld [vmem:[%s545_s25] sm:$0xff]  ;;  %v2825_v18 = vmov 0   ;;  %v2602_v20 = vld [vmem:[%s3638_s3 + $0x8] sm:$0xff]   ;;  %vm637_vm0 = vcmask 261120   ;;  %v2603_v21 = vld [vmem:[%s3014_s12] sm:$0xff]   ;;  %v775_v37 = vlaneseq  ;;  %s2321_s28 = sshll.u32 %s2806_s14, 5 }
  0x4a   : > { %2600 = vset.pattern.permute.xlu0 %v2825_v18  ;;  %v2601_v19 = vld [vmem:[%s3638_s3] sm:$0xff]   ;;  %2473 = vmatprep.mubr.msk.bf16.mxu0 %vm637_vm0, %v2603_v21  ;;  %v2605_v23 = vld [vmem:[%s3014_s12 + $0x20] sm:$0xff]   ;;  %v2611_v24 = vld [vmem:[%s3014_s12 + $0x8] sm:$0xff]   ;;  %v779_v39 = vstv %s2321_s28  ;;  %v2826_v44 = vmov 0.0   ;;  %s1258_s29 = sadd.s32 16, %s2321_s28  ;;  %vm956_vm3 = vcmask 1041409  }
  0x4b   : > { %782 = vperm.xlu0 %2600, %v3018_v17   ;;  %2469 = vmatprep.subr.bf16.mxu0 %v2601_v19  ;;  %v2604_v22 = vld [vmem:[%s3014_s12 + $0x10] sm:$0xff]   ;;  %v2612_v25 = vld [vmem:[%s3014_s12 + $0x18] sm:$0xff]   ;;  %v2613_v26 = vld [vmem:[%s3014_s12 + $0x28] sm:$0xff]   ;;  %v776_v38 = vand.u32 127, %v775_v37  ;;  %v3060_v40 = vshrl.u32 %v775_v37, 7  ;;  %v1259_v56 = vstv %s1258_s29  ;;  %vm958_vm4 = vcmask 1042434  }
  0x4c   : > { %2489 = vmatprep.subr.bf16.mxu1 %v2601_v19  ;;  %2470 = vmatpush3.bf16.msra.mxu0 %v2601_v19  ;;  %v2606_v27 = vld [vmem:[%s3014_s12 + $0x30] sm:$0xff]   ;;  %v2607_v28 = vld [vmem:[%s3014_s12 + $0x40] sm:$0xff]   ;;  %v2614_v29 = vld [vmem:[%s3014_s12 + $0x38] sm:$0xff]   ;;  %vm960_vm5 = vcmask 1043459   ;;  %vm962_vm6 = vcmask 1044484   ;;  %vm964_vm7 = vcmask 1045509  }
  0x4d   : > { %2490 = vmatpush3.bf16.msra.mxu1 %v2601_v19  ;;  %2471 = vmatprep.subr.bf16.mxu0 %v2602_v20  ;;  %v2615_v30 = vld [vmem:[%s3014_s12 + $0x48] sm:$0xff]   ;;  %v2608_v31 = vld [vmem:[%s3014_s12 + $0x50] sm:$0xff]   ;;  %v2609_v32 = vld [vmem:[%s3014_s12 + $0x60] sm:$0xff]   ;;  %v780_v41 = vadd.s32 %v779_v39, %v776_v38  ;;  %v3063_v42 = vsub.s32 0, %v3060_v40  ;;  %v3067_v47 = vsub.s32 1, %v3060_v40  ;;  %v811_v49 = vsub.s32 2, %v3060_v40 }
  0x4e   : > { %2491 = vmatprep.subr.bf16.mxu1 %v2602_v20  ;;  %2493 = vmatprep.mubr.msk.bf16.mxu1 %vm637_vm0, %v2611_v24  ;;  %v2616_v33 = vld [vmem:[%s3014_s12 + $0x58] sm:$0xff]   ;;  %v2617_v34 = vld [vmem:[%s3014_s12 + $0x68] sm:$0xff]   ;;  %v2610_v35 = vld [vmem:[%s3014_s12 + $0x70] sm:$0xff]   ;;  %v822_v51 = vsub.s32 3, %v3060_v40  ;;  %v833_v53 = vsub.s32 4, %v3060_v40  ;;  %v844_v55 = vsub.s32 5, %v3060_v40  ;;  %v1260_v59 = vadd.s32 %v1259_v56, %v776_v38 }
  0x4f   : > { %v2618_v36 = vld [vmem:[%s3014_s12 + $0x78] sm:$0xff]   ;;  %v855_v58 = vsub.s32 6, %v3060_v40  ;;  %v866_v61 = vsub.s32 7, %v3060_v40  ;;  %vm966_vm8 = vcmask 1046534   ;;  %vm968_vm9 = vcmask 1047559   ;;  %p2356_p5 = scmp.ne.s32.totalorder %s2806_s14, 1 }
  0x50   : > { %2472 = vmatpush3.bf16.msra.mxu0 %v2602_v20 }
  0x51   : > { %2492 = vmatpush3.bf16.msra.mxu1 %v2602_v20 }
  0x53   : > { %2474 = vmatmul.mubr.msk.bf16.vlgmr.msra.gmra.mrb[0].mxu0 %vm637_vm0, %v2604_v22  ;;  %v3081_v22 = vld [vmem:[%s3639_s4] ss:$0 sm:$0xff] }
  0x54   : > { %2477 = vmatprep.mubr.msk.bf16.mxu0 %vm637_vm0, %v2605_v23  ;;  %2494 = vmatmul.mubr.msk.bf16.vlgmr.msra.gmra.mrb[0].mxu1 %vm637_vm0, %v2612_v25 }
  0x55   : > { %2497 = vmatprep.mubr.msk.bf16.mxu1 %vm637_vm0, %v2613_v26 }
  0x5b   : > { %2478 = vmatmul.mubr.msk.bf16.gmra.mrb[4].mxu0 %vm637_vm0, %v2606_v27 }
  0x5c   : > { %2481 = vmatprep.mubr.msk.bf16.mxu0 %vm637_vm0, %v2607_v28  ;;  %2498 = vmatmul.mubr.msk.bf16.gmra.mrb[4].mxu1 %vm637_vm0, %v2614_v29 }
  0x5d   : > { %2501 = vmatprep.mubr.msk.bf16.mxu1 %vm637_vm0, %v2615_v30 }
  0x63   : > { %2482 = vmatmul.mubr.msk.bf16.gmra.mrb[8].mxu0 %vm637_vm0, %v2608_v31 }
  0x64   : > { %2485 = vmatprep.mubr.msk.bf16.mxu0 %vm637_vm0, %v2609_v32  ;;  %2502 = vmatmul.mubr.msk.bf16.gmra.mrb[8].mxu1 %vm637_vm0, %v2616_v33 }
  0x65   : > { %2505 = vmatprep.mubr.msk.bf16.mxu1 %vm637_vm0, %v2617_v34 }
  0x6b   : > { %2486 = vmatmul.mubr.msk.bf16.gmra.mrb[12].mxu0 %vm637_vm0, %v2610_v35 }
  0x6c   : > { %2506 = vmatmul.mubr.msk.bf16.gmra.mrb[12].mxu1 %vm637_vm0, %v2618_v36 }
  0xca   : > { %v783_v43 = vpop.permute.xlu0 %782 }
  0xcb   : > { %vm784_vm1 = vcmp.lt.s32.totalorder %v780_v41, %v783_v43  ;;  %vm1261_vm2 = vcmp.lt.s32.totalorder %v1260_v59, %v783_v43 }
  0xcc   : > { %v2322_v45 = vsel %vm784_vm1, 1.0, %v2826_v44  ;;  %v2355_v63 = vsel %vm1261_vm2, 1.0, %v2826_v44 }
  0xcd   : > { %v790_v46 = vrot.slane %v2322_v45, %v3063_v42  ;;  %v801_v48 = vrot.slane %v2322_v45, %v3067_v47  ;;  %v812_v50 = vrot.slane %v2322_v45, %v811_v49  ;;  %v823_v52 = vrot.slane %v2322_v45, %v822_v51 }
  0xce   : > { %v834_v54 = vrot.slane %v2322_v45, %v833_v53  ;;  %v845_v57 = vrot.slane %v2322_v45, %v844_v55  ;;  %v856_v60 = vrot.slane %v2322_v45, %v855_v58  ;;  %v867_v62 = vrot.slane %v2322_v45, %v866_v61 }
  0xcf   : > { %796 = vbcast.lane.b32.xlu1 %v790_v46, 264  ;;  %792 = vbcast.lane.b32.xlu0 %v790_v46, 256  ;;  %v1267_v0 = vrot.slane %v2355_v63, %v3063_v42  ;;  %v1278_v1 = vrot.slane %v2355_v63, %v3067_v47  ;;  %v1289_v2 = vrot.slane %v2355_v63, %v811_v49 }
  0xd0   : > { %v1300_v3 = vrot.slane %v2355_v63, %v822_v51  ;;  %v1311_v4 = vrot.slane %v2355_v63, %v833_v53  ;;  %v1322_v5 = vrot.slane %v2355_v63, %v844_v55  ;;  %v1333_v6 = vrot.slane %v2355_v63, %v855_v58 }
  0xd1   : > { %v1344_v7 = vrot.slane %v2355_v63, %v866_v61 }
  0xd3   : > { %803 = vbcast.lane.b32.xlu1 %v801_v48, 256  ;;  %807 = vbcast.lane.b32.xlu0 %v801_v48, 264 }
  0xd7   : > { %814 = vbcast.lane.b32.xlu1 %v812_v50, 256  ;;  %818 = vbcast.lane.b32.xlu0 %v812_v50, 264 }
  0xdb   : > { %825 = vbcast.lane.b32.xlu1 %v823_v52, 256  ;;  %829 = vbcast.lane.b32.xlu0 %v823_v52, 264 }
  0xdf   : > { %836 = vbcast.lane.b32.xlu1 %v834_v54, 256  ;;  %840 = vbcast.lane.b32.xlu0 %v834_v54, 264 }
  0xe3   : > { %847 = vbcast.lane.b32.xlu1 %v845_v57, 256  ;;  %851 = vbcast.lane.b32.xlu0 %v845_v57, 264 }
  0xe7   : > { %858 = vbcast.lane.b32.xlu1 %v856_v60, 256  ;;  %862 = vbcast.lane.b32.xlu0 %v856_v60, 264 }
  0xeb   : > { %869 = vbcast.lane.b32.xlu1 %v867_v62, 256  ;;  %873 = vbcast.lane.b32.xlu0 %v867_v62, 264 }
  0xef   : > { %1269 = vbcast.lane.b32.xlu1 %v1267_v0, 256  ;;  %1273 = vbcast.lane.b32.xlu0 %v1267_v0, 264 }
  0xf3   : > { %1280 = vbcast.lane.b32.xlu1 %v1278_v1, 256  ;;  %1284 = vbcast.lane.b32.xlu0 %v1278_v1, 264 }
  0xf7   : > { %1291 = vbcast.lane.b32.xlu1 %v1289_v2, 256  ;;  %1295 = vbcast.lane.b32.xlu0 %v1289_v2, 264 }
  0xfb   : > { %1302 = vbcast.lane.b32.xlu1 %v1300_v3, 256  ;;  %1306 = vbcast.lane.b32.xlu0 %v1300_v3, 264 }
  0xff   : > { %1313 = vbcast.lane.b32.xlu1 %v1311_v4, 256  ;;  %1317 = vbcast.lane.b32.xlu0 %v1311_v4, 264 }
 0x103   : > { %1324 = vbcast.lane.b32.xlu1 %v1322_v5, 256  ;;  %1328 = vbcast.lane.b32.xlu0 %v1322_v5, 264 }
 0x107   : > { %1335 = vbcast.lane.b32.xlu1 %v1333_v6, 256  ;;  %1339 = vbcast.lane.b32.xlu0 %v1333_v6, 264 }
 0x10b   : > { %1346 = vbcast.lane.b32.xlu1 %v1344_v7, 256  ;;  %1350 = vbcast.lane.b32.xlu0 %v1344_v7, 264 }
 0x126   : > { %v2475_v8 = vpop.f32.mrb[0].mxu0 }
 0x127   : > { %v696_v9 = vpop.f32.mrb[1].mxu0  ;;  %v2495_v12 = vpop.f32.mrb[0].mxu1  ;;  %v3084_v25 = vadd.f32 %v2475_v8, %v3081_v22 }
 0x128   : > { %v2476_v10 = vpop.f32.mrb[2].mxu0  ;;  %v1179_v13 = vpop.f32.mrb[1].mxu1  ;;  %v3087_v27 = vadd.f32 %v3081_v22, %v696_v9  ;;  %v3096_v31 = vadd.f32 %v2495_v12, %v3081_v22 }
 0x129   : > { %v699_v11 = vpop.f32.mrb[3].mxu0  ;;  %v2496_v14 = vpop.f32.mrb[2].mxu1  ;;  %v3090_v28 = vadd.f32 %v2476_v10, %v3081_v22  ;;  %v3099_v33 = vadd.f32 %v3081_v22, %v1179_v13  ;;  %v761_v34 = vmax.f32 %v3084_v25, 0.0 }
 0x12a   : > { %v1182_v15 = vpop.f32.mrb[3].mxu1  ;;  %v3093_v29 = vadd.f32 %v3081_v22, %v699_v11  ;;  %v3103_v36 = vadd.f32 %v2496_v14, %v3081_v22  ;;  %v759_v38 = vmax.f32 %v3087_v27, 0.0 }
 0x12b   : > { %v3106_v37 = vadd.f32 %v3081_v22, %v1182_v15  ;;  %v762_v39 = vmax.f32 %v3090_v28, 0.0 }
 0x12c   : > { %v760_v45 = vmax.f32 %v3093_v29, 0.0 }
 0x12e   : > { %v2479_v16 = vpop.f32.mrb[4].mxu0 }
 0x12f   : > { %v712_v18 = vpop.f32.mrb[5].mxu0  ;;  %v2499_v21 = vpop.f32.mrb[4].mxu1  ;;  %v3111_v40 = vadd.f32 %v2479_v16, %v3081_v22 }
 0x130   : > { %v2480_v19 = vpop.f32.mrb[6].mxu0  ;;  %v1195_v23 = vpop.f32.mrb[5].mxu1  ;;  %v3114_v41 = vadd.f32 %v3081_v22, %v712_v18  ;;  %v3126_v52 = vadd.f32 %v2499_v21, %v3081_v22 }
 0x131   : > { %v715_v20 = vpop.f32.mrb[7].mxu0  ;;  %v2500_v24 = vpop.f32.mrb[6].mxu1  ;;  %v3118_v46 = vadd.f32 %v2480_v19, %v3081_v22  ;;  %v3129_v53 = vadd.f32 %v3081_v22, %v1195_v23  ;;  %v765_v61 = vmax.f32 %v3111_v40, 0.0 }
 0x132   : > { %v1198_v26 = vpop.f32.mrb[7].mxu1  ;;  %v3121_v48 = vadd.f32 %v3081_v22, %v715_v20  ;;  %v3132_v54 = vadd.f32 %v2500_v24, %v3081_v22  ;;  %v763_v62 = vmax.f32 %v3114_v41, 0.0 }
 0x133   : > { %v3140_v59 = vadd.f32 %v3081_v22, %v1198_v26  ;;  %v766_v1 = vmax.f32 %v3118_v46, 0.0 }
 0x134   : > { %v764_v2 = vmax.f32 %v3121_v48, 0.0 }
 0x136   : > { %v2483_v30 = vpop.f32.mrb[8].mxu0 }
 0x137   : > { %v728_v32 = vpop.f32.mrb[9].mxu0  ;;  %v2503_v44 = vpop.f32.mrb[8].mxu1  ;;  %v3135_v56 = vadd.f32 %v2483_v30, %v3081_v22 }
 0x138   : > { %v2484_v35 = vpop.f32.mrb[10].mxu0  ;;  %v1211_v50 = vpop.f32.mrb[9].mxu1  ;;  %v3145_v63 = vadd.f32 %v3081_v22, %v728_v32  ;;  %v3156_v5 = vadd.f32 %v2503_v44, %v3081_v22 }
 0x139   : > { %v731_v43 = vpop.f32.mrb[11].mxu0  ;;  %v2504_v55 = vpop.f32.mrb[10].mxu1  ;;  %v3148_v0 = vadd.f32 %v2484_v35, %v3081_v22  ;;  %v3162_v10 = vadd.f32 %v3081_v22, %v1211_v50  ;;  %v769_v13 = vmax.f32 %v3135_v56, 0.0 }
 0x13a   : > { %v1214_v60 = vpop.f32.mrb[11].mxu1  ;;  %v3153_v3 = vadd.f32 %v3081_v22, %v731_v43  ;;  %v3167_v15 = vadd.f32 %v2504_v55, %v3081_v22  ;;  %v767_v20 = vmax.f32 %v3145_v63, 0.0 }
 0x13b   : > { %v3170_v16 = vadd.f32 %v3081_v22, %v1214_v60  ;;  %v770_v21 = vmax.f32 %v3148_v0, 0.0 }
 0x13c   : > { %v768_v26 = vmax.f32 %v3153_v3, 0.0 }
 0x13e   : > { %v2487_v4 = vpop.f32.mrb[12].mxu0 }
 0x13f   : > { %v744_v6 = vpop.f32.mrb[13].mxu0  ;;  %v2507_v24 = vpop.f32.mrb[12].mxu1  ;;  %v3176_v27 = vadd.f32 %v2487_v4, %v3081_v22 }
 0x140   : > { %v2488_v23 = vpop.f32.mrb[14].mxu0  ;;  %v3179_v29 = vadd.f32 %v3081_v22, %v744_v6  ;;  %v1227_v35 = vpop.f32.mrb[13].mxu1  ;;  %v3189_v7 = vadd.f32 %v2507_v24, %v3081_v22 }
 0x141   : > { %v797_v11 = vpop.permute.xlu1 %796  ;;  %v793_v12 = vpop.permute.xlu0 %792  ;;  %v3184_v9 = vadd.f32 %v2488_v23, %v3081_v22  ;;  %v3201_v6 = vadd.f32 %v3081_v22, %v1227_v35  ;;  %v3664_v0 = vmax.f32 %v3176_v27, 0.0 }
 0x142   : > { %v876_v18 = vmul.f32 %v797_v11, %v760_v45  ;;  %v875_v19 = vmul.f32 %v793_v12, %v759_v38  ;;  %v747_v30 = vpop.f32.mrb[15].mxu0  ;;  %v2508_v60 = vpop.f32.mrb[14].mxu1  ;;  %v771_v23 = vmax.f32 %v3179_v29, 0.0 }
 0x143   : > { %v3198_v4 = vadd.f32 %v3081_v22, %v747_v30  ;;  %v3210_v30 = vadd.f32 %v2508_v60, %v3081_v22 }
 0x144   : > { %v975_v43 = vmul.f32 %v876_v18, %v760_v45  ;;  %v892_v44 = vadd.f32 %v876_v18, %v875_v19  ;;  %v974_v50 = vmul.f32 %v875_v19, %v759_v38  ;;  %v1230_v18 = vpop.f32.mrb[15].mxu1 }
 0x145   : > { %v804_v11 = vpop.permute.xlu1 %803  ;;  %v808_v12 = vpop.permute.xlu0 %807 }
 0x146   : > { %v893_v32 = vrot.slane %v892_v44, 4  ;;  %v990_v14 = vadd.f32 %v975_v43, %v974_v50  ;;  %v877_v38 = vmul.f32 %v804_v11, %v761_v34  ;;  %v878_v45 = vmul.f32 %v808_v12, %v762_v39 }
 0x148   : > { %v894_v24 = vadd.f32 %v893_v32, %v892_v44  ;;  %v991_v55 = vrot.slane %v990_v14, 4  ;;  %v976_v43 = vmul.f32 %v877_v38, %v761_v34  ;;  %v899_v50 = vadd.f32 %v878_v45, %v877_v38 }
 0x149   : > { %v977_v11 = vmul.f32 %v878_v45, %v762_v39  ;;  %v815_v12 = vpop.permute.xlu1 %814  ;;  %v819_v8 = vpop.permute.xlu0 %818  ;;  %v772_v39 = vmax.f32 %v3198_v4, 0.0  ;;  %v3666_v4 = vmax.f32 %v3184_v9, 0.0 }
 0x14a   : > { %v895_v35 = vrot.slane %v894_v24, 2  ;;  %v992_v58 = vadd.f32 %v991_v55, %v990_v14  ;;  %v900_v32 = vrot.slane %v899_v50, 4  ;;  %v879_v25 = vmul.f32 %v815_v12, %v763_v62 }
 0x14b   : > { %v997_v34 = vadd.f32 %v977_v11, %v976_v43  ;;  %v880_v28 = vmul.f32 %v819_v8, %v764_v2  ;;  %v3223_v11 = vadd.f32 %v3081_v22, %v1230_v18 }
 0x14c   : > { %v896_v38 = vadd.f32 %v895_v35, %v894_v24  ;;  %v993_v45 = vrot.slane %v992_v58, 2  ;;  %v901_v49 = vadd.f32 %v900_v32, %v899_v50  ;;  %v978_v60 = vmul.f32 %v879_v25, %v763_v62 }
 0x14d   : > { %v998_v14 = vrot.slane %v997_v34, 4  ;;  %v906_v55 = vadd.f32 %v880_v28, %v879_v25  ;;  %v979_v12 = vmul.f32 %v880_v28, %v764_v2  ;;  %v826_v51 = vpop.permute.xlu1 %825  ;;  %v830_v43 = vpop.permute.xlu0 %829 }
 0x14e   : > { %v897_v8 = vrot.slane %v896_v38, 1  ;;  %v994_v57 = vadd.f32 %v993_v45, %v992_v58  ;;  %v902_v19 = vrot.slane %v901_v49, 2  ;;  %v881_v24 = vmul.f32 %v826_v51, %v765_v61 }
 0x14f   : > { %v999_v50 = vadd.f32 %v998_v14, %v997_v34  ;;  %v907_v35 = vrot.slane %v906_v55, 4  ;;  %v1004_v41 = vadd.f32 %v979_v12, %v978_v60  ;;  %v882_v62 = vmul.f32 %v830_v43, %v766_v1 }
 0x150   : > { %v898_v32 = vadd.f32 %v897_v8, %v896_v38  ;;  %v995_v48 = vrot.slane %v994_v57, 1  ;;  %v903_v2 = vadd.f32 %v902_v19, %v901_v49  ;;  %v980_v22 = vmul.f32 %v881_v24, %v765_v61 }
 0x151   : > { %v1000_v18 = vrot.slane %v999_v50, 2  ;;  %v908_v25 = vadd.f32 %v907_v35, %v906_v55  ;;  %v1005_v58 = vrot.slane %v1004_v41, 4  ;;  %v913_v28 = vadd.f32 %v882_v62, %v881_v24  ;;  %v837_v45 = vpop.permute.xlu1 %836  ;;  %v841_v44 = vpop.permute.xlu0 %840 }
 0x152   : > { %v996_v51 = vadd.f32 %v995_v48, %v994_v57  ;;  %v904_v34 = vrot.slane %v903_v2, 1  ;;  %v981_v60 = vmul.f32 %v882_v62, %v766_v1  ;;  %v883_v38 = vmul.f32 %v837_v45, %v767_v20 }
 0x153   : > { %v1001_v14 = vadd.f32 %v1000_v18, %v999_v50  ;;  %v909_v49 = vrot.slane %v908_v25, 2  ;;  %v1006_v19 = vadd.f32 %v1005_v58, %v1004_v41  ;;  %v914_v12 = vrot.slane %v913_v28, 4 }
 0x154   : > { %v905_v40 = vadd.f32 %v904_v34, %v903_v2  ;;  %v1011_v61 = vadd.f32 %v981_v60, %v980_v22  ;;  %v982_v55 = vmul.f32 %v883_v38, %v767_v20  ;;  %v884_v57 = vmul.f32 %v841_v44, %v768_v26 }
 0x155   : > { %v1002_v43 = vrot.slane %v1001_v14, 1  ;;  %v910_v8 = vadd.f32 %v909_v49, %v908_v25  ;;  %v1007_v46 = vrot.slane %v1006_v19, 2  ;;  %v915_v1 = vadd.f32 %v914_v12, %v913_v28  ;;  %v848_v24 = vpop.permute.xlu1 %847  ;;  %v852_v35 = vpop.permute.xlu0 %851 }
 0x156   : > { %v957_v50 = vsel %vm956_vm3, %v905_v40, %v898_v32  ;;  %v1012_v62 = vrot.slane %v1011_v61, 4  ;;  %v920_v41 = vadd.f32 %v884_v57, %v883_v38  ;;  %v983_v48 = vmul.f32 %v884_v57, %v768_v26 }
 0x157   : > { %v1003_v2 = vadd.f32 %v1002_v43, %v1001_v14  ;;  %v911_v22 = vrot.slane %v910_v8, 1  ;;  %v1008_v63 = vadd.f32 %v1007_v46, %v1006_v19  ;;  %v916_v20 = vrot.slane %v915_v1, 2 }
 0x158   : > { %v1013_v18 = vadd.f32 %v1012_v62, %v1011_v61  ;;  %v921_v58 = vrot.slane %v920_v41, 4  ;;  %v1018_v44 = vadd.f32 %v983_v48, %v982_v55  ;;  %v885_v25 = vmul.f32 %v848_v24, %v769_v13 }
 0x159   : > { %v1054_v28 = vsel %vm956_vm3, %v1003_v2, %v996_v51  ;;  %v912_v45 = vadd.f32 %v911_v22, %v910_v8  ;;  %v1009_v34 = vrot.slane %v1008_v63, 1  ;;  %v917_v32 = vadd.f32 %v916_v20, %v915_v1  ;;  %v859_v60 = vpop.permute.xlu1 %858  ;;  %v863_v38 = vpop.permute.xlu0 %862 }
 0x15a   : > { %v1014_v3 = vrot.slane %v1013_v18, 2  ;;  %v922_v26 = vadd.f32 %v921_v58, %v920_v41  ;;  %v1019_v14 = vrot.slane %v1018_v44, 4  ;;  %v984_v49 = vmul.f32 %v885_v25, %v769_v13 }
 0x15b   : > { %v959_v19 = vsel %vm958_vm4, %v912_v45, %v957_v50  ;;  %v1010_v12 = vadd.f32 %v1009_v34, %v1008_v63  ;;  %v918_v40 = vrot.slane %v917_v32, 1  ;;  %v886_v61 = vmul.f32 %v852_v35, %v770_v21 }
 0x15c   : > { %v1015_v51 = vadd.f32 %v1014_v3, %v1013_v18  ;;  %v923_v55 = vrot.slane %v922_v26, 2  ;;  %v1020_v57 = vadd.f32 %v1019_v14, %v1018_v44  ;;  %v887_v43 = vmul.f32 %v859_v60, %v771_v23 }
 0x15d   : > { %v1055_v8 = vsel %vm958_vm4, %v1010_v12, %v1054_v28  ;;  %v919_v46 = vadd.f32 %v918_v40, %v917_v32  ;;  %v927_v1 = vadd.f32 %v886_v61, %v885_v25  ;;  %v985_v56 = vmul.f32 %v886_v61, %v770_v21  ;;  %v870_v13 = vpop.permute.xlu1 %869  ;;  %v874_v24 = vpop.permute.xlu0 %873 }
 0x15e   : > { %v1016_v50 = vrot.slane %v1015_v51, 1  ;;  %v924_v62 = vadd.f32 %v923_v55, %v922_v26  ;;  %v1021_v41 = vrot.slane %v1020_v57, 2  ;;  %v986_v35 = vmul.f32 %v887_v43, %v771_v23 }
 0x15f   : > { %v961_v48 = vsel %vm960_vm5, %v919_v46, %v959_v19  ;;  %v928_v2 = vrot.slane %v927_v1, 4  ;;  %v1025_v22 = vadd.f32 %v985_v56, %v984_v49  ;;  %v888_v63 = vmul.f32 %v863_v38, %v772_v39 }
 0x160   : > { %v1017_v20 = vadd.f32 %v1016_v50, %v1015_v51  ;;  %v925_v18 = vrot.slane %v924_v62, 1  ;;  %v1022_v58 = vadd.f32 %v1021_v41, %v1020_v57  ;;  %v889_v21 = vmul.f32 %v870_v13, %v3664_v0 }
 0x161   : > { %v929_v44 = vadd.f32 %v928_v2, %v927_v1  ;;  %v1026_v25 = vrot.slane %v1025_v22, 4  ;;  %v934_v28 = vadd.f32 %v888_v63, %v887_v43  ;;  %v987_v29 = vmul.f32 %v888_v63, %v772_v39  ;;  %v1270_v23 = vpop.permute.xlu1 %1269  ;;  %v1274_v45 = vpop.permute.xlu0 %1273 }
 0x162   : > { %v1056_v34 = vsel %vm960_vm5, %v1017_v20, %v1055_v8  ;;  %v926_v32 = vadd.f32 %v925_v18, %v924_v62  ;;  %v1023_v60 = vrot.slane %v1022_v58, 1  ;;  %v3665_v38 = vmov %v3664_v0 }
 0x163   : > { %v988_v3 = vmul.f32 %v889_v21, %v3665_v38  ;;  %v930_v26 = vrot.slane %v929_v44, 2  ;;  %v1027_v14 = vadd.f32 %v1026_v25, %v1025_v22  ;;  %v935_v49 = vrot.slane %v934_v28, 4 }
 0x164   : > { %v1032_v19 = vadd.f32 %v987_v29, %v986_v35  ;;  %v963_v12 = vsel %vm962_vm6, %v926_v32, %v961_v48  ;;  %v1024_v40 = vadd.f32 %v1023_v60, %v1022_v58  ;;  %v890_v39 = vmul.f32 %v874_v24, %v3666_v4 }
 0x165   : > { %v3667_v61 = vmax.f32 %v3099_v33, 0.0  ;;  %v931_v55 = vadd.f32 %v930_v26, %v929_v44  ;;  %v1028_v57 = vrot.slane %v1027_v14, 2  ;;  %v936_v43 = vadd.f32 %v935_v49, %v934_v28  ;;  %v1281_v27 = vpop.permute.xlu1 %1280  ;;  %v1285_v46 = vpop.permute.xlu0 %1284 }
 0x166   : > { %v1033_v8 = vrot.slane %v1032_v19, 4  ;;  %v1057_v1 = vsel %vm962_vm6, %v1024_v40, %v1056_v34  ;;  %v941_v56 = vadd.f32 %v890_v39, %v889_v21  ;;  %v3668_v13 = vmov %v3666_v4 }
 0x167   : > { %v1352_v51 = vmul.f32 %v1270_v23, %v3667_v61  ;;  %v989_v50 = vmul.f32 %v890_v39, %v3668_v13  ;;  %v3669_v62 = vmov %v3667_v61  ;;  %v932_v35 = vrot.slane %v931_v55, 1 }
 0x168   : > { %v1029_v24 = vadd.f32 %v1028_v57, %v1027_v14  ;;  %v937_v48 = vrot.slane %v936_v43, 2  ;;  %v1034_v2 = vadd.f32 %v1033_v8, %v1032_v19  ;;  %v942_v22 = vrot.slane %v941_v56, 4 }
 0x169   : > { %v1444_v41 = vmul.f32 %v1352_v51, %v3669_v62  ;;  %v1039_v63 = vadd.f32 %v989_v50, %v988_v3  ;;  %v3670_v20 = vmax.f32 %v3106_v37, 0.0  ;;  %v3671_v58 = vmax.f32 %v3096_v31, 0.0  ;;  %v1292_v28 = vpop.permute.xlu1 %1291  ;;  %v1296_v26 = vpop.permute.xlu0 %1295 }
 0x16a   : > { %v933_v44 = vadd.f32 %v932_v35, %v931_v55  ;;  %v1030_v21 = vrot.slane %v1029_v24, 1  ;;  %v938_v25 = vadd.f32 %v937_v48, %v936_v43  ;;  %v1035_v9 = vrot.slane %v1034_v2, 2 }
 0x16b   : > { %v1353_v18 = vmul.f32 %v1274_v45, %v3670_v20  ;;  %v1354_v0 = vmul.f32 %v1281_v27, %v3671_v58  ;;  %v943_v33 = vadd.f32 %v942_v22, %v941_v56  ;;  %v1040_v29 = vrot.slane %v1039_v63, 4 }
 0x16c   : > { %v3672_v34 = vmov %v3670_v20  ;;  %v965_v60 = vsel %vm964_vm7, %v933_v44, %v963_v12  ;;  %v1031_v38 = vadd.f32 %v1030_v21, %v1029_v24  ;;  %v939_v3 = vrot.slane %v938_v25, 1 }
 0x16d   : > { %v1369_v23 = vadd.f32 %v1353_v18, %v1352_v51  ;;  %v1445_v32 = vmul.f32 %v1353_v18, %v3672_v34  ;;  %v1036_v45 = vadd.f32 %v1035_v9, %v1034_v2  ;;  %v944_v14 = vrot.slane %v943_v33, 2  ;;  %v1303_v12 = vpop.permute.xlu1 %1302 }
 0x16e   : > { %v1041_v49 = vadd.f32 %v1040_v29, %v1039_v63  ;;  %v1058_v4 = vsel %vm964_vm7, %v1031_v38, %v1057_v1  ;;  %v940_v39 = vadd.f32 %v939_v3, %v938_v25  ;;  %v3673_v55 = vmov %v3671_v58  ;;  %v1307_v58 = vpop.permute.xlu0 %1306 }
 0x16f   : > { %v1370_v19 = vrot.slane %v1369_v23, 4  ;;  %v1460_v40 = vadd.f32 %v1445_v32, %v1444_v41  ;;  %v1037_v61 = vrot.slane %v1036_v45, 1  ;;  %v1446_v51 = vmul.f32 %v1354_v0, %v3673_v55 }
 0x170   : > { %v945_v57 = vadd.f32 %v944_v14, %v943_v33  ;;  %v1042_v37 = vrot.slane %v1041_v49, 2  ;;  %v967_v27 = vsel %vm966_vm8, %v940_v39, %v965_v60  ;;  %v3674_v13 = vmax.f32 %v3103_v36, 0.0 }
 0x171   : > { %v1371_v43 = vadd.f32 %v1370_v19, %v1369_v23  ;;  %v1461_v8 = vrot.slane %v1460_v40, 4  ;;  %v1038_v56 = vadd.f32 %v1037_v61, %v1036_v45  ;;  %v3675_v62 = vmax.f32 %v3129_v53, 0.0  ;;  %v1314_v60 = vpop.permute.xlu1 %1313 }
 0x172   : > { %v1355_v50 = vmul.f32 %v1285_v46, %v3674_v13  ;;  %v946_v1 = vrot.slane %v945_v57, 1  ;;  %v1043_v35 = vadd.f32 %v1042_v37, %v1041_v49  ;;  %v3676_v22 = vmov %v3674_v13 }
 0x173   : > { %v1356_v41 = vmul.f32 %v1292_v28, %v3675_v62  ;;  %v1372_v24 = vrot.slane %v1371_v43, 2  ;;  %v1462_v48 = vadd.f32 %v1461_v8, %v1460_v40  ;;  %v1059_v31 = vsel %vm966_vm8, %v1038_v56, %v1058_v4 }
 0x174   : > { %v1376_v2 = vadd.f32 %v1355_v50, %v1354_v0  ;;  %v1447_v63 = vmul.f32 %v1355_v50, %v3676_v22  ;;  %v3677_v20 = vmov %v3675_v62  ;;  %v947_v44 = vadd.f32 %v946_v1, %v945_v57  ;;  %v1318_v57 = vpop.permute.xlu0 %1317 }
 0x175   : > { %v1448_v18 = vmul.f32 %v1356_v41, %v3677_v20  ;;  %v1044_v21 = vrot.slane %v1043_v35, 1  ;;  %v1373_v46 = vadd.f32 %v1372_v24, %v1371_v43  ;;  %v1463_v25 = vrot.slane %v1462_v48, 2  ;;  %v1325_v22 = vpop.permute.xlu1 %1324 }
 0x176   : > { %v1377_v9 = vrot.slane %v1376_v2, 4  ;;  %v1467_v28 = vadd.f32 %v1447_v63, %v1446_v51  ;;  %v3678_v33 = vmax.f32 %v3140_v59, 0.0  ;;  %v3679_v23 = vmax.f32 %v3126_v52, 0.0 }
 0x177   : > { %v3302_v0 = vsel %vm968_vm9, %v947_v44, %v967_v27  ;;  %v1045_v36 = vadd.f32 %v1044_v21, %v1043_v35  ;;  %v1374_v32 = vrot.slane %v1373_v46, 1  ;;  %v1464_v53 = vadd.f32 %v1463_v25, %v1462_v48 }
 0x178   : > { %v1357_v29 = vmul.f32 %v1296_v26, %v3678_v33  ;;  %v1358_v34 = vmul.f32 %v1303_v12, %v3679_v23  ;;  %v1378_v38 = vadd.f32 %v1377_v9, %v1376_v2  ;;  %v1468_v3 = vrot.slane %v1467_v28, 4 }
 0x179   : > { %v1257_v14 = vmax.f32 %v3210_v30, 0.0  ;;  %v3306_v49 = vsel %vm968_vm9, %v1045_v36, %v1059_v31  ;;  %v1465_v19 = vrot.slane %v1464_v53, 1  ;;  %v3680_v26 = vmov %v3678_v33 }
 0x17a   : > { %v1383_v45 = vadd.f32 %v1357_v29, %v1356_v41  ;;  %v1449_v40 = vmul.f32 %v1357_v29, %v3680_v26  ;;  %v1255_v4 = vmax.f32 %v3223_v11, 0.0  ;;  %v1375_v39 = vadd.f32 %v1374_v32, %v1373_v46 }
 0x17b   : > { %v1379_v61 = vrot.slane %v1378_v38, 2  ;;  %v1469_v55 = vadd.f32 %v1468_v3, %v1467_v28  ;;  %v1466_v37 = vadd.f32 %v1465_v19, %v1464_v53  ;;  %v3681_v8 = vmov %v3679_v23  ;;  %v1329_v23 = vpop.permute.xlu0 %1328 }
 0x17c   : > { %v1384_v51 = vrot.slane %v1383_v45, 4  ;;  %v1474_v43 = vadd.f32 %v1449_v40, %v1448_v18  ;;  %v1450_v12 = vmul.f32 %v1358_v34, %v3681_v8  ;;  %v3682_v27 = vmax.f32 %v3132_v54, 0.0 }
 0x17d   : > { %v1380_v13 = vadd.f32 %v1379_v61, %v1378_v38  ;;  %v1470_v50 = vrot.slane %v1469_v55, 2  ;;  %v3683_v59 = vmax.f32 %v3162_v10, 0.0  ;;  %v3685_v31 = vmax.f32 %v3170_v16, 0.0  ;;  %v1336_v61 = vpop.permute.xlu1 %1335 }
 0x17e   : > { %v1359_v56 = vmul.f32 %v1307_v58, %v3682_v27  ;;  %v1385_v62 = vadd.f32 %v1384_v51, %v1383_v45  ;;  %v1475_v1 = vrot.slane %v1474_v43, 4  ;;  %v3684_v24 = vmov %v3682_v27 }
 0x17f   : > { %v1360_v41 = vmul.f32 %v1314_v60, %v3683_v59  ;;  %v1361_v2 = vmul.f32 %v1318_v57, %v3685_v31  ;;  %v1381_v52 = vrot.slane %v1380_v13, 1  ;;  %v1471_v63 = vadd.f32 %v1470_v50, %v1469_v55 }
 0x180   : > { %v1390_v35 = vadd.f32 %v1359_v56, %v1358_v34  ;;  %v1451_v48 = vmul.f32 %v1359_v56, %v3684_v24  ;;  %v1386_v20 = vrot.slane %v1385_v62, 2  ;;  %v3686_v18 = vmov %v3683_v59 }
 0x181   : > { %v1452_v58 = vmul.f32 %v1360_v41, %v3686_v18  ;;  %v1476_v44 = vadd.f32 %v1475_v1, %v1474_v43  ;;  %v1397_v25 = vadd.f32 %v1361_v2, %v1360_v41  ;;  %v1382_v9 = vadd.f32 %v1381_v52, %v1380_v13  ;;  %v1340_v1 = vpop.permute.xlu0 %1339 }
 0x182   : > { %v1391_v21 = vrot.slane %v1390_v35, 4  ;;  %v1481_v46 = vadd.f32 %v1451_v48, %v1450_v12  ;;  %v1472_v28 = vrot.slane %v1471_v63, 1  ;;  %v1387_v33 = vadd.f32 %v1386_v20, %v1385_v62 }
 0x183   : > { %v3687_v54 = vmov %v3685_v31  ;;  %v1477_v34 = vrot.slane %v1476_v44, 2  ;;  %v1398_v53 = vrot.slane %v1397_v25, 4  ;;  %v1433_v60 = vsel %vm956_vm3, %v1382_v9, %v1375_v39 }
 0x184   : > { %v1453_v29 = vmul.f32 %v1361_v2, %v3687_v54  ;;  %v1392_v36 = vadd.f32 %v1391_v21, %v1390_v35  ;;  %v1482_v32 = vrot.slane %v1481_v46, 4  ;;  %v1473_v38 = vadd.f32 %v1472_v28, %v1471_v63  ;;  %v1347_v21 = vpop.permute.xlu1 %1346 }
 0x185   : > { %v1388_v10 = vrot.slane %v1387_v33, 1  ;;  %v1478_v45 = vadd.f32 %v1477_v34, %v1476_v44  ;;  %v1399_v40 = vadd.f32 %v1398_v53, %v1397_v25  ;;  %v3688_v57 = vmax.f32 %v3156_v5, 0.0 }
 0x186   : > { %v1488_v3 = vadd.f32 %v1453_v29, %v1452_v58  ;;  %v1393_v19 = vrot.slane %v1392_v36, 2  ;;  %v1483_v26 = vadd.f32 %v1482_v32, %v1481_v46  ;;  %v1524_v55 = vsel %vm956_vm3, %v1473_v38, %v1466_v37  ;;  %v1351_v38 = vpop.permute.xlu0 %1350 }
 0x187   : > { %v1389_v51 = vadd.f32 %v1388_v10, %v1387_v33  ;;  %v1362_v43 = vmul.f32 %v1325_v22, %v3688_v57  ;;  %v1479_v8 = vrot.slane %v1478_v45, 1  ;;  %v1400_v56 = vrot.slane %v1399_v40, 2 }
 0x188   : > { %v1489_v16 = vrot.slane %v1488_v3, 4  ;;  %v1394_v12 = vadd.f32 %v1393_v19, %v1392_v36  ;;  %v1484_v27 = vrot.slane %v1483_v26, 2  ;;  %v3689_v50 = vmov %v3688_v57 }
 0x189   : > { %v1434_v39 = vsel %vm958_vm4, %v1389_v51, %v1433_v60  ;;  %v1454_v62 = vmul.f32 %v1362_v43, %v3689_v50  ;;  %v3690_v59 = vmax.f32 %v3167_v15, 0.0  ;;  %v1480_v37 = vadd.f32 %v1479_v8, %v1478_v45 }
 0x18a   : > { %v1490_v13 = vadd.f32 %v1489_v16, %v1488_v3  ;;  %v1395_v35 = vrot.slane %v1394_v12, 1  ;;  %v1485_v24 = vadd.f32 %v1484_v27, %v1483_v26  ;;  %v1401_v48 = vadd.f32 %v1400_v56, %v1399_v40 }
 0x18b   : > { %v1363_v41 = vmul.f32 %v1329_v23, %v3690_v59  ;;  %v3691_v22 = vmov %v3690_v59  ;;  %v3692_v63 = vmax.f32 %v3201_v6, 0.0  ;;  %v1525_v18 = vsel %vm958_vm4, %v1480_v37, %v1524_v55 }
 0x18c   : > { %v1491_v31 = vrot.slane %v1490_v13, 2  ;;  %v1396_v5 = vadd.f32 %v1395_v35, %v1394_v12  ;;  %v1486_v58 = vrot.slane %v1485_v24, 1  ;;  %v1402_v44 = vrot.slane %v1401_v48, 1 }
 0x18d   : > { %v1404_v2 = vadd.f32 %v1363_v41, %v1362_v43  ;;  %v1455_v52 = vmul.f32 %v1363_v41, %v3691_v22  ;;  %v1364_v20 = vmul.f32 %v1336_v61, %v3692_v63  ;;  %v3693_v28 = vmov %v3692_v63 }
 0x18e   : > { %v1492_v46 = vadd.f32 %v1491_v31, %v1490_v13  ;;  %v1435_v54 = vsel %vm960_vm5, %v1396_v5, %v1434_v39  ;;  %v1487_v29 = vadd.f32 %v1486_v58, %v1485_v24  ;;  %v1403_v15 = vadd.f32 %v1402_v44, %v1401_v48  ;;  %v891_v44 = vld [vmem:[#allocation2] sm:$0xff] }
 0x18f   : > { %v1405_v25 = vrot.slane %v1404_v2, 4  ;;  %v1495_v9 = vadd.f32 %v1455_v52, %v1454_v62  ;;  %v1456_v33 = vmul.f32 %v1364_v20, %v3693_v28  ;;  %v1365_v23 = vmul.f32 %v1340_v1, %v1255_v4  ;;  %v973_v28 = vld [vmem:[#allocation3] sm:$0xff] }
 0x190   : > { %v1493_v34 = vrot.slane %v1492_v46, 1  ;;  %v3694_v53 = vmax.f32 %v3189_v7, 0.0  ;;  %v1526_v10 = vsel %vm960_vm5, %v1487_v29, %v1525_v18  ;;  %v1436_v3 = vsel %vm962_vm6, %v1403_v15, %v1435_v54 }
 0x191   : > { %v1406_v36 = vadd.f32 %v1405_v25, %v1404_v2  ;;  %v1496_v32 = vrot.slane %v1495_v9, 4  ;;  %v1411_v6 = vadd.f32 %v1365_v23, %v1364_v20  ;;  %v1457_v45 = vmul.f32 %v1365_v23, %v1255_v4 }
 0x192   : > { %v1366_v60 = vmul.f32 %v1347_v21, %v3694_v53  ;;  %v1494_v19 = vadd.f32 %v1493_v34, %v1492_v46  ;;  %v3695_v51 = vmov %v3694_v53  ;;  %v1367_v57 = vmul.f32 %v1351_v38, %v1257_v14 }
 0x193   : > { %v1407_v26 = vrot.slane %v1406_v36, 2  ;;  %v1497_v40 = vadd.f32 %v1496_v32, %v1495_v9  ;;  %v1412_v61 = vrot.slane %v1411_v6, 4  ;;  %v1502_v55 = vadd.f32 %v1457_v45, %v1456_v33  ;;  %v2626_v45 = vld [vmem:[%s3640_s5 + $0x24] ss:$8 sps:$4 sm:$0xff] (!%p2356_p5)  }
 0x194   : > { %v1458_v16 = vmul.f32 %v1366_v60, %v3695_v51  ;;  %v1527_v43 = vsel %vm962_vm6, %v1494_v19, %v1526_v10  ;;  %v1418_v39 = vadd.f32 %v1367_v57, %v1366_v60  ;;  %v1459_v11 = vmul.f32 %v1367_v57, %v1257_v14  ;;  %v2628_v19 = vld [vmem:[%s3640_s5 + $0x20] ss:$8 sps:$4 sm:$0xff] (!%p2356_p5)   ;;  %v2631_v51 = vld [vmem:[%s3640_s5 + $0x30] ss:$8 sps:$4 sm:$0xff] (!%p2356_p5)   ;;  %v2632_v57 = vld [vmem:[%s3640_s5 + $0x44] ss:$8 sps:$4 sm:$0xff] (!%p2356_p5)  }
 0x195   : > { %v1408_v8 = vadd.f32 %v1407_v26, %v1406_v36  ;;  %v1498_v12 = vrot.slane %v1497_v40, 2  ;;  %v1413_v27 = vadd.f32 %v1412_v61, %v1411_v6  ;;  %v1503_v56 = vrot.slane %v1502_v55, 4  ;;  %v2623_v6 = vld [vmem:[%s3640_s5 + $0x14] ss:$8 sps:$4 sm:$0xff] (!%p2356_p5)   ;;  %v2635_v26 = vld [vmem:[%s3640_s5 + $0x84] ss:$8 sps:$4 sm:$0xff] (!%p2356_p5)  }
 0x196   : > { %v1419_v59 = vrot.slane %v1418_v39, 4  ;;  %v1509_v7 = vadd.f32 %v1459_v11, %v1458_v16  ;;  %v971_v15 = vadd.f32 %v3302_v0, %v891_v44  ;;  %v1062_v36 = vadd.f32 %v3306_v49, %v973_v28  ;;  %v2620_v0 = vld [vmem:[%s3640_s5 + $0x4] ss:$8 sps:$4 sm:$0xff] (!%p2356_p5)   ;;  %v2622_v49 = vld [vmem:[%s3640_s5] ss:$8 sps:$4 sm:$0xff] (!%p2356_p5)   ;;  %1674 = vmatprep.subr.bf16.mxu0 (!%p2356_p5), %v2635_v26 }
 0x197   : > { %v1409_v4 = vrot.slane %v1408_v8, 1  ;;  %v1499_v13 = vadd.f32 %v1498_v12, %v1497_v40  ;;  %v1414_v50 = vrot.slane %v1413_v27, 2  ;;  %v1504_v62 = vadd.f32 %v1503_v56, %v1502_v55  ;;  %1795 = vmatprep.subr.bf16.mxu1 (!%p2356_p5), %v2620_v0  ;;  %v2629_v40 = vld [vmem:[%s3640_s5 + $0x34] ss:$8 sps:$4 sm:$0xff] (!%p2356_p5)   ;;  %v2639_v61 = vld [vmem:[%s3640_s5 + $0x80] ss:$8 sps:$4 sm:$0xff] (!%p2356_p5)  }
 0x198   : > { %v1420_v24 = vadd.f32 %v1419_v59, %v1418_v39  ;;  %v1510_v48 = vrot.slane %v1509_v7, 4  ;;  %v1538_v38 = vcvt.s32.f32 (!%p2356_p5), %v3018_v17  ;;  %v2827_v10 = vmov (!%p2356_p5), 0   ;;  %1796 = vmatpush1.bf16.msra.mxu1 (!%p2356_p5), %v2622_v49  ;;  %v2625_v17 = vld [vmem:[%s3640_s5 + $0x10] ss:$8 sps:$4 sm:$0xff] (!%p2356_p5)   ;;  %1675 = vmatpush1.bf16.msra.mxu0 (!%p2356_p5), %v2639_v61  ;;  %v2641_v55 = vld [vmem:[%s3640_s5 + $0x94] ss:$8 sps:$4 sm:$0xff] (!%p2356_p5)  }
 0x199   : > { %v1410_v41 = vadd.f32 %v1409_v4, %v1408_v8  ;;  %v1500_v1 = vrot.slane %v1499_v13, 1  ;;  %v1415_v37 = vadd.f32 %v1414_v50, %v1413_v27  ;;  %v1505_v35 = vrot.slane %v1504_v62, 2  ;;  %2619 = vset.pattern.permute.xlu0 (!%p2356_p5), %v2827_v10  ;;  %1827 = vmatprep.mubr.bf16.mxu1 (!%p2356_p5), %v2827_v10  ;;  %v2645_v16 = vld [vmem:[%s3640_s5 + $0x90] ss:$8 sps:$4 sm:$0xff] (!%p2356_p5)   ;;  %v2634_v12 = vld [vmem:[%s3640_s5 + $0x40] ss:$8 sps:$4 sm:$0xff] (!%p2356_p5)  }
 0x19a   : > { %v1421_v63 = vrot.slane %v1420_v24, 2  ;;  %v1511_v30 = vadd.f32 %v1510_v48, %v1509_v7  ;;  %1706 = vmatprep.mubr.bf16.mxu0 (!%p2356_p5), %v2827_v10  ;;  %1797 = vmatprep.subr.bf16.mxu1 (!%p2356_p5), %v2623_v6  ;;  %v2651_v27 = vld [vmem:[%s3640_s5 + $0xa0] ss:$8 sps:$4 sm:$0xff] (!%p2356_p5)   ;;  %v2637_v56 = vld [vmem:[%s3640_s5 + $0x54] ss:$8 sps:$4 sm:$0xff] (!%p2356_p5)  }
 0x19b   : > { %v1437_v31 = vsel %vm964_vm7, %v1410_v41, %v1436_v3  ;;  %v1501_v2 = vadd.f32 %v1500_v1, %v1499_v13  ;;  %v1416_v22 = vrot.slane %v1415_v37, 1  ;;  %v1506_v52 = vadd.f32 %v1505_v35, %v1504_v62  ;;  %1676 = vmatprep.subr.bf16.mxu0 (!%p2356_p5), %v2641_v55  ;;  %v2640_v39 = vld [vmem:[%s3640_s5 + $0x50] ss:$8 sps:$4 sm:$0xff] (!%p2356_p5)   ;;  %v2653_v11 = vld [vmem:[%s3640_s5 + $0xb4] ss:$8 sps:$4 sm:$0xff] (!%p2356_p5)   ;;  %v2695_v26 = vld [vmem:[%s3642_s7 + $0x8] sm:$0xff] (!%p2356_p5)  }
 0x19c   : > { %v1422_v5 = vadd.f32 %v1421_v63, %v1420_v24  ;;  %v1512_v58 = vrot.slane %v1511_v30, 2  ;;  %v1539_v3 = vmax.f32 (!%p2356_p5), %v1538_v38, 1.0  ;;  %1798 = vmatpush1.bf16.msra.mxu1 (!%p2356_p5), %v2625_v17  ;;  %1677 = vmatpush1.bf16.msra.mxu0 (!%p2356_p5), %v2645_v16  ;;  %v2643_v4 = vld [vmem:[%s3640_s5 + $0x64] ss:$8 sps:$4 sm:$0xff] (!%p2356_p5)   ;;  %v2655_v13 = vld [vmem:[%s3640_s5 + $0xb0] ss:$8 sps:$4 sm:$0xff] (!%p2356_p5)  }
 0x19d   : > { %v1528_v14 = vsel %vm964_vm7, %v1501_v2, %v1527_v43  ;;  %v1417_v20 = vadd.f32 %v1416_v22, %v1415_v37  ;;  %v1507_v18 = vrot.slane %v1506_v52, 1  ;;  %1799 = vmatprep.subr.bf16.mxu1 (!%p2356_p5), %v2626_v45  ;;  %v2647_v43 = vld [vmem:[%s3640_s5 + $0xa4] ss:$8 sps:$4 sm:$0xff] (!%p2356_p5)   ;;  %v2658_v62 = vld [vmem:[%s3640_s5 + $0xc0] ss:$8 sps:$4 sm:$0xff] (!%p2356_p5)   ;;  %v2697_v61 = vld [vmem:[%s3642_s7 + $0x10] sm:$0xff] (!%p2356_p5)  }
 0x19e   : > { %v1423_v25 = vrot.slane %v1422_v5, 1  ;;  %v1513_v9 = vadd.f32 %v1512_v58, %v1511_v30  ;;  %2708 = vrcp.f32 (!%p2356_p5), %v1539_v3  ;;  %1678 = vmatprep.subr.bf16.mxu0 (!%p2356_p5), %v2647_v43  ;;  %v2656_v50 = vld [vmem:[%s3640_s5 + $0xc4] ss:$8 sps:$4 sm:$0xff] (!%p2356_p5)   ;;  %v2646_v59 = vld [vmem:[%s3640_s5 + $0x60] ss:$8 sps:$4 sm:$0xff] (!%p2356_p5)   ;;  %v2698_v55 = vld [vmem:[%s3642_s7 + $0x58] sm:$0xff] (!%p2356_p5)  }
 0x19f   : > { %v1438_v21 = vsel %vm966_vm8, %v1417_v20, %v1437_v31  ;;  %v1508_v46 = vadd.f32 %v1507_v18, %v1506_v52  ;;  %v2659_v7 = vld [vmem:[%s3640_s5 + $0xd4] ss:$8 sps:$4 sm:$0xff] (!%p2356_p5)   ;;  %v2652_v1 = vld [vmem:[%s3640_s5 + $0x70] ss:$8 sps:$4 sm:$0xff] (!%p2356_p5)   ;;  %v2662_v35 = vld [vmem:[%s3640_s5 + $0xe4] ss:$8 sps:$4 sm:$0xff] (!%p2356_p5)  }
 0x1a0   : > { %v1424_v54 = vadd.f32 %v1423_v25, %v1422_v5  ;;  %v1514_v29 = vrot.slane %v1513_v9, 1  ;;  %1800 = vmatpush1.bf16.msra.mxu1 (!%p2356_p5), %v2628_v19  ;;  %1679 = vmatpush1.bf16.msra.mxu0 (!%p2356_p5), %v2651_v27  ;;  %v2649_v41 = vld [vmem:[%s3640_s5 + $0x74] ss:$8 sps:$4 sm:$0xff] (!%p2356_p5)   ;;  %v2661_v37 = vld [vmem:[%s3640_s5 + $0xd0] ss:$8 sps:$4 sm:$0xff] (!%p2356_p5)   ;;  %v2692_v17 = vld [vmem:[%s3642_s7 + $0x40] sm:$0xff] (!%p2356_p5)  }
 0x1a1   : > { %v1529_v33 = vsel %vm966_vm8, %v1508_v46, %v1528_v14  ;;  %1537 = sbr.rel (%p2356_p5) target bundleno = 1050 (0x41a), region = 105  ;;  %1801 = vmatprep.subr.bf16.mxu1 (!%p2356_p5), %v2629_v40  ;;  %1680 = vmatprep.subr.bf16.mxu0 (!%p2356_p5), %v2653_v11  ;;  %v2664_v24 = vld [vmem:[%s3640_s5 + $0xe0] ss:$8 sps:$4 sm:$0xff] (!%p2356_p5)   ;;  %v2665_v48 = vld [vmem:[%s3640_s5 + $0xf4] ss:$8 sps:$4 sm:$0xff] (!%p2356_p5)  }
 0x1a2   : > { %v1439_v23 = vsel %vm968_vm9, %v1424_v54, %v1438_v21  ;;  %v1515_v34 = vadd.f32 %v1514_v29, %v1513_v9  ;;  %v2667_v31 = vld [vmem:[%s3640_s5 + $0xf0] ss:$8 sps:$4 sm:$0xff] (!%p2356_p5)   ;;  %v2670_v2 = vld [vmem:[%s3640_s5 + $0x104] ss:$8 sps:$4 sm:$0xff] (!%p2356_p5)   ;;  %v2668_v9 = vld [vmem:[%s3640_s5 + $0x100] ss:$8 sps:$4 sm:$0xff] (!%p2356_p5)  }
 0x1a3   : > { %v1441_v32 = vadd.f32 %v1439_v23, %v971_v15  ;;  %v2673_v54 = vld [vmem:[%s3640_s5 + $0x114] ss:$8 sps:$4 sm:$0xff] (!%p2356_p5)   ;;  %v2671_v29 = vld [vmem:[%s3640_s5 + $0x110] ss:$8 sps:$4 sm:$0xff] (!%p2356_p5)   ;;  %v2676_v15 = vld [vmem:[%s3640_s5 + $0x124] ss:$8 sps:$4 sm:$0xff] (!%p2356_p5)  }
 0x1a4   : > { %v1530_v53 = vsel %vm968_vm9, %v1515_v34, %v1529_v33  ;;  %1802 = vmatpush1.bf16.msra.mxu1 (!%p2356_p5), %v2631_v51  ;;  %1681 = vmatpush1.bf16.msra.mxu0 (!%p2356_p5), %v2655_v13  ;;  %v2674_v23 = vld [vmem:[%s3640_s5 + $0x120] ss:$8 sps:$4 sm:$0xff] (!%p2356_p5)   ;;  %v2679_v34 = vld [vmem:[%s3640_s5 + $0x134] ss:$8 sps:$4 sm:$0xff] (!%p2356_p5)   ;;  %v2683_v38 = vld [vmem:[%s3640_s5 + $0x150] ss:$8 sps:$4 sm:$0xff] (!%p2356_p5)  }
 0x1a5   : > { %1442 = vst [vmem:[#allocation2] sm:$0xff] %v1441_v32  ;;  %v1532_v60 = vadd.f32 %v1530_v53, %v1062_v36  ;;  %1803 = vmatprep.subr.bf16.mxu1 (!%p2356_p5), %v2632_v57  ;;  %1682 = vmatprep.subr.bf16.mxu0 (!%p2356_p5), %v2656_v50  ;;  %v2677_v36 = vld [vmem:[%s3640_s5 + $0x130] ss:$8 sps:$4 sm:$0xff] (!%p2356_p5)   ;;  %v2682_v32 = vld [vmem:[%s3640_s5 + $0x144] ss:$8 sps:$4 sm:$0xff] (!%p2356_p5)  }
 0x1a6   : > { %v2680_v53 = vld [vmem:[%s3640_s5 + $0x140] ss:$8 sps:$4 sm:$0xff] (!%p2356_p5)   ;;  %v2688_v0 = vld [vmem:[%s3640_s5 + $0x164] ss:$8 sps:$4 sm:$0xff] (!%p2356_p5)   ;;  %v2691_v49 = vld [vmem:[%s3640_s5 + $0x174] ss:$8 sps:$4 sm:$0xff] (!%p2356_p5)  }
 0x1a7   : > { %1533 = vst [vmem:[#allocation3] sm:$0xff] %v1532_v60  ;;  %v2685_v60 = vld [vmem:[%s3640_s5 + $0x154] ss:$8 sps:$4 sm:$0xff] (!%p2356_p5)   ;;  %v2689_v3 = vld [vmem:[%s3640_s5 + $0x170] ss:$8 sps:$4 sm:$0xff] (!%p2356_p5)   ;;  %v2693_v45 = vld [vmem:[%s3642_s7] sm:$0xff] (!%p2356_p5)  }
 0x1a8   : > { %v2709_v8 = vpop.eup %2708  ;;  %1804 = vmatpush1.bf16.msra.mxu1 %v2634_v12  ;;  %1683 = vmatpush1.bf16.msra.mxu0 %v2658_v62  ;;  %v1836_v6 = vld [vmem:[%s3012_s16] sm:$0xf]  ;;  %v2694_v19 = vld [vmem:[%s3642_s7 + $0x48] sm:$0xff]   ;;  %v2696_v40 = vld [vmem:[%s3642_s7 + $0x50] sm:$0xff]  }
 0x1a9   : > { %1544 = vperm.xlu0 %2619, %v2709_v8   ;;  %1805 = vmatprep.subr.bf16.mxu1 %v2637_v56  ;;  %v2699_v51 = vld [vmem:[%s3642_s7 + $0x18] sm:$0xff]   ;;  %v2700_v16 = vld [vmem:[%s3642_s7 + $0x60] sm:$0xff]   ;;  %v2702_v43 = vld [vmem:[%s3642_s7 + $0x68] sm:$0xff]  }
 0x1aa   : > { %1684 = vmatprep.subr.bf16.mxu0 %v2659_v7  ;;  %v2701_v57 = vld [vmem:[%s3642_s7 + $0x20] sm:$0xff]   ;;  %v2703_v8 = vld [vmem:[%s3642_s7 + $0x28] sm:$0xff]   ;;  %v2704_v12 = vld [vmem:[%s3642_s7 + $0x70] sm:$0xff]  }
 0x1ab   : > { %v2705_v27 = vld [vmem:[%s3642_s7 + $0x30] sm:$0xff]   ;;  %v2706_v56 = vld [vmem:[%s3642_s7 + $0x78] sm:$0xff]  }
 0x1ac   : > { %1806 = vmatpush1.bf16.msra.mxu1 %v2640_v39  ;;  %1685 = vmatpush1.bf16.msra.mxu0 %v2661_v37  ;;  %v1541_v22 = vld [vmem:[#allocation2] sm:$0xff]  ;;  %v2707_v39 = vld [vmem:[%s3642_s7 + $0x38] sm:$0xff]  }
 0x1ad   : > { %1807 = vmatprep.subr.bf16.mxu1 %v2643_v4  ;;  %1686 = vmatprep.subr.bf16.mxu0 %v2662_v35  ;;  %v1976_v35 = vld [vmem:[%s3641_s6] sm:$0x3] }
 0x1ae   : > { %v1548_v52 = vld [vmem:[#allocation3] sm:$0xff] }
 0x1b0   : > { %1808 = vmatpush1.bf16.msra.mxu1 %v2646_v59  ;;  %1687 = vmatpush1.bf16.msra.mxu0 %v2664_v24  ;;  %v1981_v24 = vrot.slane %v1976_v35, %v3063_v42  ;;  %v2405_v42 = vld [vmem:[%s3643_s8] ss:$0 sm:$0xff] }
 0x1b1   : > { %1809 = vmatprep.subr.bf16.mxu1 %v2649_v41  ;;  %1688 = vmatprep.subr.bf16.mxu0 %v2665_v48 }
 0x1b4   : > { %1810 = vmatpush1.bf16.msra.mxu1 %v2652_v1  ;;  %1689 = vmatpush1.bf16.msra.mxu0 %v2667_v31  ;;  %v1985_v31 = vrot.slane %v1976_v35, %v3067_v47 }
 0x1b5   : > { %1933 = vmatprep.subr.bf16.mxu0 %v2670_v2  ;;  %2447 = vmatprep.subr.bf16.mxu1 %v2692_v17 }
 0x228   : > { %v1545_v63 = vpop.permute.xlu0 %1544 }
 0x229   : > { %v1547_v30 = vmul.f32 %v1545_v63, %v1541_v22  ;;  %v1549_v14 = vmul.f32 %v1548_v52, %v1545_v63 }
 0x22b   : > { %v1550_v20 = vmul.f32 %v1547_v30, %v1547_v30  ;;  %v1560_v18 = vpack.c.bf16 %v1547_v30, %v1547_v30 }
 0x22d   : > { %v1551_v5 = vsub.f32 %v1549_v14, %v1550_v20  ;;  %1828 = vmatmul.mubr.bf16.vlgmr.msra.gmra.mrb[0].mxu1 %v1560_v18 }
 0x22e   : > { %2448 = vmatpush3.bf16.msra.mxu1 %v2693_v45 }
 0x22f   : > { %v1552_v58 = vmax.f32 %v1551_v5, 1e-06  ;;  %2449 = vmatprep.subr.bf16.mxu1 %v2694_v19 }
 0x231   : > { %2710 = vrsqrt.f32 %v1552_v58  ;;  %vm1555_vm10 = vcmp.eq.f32.partialorder %v1552_v58, inf  ;;  %v1558_v46 = vand.u32 2147483648, %v1552_v58  ;;  %vm1557_vm11 = vcmp.eq.f32.partialorder %v1552_v58, 0.0 }
 0x232   : > { %2450 = vmatpush3.bf16.msra.mxu1 %v2695_v26 }
 0x233   : > { %2451 = vmatprep.subr.bf16.mxu1 %v2696_v40 }
 0x236   : > { %2452 = vmatpush3.bf16.msra.mxu1 %v2697_v61 }
 0x237   : > { %2453 = vmatprep.subr.bf16.mxu1 %v2698_v55 }
 0x23a   : > { %2454 = vmatpush3.bf16.msra.mxu1 %v2699_v51 }
 0x23b   : > { %v2711_v44 = vpop.eup %2710  ;;  %2455 = vmatprep.subr.bf16.mxu1 %v2700_v16 }
 0x23c   : > { %v1554_v21 = vmul.f32 %v2711_v44, %v1552_v58 }
 0x23e   : > { %v1556_v25 = vsel %vm1555_vm10, %v1552_v58, %v1554_v21  ;;  %2456 = vmatpush3.bf16.msra.mxu1 %v2701_v57 }
 0x23f   : > { %v1559_v28 = vsel %vm1557_vm11, %v1558_v46, %v1556_v25  ;;  %2457 = vmatprep.subr.bf16.mxu1 %v2702_v43 }
 0x240   : > { %v1577_v33 = vpack.c.bf16 %v1559_v28, %v1559_v28 }
 0x242   : > { %1707 = vmatmul.mubr.bf16.vlgmr.msra.gmra.mrb[0].mxu0 %v1577_v33  ;;  %2458 = vmatpush3.bf16.msra.mxu1 %v2703_v8 }
 0x243   : > { %1934 = vmatpush1.bf16.msra.mxu0 %v2668_v9  ;;  %1965 = vmatprep.mubr.bf16.mxu0 %v2827_v10  ;;  %v2686_v10 = vld [vmem:[%s3640_s5 + $0x160] ss:$8 sps:$4 sm:$0xff]  }
 0x244   : > { %1935 = vmatprep.subr.bf16.mxu0 %v2673_v54  ;;  %2459 = vmatprep.subr.bf16.mxu1 %v2704_v12 }
 0x246   : > { %2460 = vmatpush3.bf16.msra.mxu1 %v2705_v27 }
 0x247   : > { %1936 = vmatpush1.bf16.msra.mxu0 %v2671_v29  ;;  %2461 = vmatprep.subr.bf16.mxu1 %v2706_v56 }
 0x248   : > { %1937 = vmatprep.subr.bf16.mxu0 %v2676_v15 }
 0x24a   : > { %2462 = vmatpush3.bf16.msra.mxu1 %v2707_v39 }
 0x24b   : > { %1938 = vmatpush1.bf16.msra.mxu0 %v2674_v23 }
 0x24c   : > { %1939 = vmatprep.subr.bf16.mxu0 %v2679_v34 }
 0x24f   : > { %1940 = vmatpush1.bf16.msra.mxu0 %v2677_v36 }
 0x250   : > { %1941 = vmatprep.subr.bf16.mxu0 %v2682_v32 }
 0x253   : > { %1942 = vmatpush1.bf16.msra.mxu0 %v2680_v53 }
 0x254   : > { %1943 = vmatprep.subr.bf16.mxu0 %v2685_v60 }
 0x257   : > { %1944 = vmatpush1.bf16.msra.mxu0 %v2683_v38 }
 0x258   : > { %1945 = vmatprep.subr.bf16.mxu0 %v2688_v0 }
 0x25b   : > { %1946 = vmatpush1.bf16.msra.mxu0 %v2686_v10 }
 0x25c   : > { %1947 = vmatprep.subr.bf16.mxu0 %v2691_v49 }
 0x25f   : > { %1948 = vmatpush1.bf16.msra.mxu0 %v2689_v3 }
 0x262   : > { %1966 = vmatmul.mubr.bf16.vlgmr.msra.gmra.mrb[4].mxu0 %v1836_v6 }
 0x300   : > { %v1829_v11 = vpop.f32.mrb[0].mxu1 }
 0x301   : > { %v1831_v4 = vpop.f32.mrb[1].mxu1 }
 0x302   : > { %v1833_v13 = vpop.f32.mrb[2].mxu1 }
 0x303   : > { %v1834_v50 = vpop.f32.mrb[3].mxu1 }
 0x315   : > { %v1708_v62 = vpop.f32.mrb[0].mxu0 }
 0x316   : > { %v1830_v59 = vadd.f32 %v1829_v11, %v1708_v62  ;;  %v1710_v7 = vpop.f32.mrb[1].mxu0 }
 0x317   : > { %v1832_v41 = vadd.f32 %v1831_v4, %v1710_v7  ;;  %v1712_v1 = vpop.f32.mrb[2].mxu0 }
 0x318   : > { %v1713_v37 = vpop.f32.mrb[3].mxu0 }
 0x335   : > { %v1967_v48 = vpop.f32.mrb[4].mxu0 }
 0x336   : > { %v1974_v2 = vadd.f32 %v1967_v48, %v1830_v59  ;;  %v1969_v22 = vpop.f32.mrb[5].mxu0 }
 0x337   : > { %v1975_v52 = vadd.f32 %v1969_v22, %v1832_v41  ;;  %v1971_v63 = vpop.f32.mrb[6].mxu0 }
 0x338   : > { %v1988_v30 = vadd.f32 %v1981_v24, %v1974_v2  ;;  %v1972_v14 = vpop.f32.mrb[7].mxu0 }
 0x339   : > { %v1989_v20 = vadd.f32 %v1985_v31, %v1975_v52 }
 0x33a   : > { %v1990_v18 = vmax.f32 %v1988_v30, 0.0 }
 0x33b   : > { %v1991_v5 = vmax.f32 %v1989_v20, 0.0 }
 0x33c   : > { %v1992_v44 = vpack.c.bf16 %v1990_v18, %v1990_v18 }
 0x33d   : > { %v1993_v58 = vpack.c.bf16 %v1991_v5, %v1991_v5 }
 0x33f   : > { %2161 = vmatprep.mubr.bf16.mxu1 %v1993_v58 }
 0x340   : > { %2162 = vmatmul.mubr.bf16.vlgmr.msra.gmra.mrb[4].mxu1 %v1992_v44 }
 0x413   : > { %v2463_v21 = vpop.f32.mrb[4].mxu1 }
 0x414   : > { %v2464_v47 = vpop.f32.mrb[5].mxu1 }
 0x415   : > { %v2465_v46 = vadd.f32 %v2464_v47, %v2463_v21  ;;  %v2466_v25 = vpop.f32.mrb[6].mxu1 }
 0x416   : > { %v2467_v9 = vpop.f32.mrb[7].mxu1 }
 0x417   : > { %v2164_v28 = vadd.f32 %v2465_v46, %v2405_v42 }
 0x419   : > { %2169 = vst [vmem:[%s539_s30] sm:$0xff] %v2164_v28 }
 0x41a PF: > { %s2423_s29 = sshll.u32 %s2810_s15, 7  ;;  %s3696_s25 = sld [smem:[#allocation15_spill]] }
 0x41b   : > { %s2184_s0 = sshll.u32 %s539_s30, 4  ;;  %s2171_s17 = scalar_lea.sflag [#allocation6], %s537_s21  ;;  %s2185_s0 = int_to_ptr.vmem [resolvable:$true] %s2184_s0 }
 0x41c   : > { %s2712_s22 = scalar_lea.vmem %s2185_s0, 128  ;;  %s2828_s16 = smov [#allocation5]  }
 0x41d   : > { %p2713_p6 = scmp.ne.s32.totalorder %s2185_s0, %s2712_s22  ;;  %s2716_s14 = sshll.u32 %s2828_s16, 4  ;;  %s2717_s14 = int_to_ptr.vmem [resolvable:$false] %s2716_s14 }
 0x41e   : > { %s2718_s24 = scalar_lea.vmem %s2717_s14, 256  ;;  %p2719_p10 = scmp.lt.s32.totalorder %s2185_s0, %s2717_s14 }
 0x41f   : > { %p2714_p8 = pnand %p2713_p6, %p2951_p7  ;;  %p2720_p11 = scmp.lt.s32.totalorder %s2718_s24, %s2712_s22 }
 0x420   : > { %s3578_s12 = scalar_lea.hbm %s3696_s25, %s2423_s29 }
 0x421   : > { %p2715_p9 = pneg %p2714_p8  ;;  %p2721_p13 = por %p2720_p11, %p2719_p10 }
 0x423   : > { %p2722_p0 = pnand %p2721_p13, %p2715_p9 }
 0x425   : > { %2725 = shalt.err (!%p2722_p0)
}
 0x426   : > { %s2726_s15 = scalar_lea.hbm %s3578_s12, 128  ;;  %s2730_s30 = scalar_lea.hbm %s3696_s25, 256 }
 0x427   : > { %p2727_p1 = scmp.ne.s32.totalorder %s3578_s12, %s2726_s15  ;;  %p2731_p4 = scmp.lt.u32.totalorder %s3578_s12, %s3696_s25 }
 0x428   : > { %p2732_p5 = scmp.lt.u32.totalorder %s2730_s30, %s2726_s15  ;;  %p2734_p8 = scmp.lt.u32.totalorder %s2726_s15, %s3578_s12 }
 0x429   : > { %p2728_p2 = pnand %p2727_p1, %p2951_p7 }
 0x42a   : > { %p2733_p6 = por %p2732_p5, %p2731_p4 }
 0x42b   : > { %p2729_p3 = pneg %p2728_p2 }
 0x42c   : > { %p2735_p9 = por %p2734_p8, %p2733_p6 }
 0x42e   : > { %p2736_p10 = pnand %p2735_p9, %p2729_p3 }
 0x430   : > { %2739 = shalt.err (!%p2736_p10)
}
 0x431   : > { %2509 = dma.vmem_to_hbm [thread:$0]  (%p2951_p7), %s2185_s0, 128, %s3578_s12, %s2171_s17  }
 0x432 PF: > { %s3697_s26 = sld [smem:[#allocation8_spill]]  ;;  %p2515_p11 = scmp.ge.s32.totalorder %s2822_s18, 2 }
 0x434   : > { %p2512_p13 = pnand %p2515_p11, %p2959_p12 }
 0x438   : > { %s2196_s22 = sand.u32 1, %s3697_s26  }
 0x439   : > { %s2197_s16 = scalar_lea.sflag [#allocation6], %s2196_s22 }
 0x43a   : > { %2781 = dma.done.wait (!%p2512_p13), %s2197_s16, 128  }
 0x43b   : > { %2783 = vsyncadd (!%p2512_p13), %s2197_s16, 4294967168  ;;  %s22_s18 = sadd.s32 1, %s2822_s18   ;;  %s3699_s14 = sld [smem:[#allocation9_spill]] }
 0x43c   : > { %p19_p0 = scmp.ge.s32.totalorder %s22_s18, 6   ;;  %s3700_s15 = sld [smem:[#allocation10_spill]] }
 0x43d   : > { %s3701_s16 = sld [smem:[#allocation11_spill]]  ;;  %s3702_s17 = sld [smem:[#allocation12_spill]] }
 0x43e   : > { %s3703_s30 = smov %s2790_s10  ;;  %s3704_s10 = smov %s2794_s11 }
 0x43f   : > { %s3705_s11 = smov %s2964_s9  ;;  %s3706_s12 = smov %s2802_s13 }
 0x440   : > { %s3707_s13 = smov %s2967_s19  ;;  %21 = sbr.rel (!%p19_p0) target bundleno = 9 (0x9), region = 152 }
 0x447   :  { %2202 = vsyncpa [#allocation6], 1 }
 0x448   :  { %2204 = vsyncpa [#allocation6 + $0x1], 1 }

// kernel: tpu_custom_call.1
= control target key start
LH: loop header
LB: loop body
LE: loop exit
PB: predicated region body
PF: predicated region fallthrough
CT: control target
= control target key end

     0   :  { %s3635_s0 = inlined_call_operand.vmem [shape: bf16[16,64,32], index: 0, kind: input, shape index: {}]   ;;  %s3636_s1 = inlined_call_operand.vmem [shape: s32[16,1], index: 1, kind: input, shape index: {}]   ;;  %s3637_s2 = inlined_call_operand.vmem [shape: bf16[16,128], index: 2, kind: input, shape index: {}]   ;;  %s3638_s3 = inlined_call_operand.vmem [shape: bf16[32,128], index: 3, kind: input, shape index: {}]   ;;  %s3639_s4 = inlined_call_operand.vmem [shape: f32[1,128], index: 4, kind: input, shape index: {}]   ;;  %s3640_s5 = inlined_call_operand.vmem [shape: bf16[384,256], index: 5, kind: input, shape index: {}]   ;;  %s3641_s6 = inlined_call_operand.vmem [shape: f32[1,256], index: 6, kind: input, shape index: {}]   ;;  %s3642_s7 = inlined_call_operand.vmem [shape: bf16[256,128], index: 7, kind: input, shape index: {}]   ;;  %s3643_s8 = inlined_call_operand.vmem [shape: f32[1,128], index: 8, kind: input, shape index: {}]   ;;  %s3644_s9 = inlined_call_operand.hbm [shape: f32[16,128], index: 9, kind: output, shape index: {}]  }
   0x1   :  { %3652 = sst [smem:[#allocation14_spill]] %s3635_s0 }
   0x2   :  { %3653 = sst [smem:[#allocation15_spill]] %s3644_s9 }
   0x3   :  { %14 = vsyncpa [#allocation6], 0 }
   0x4   :  { %16 = vsyncpa [#allocation6 + $0x1], 0  ;;  %s2879_s30 = smov 0   ;;  %s2881_s10 = smov 0  }
   0x5   :  { %s2883_s11 = smov 0   ;;  %s2885_s12 = smov 0  }
   0x6   :  { %s2887_s13 = smov 0   ;;  %s2889_s14 = smov 0  }
   0x7   :  { %s2891_s15 = smov 0   ;;  %s2893_s16 = smov 0  }
   0x8   :  { %s2895_s17 = smov 0   ;;  %s2897_s18 = smov 0  }
   0x9 LB: > { %3654 = sst [smem:[#allocation8_spill]] %s2786_s30  ;;  %s2287_s19 = sadd.s32 4294967295, %s2822_s18   ;;  %s2822_s18 = sphi %s2897_s18, %s22_s18   ;;  %s2818_s17 = sphi %s2895_s17, %s3702_s17   ;;  %s2814_s16 = sphi %s2893_s16, %s3701_s16   ;;  %s2810_s15 = sphi %s2891_s15, %s3700_s15   ;;  %s2806_s14 = sphi %s2889_s14, %s3699_s14   ;;  %s2802_s13 = sphi %s2887_s13, %s3707_s13   ;;  %s2798_s12 = sphi %s2885_s12, %s3706_s12   ;;  %s2794_s11 = sphi %s2883_s11, %s3705_s11   ;;  %s2790_s10 = sphi %s2881_s10, %s3704_s10   ;;  %s2786_s30 = sphi %s2879_s30, %s3703_s30  }
   0xa   : > { %3655 = sst [smem:[#allocation9_spill]] %s2814_s16  ;;  %s2288_s20 = sadd.s32 4294967294, %s2822_s18  }
   0xb   : > { %3656 = sst [smem:[#allocation10_spill]] %s2818_s17  ;;  %s31_s21 = sadd.s32 1, %s2814_s16 }
   0xc   : > { %s34_s22 = sadd.s32 1, %s2818_s17  ;;  %p32_p0 = scmp.ge.s32.totalorder %s31_s21, 2 }
   0xd   : > { %s43_s23 = sadd.s32 1, %s2802_s13  ;;  %p50_p1 = scmp.ne.s32.totalorder %s2802_s13, %s2798_s12 }
   0xe   : > { %p51_p2 = scmp.eq.s32.totalorder %s2822_s18, 0  ;;  %s3709_s21 = smov (%p32_p0, %s31_s21), 0 }
   0xf   : > { %3657 = sst [smem:[#allocation11_spill]] %s3709_s21  ;;  %s3711_s22 = smov (!%p32_p0, %s34_s22), %s2818_s17 }
  0x10   : > { %s39_s24 = ssub.s32 %s2814_s16, %s3709_s21  ;;  %p2942_p3 = por %p51_p2, %p50_p1 }
  0x11   : > { %p36_p4 = scmp.ge.s32.totalorder %s3711_s22, 2  ;;  %s247_s26 = sadd.s32 1, %s2794_s11 }
  0x12   : > { %p257_p5 = scmp.ne.s32.totalorder %s2794_s11, %s2790_s10  ;;  %p258_p6 = scmp.eq.s32.totalorder %s2287_s19, 3 }
  0x13   : > { %s3713_s22 = smov (%p36_p4, %s3711_s22), 0  ;;  %p263_p8 = scmp.ne.s32.totalorder %s2790_s10, %s2786_s30 }
  0x14   : > { %3659 = sst [smem:[#allocation12_spill]] %s3713_s22  ;;  %p2951_p7 = por %p258_p6, %p257_p5 }
  0x15   : > { %s38_s28 = ssub.s32 %s2818_s17, %s3713_s22  ;;  %p264_p9 = scmp.eq.s32.totalorder %s2288_s20, 3 }
  0x16   : > { %s40_s29 = sor.u32 %s39_s24, %s38_s28  ;;  %p245_p10 = scmp.eq.s32.totalorder %s38_s28, 0 }
  0x17   : > { %p41_p11 = scmp.eq.s32.totalorder %s40_s29, 0  ;;  %p2959_p12 = por %p264_p9, %p263_p8 }
  0x18   : > { %s2964_s9 = scalar_select %p245_p10, %s2794_s11, %s247_s26  }
  0x19   : > { %s3661_s21 = scalar_select %p2959_p12, 1, 0 }
  0x1a   : > { %s2967_s19 = scalar_select %p41_p11, %s2802_s13, %s43_s23  }
  0x1b   : > { %3662 = sst [smem:[#allocation13_spill]] %s3661_s21  ;;  %p2290_p13 = scmp.ge.s32.totalorder %s2822_s18, 4 }
  0x1d   : > { %298 = sbr.rel (%p2290_p13) target bundleno = 54 (0x36), region = 40 }
  0x24   : > { %301 = sbr.rel (!%p2942_p3) target bundleno = 54 (0x36), region = 44  ;;  %s303_s20 = sand.u32 (%p2942_p3), 1, %s2802_s13  }
  0x25   : > { %s2293_s24 = sshll.u32 (%p2942_p3), %s2814_s16, 2  ;;  %s2291_s28 = sshll.u32 (%p2942_p3), %s303_s20, 7 }
  0x26   : > { %s2426_s29 = sshll.u32 (%p2942_p3), %s2818_s17, 6  ;;  %s3663_s0 = sld [smem:[#allocation14_spill]] (%p2942_p3) }
  0x27   : > { %s309_s22 = sadd.s32 (%p2942_p3), %s2426_s29, %s2293_s24  ;;  %s305_s25 = scalar_lea.vmem (%p2942_p3), [#allocation4], %s2291_s28 }
  0x28   : > { %s2295_s30 = sshll.u32 (%p2942_p3), %s309_s22, 2 }
  0x2c   : > { %s2978_s23 = scalar_lea.vmem %s3663_s0, %s2295_s30 }
  0x2d   : > { %v327_v0 = vld [vmem:[%s2978_s23] sm:$0xff]   ;;  %v331_v1 = vld [vmem:[%s2978_s23 + $0x8] sm:$0xff]  }
  0x2e   : > { %v335_v2 = vld [vmem:[%s2978_s23 + $0x20] sm:$0xff]   ;;  %328 = vst [vmem:[%s305_s25] sm:$0xff] %v327_v0   ;;  %332 = vst [vmem:[%s305_s25 + $0x8] sm:$0xff] %v331_v1   ;;  %v339_v3 = vld [vmem:[%s2978_s23 + $0x28] sm:$0xff]  }
  0x2f   : > { %336 = vst [vmem:[%s305_s25 + $0x10] sm:$0xff] %v335_v2   ;;  %v343_v4 = vld [vmem:[%s2978_s23 + $0x40] sm:$0xff]   ;;  %v347_v5 = vld [vmem:[%s2978_s23 + $0x48] sm:$0xff]   ;;  %340 = vst [vmem:[%s305_s25 + $0x18] sm:$0xff] %v339_v3  }
  0x30   : > { %344 = vst [vmem:[%s305_s25 + $0x20] sm:$0xff] %v343_v4   ;;  %348 = vst [vmem:[%s305_s25 + $0x28] sm:$0xff] %v347_v5   ;;  %v351_v6 = vld [vmem:[%s2978_s23 + $0x60] sm:$0xff]   ;;  %v355_v7 = vld [vmem:[%s2978_s23 + $0x68] sm:$0xff]  }
  0x31   : > { %v359_v8 = vld [vmem:[%s2978_s23 + $0x80] sm:$0xff]   ;;  %352 = vst [vmem:[%s305_s25 + $0x30] sm:$0xff] %v351_v6   ;;  %356 = vst [vmem:[%s305_s25 + $0x38] sm:$0xff] %v355_v7   ;;  %v363_v9 = vld [vmem:[%s2978_s23 + $0x88] sm:$0xff]  }
  0x32   : > { %360 = vst [vmem:[%s305_s25 + $0x40] sm:$0xff] %v359_v8   ;;  %v367_v10 = vld [vmem:[%s2978_s23 + $0xa0] sm:$0xff]   ;;  %v371_v11 = vld [vmem:[%s2978_s23 + $0xa8] sm:$0xff]   ;;  %364 = vst [vmem:[%s305_s25 + $0x48] sm:$0xff] %v363_v9  }
  0x33   : > { %368 = vst [vmem:[%s305_s25 + $0x50] sm:$0xff] %v367_v10   ;;  %372 = vst [vmem:[%s305_s25 + $0x58] sm:$0xff] %v371_v11   ;;  %v375_v12 = vld [vmem:[%s2978_s23 + $0xc0] sm:$0xff]   ;;  %v379_v13 = vld [vmem:[%s2978_s23 + $0xc8] sm:$0xff]  }
  0x34   : > { %v383_v14 = vld [vmem:[%s2978_s23 + $0xe0] sm:$0xff]   ;;  %376 = vst [vmem:[%s305_s25 + $0x60] sm:$0xff] %v375_v12   ;;  %380 = vst [vmem:[%s305_s25 + $0x68] sm:$0xff] %v379_v13   ;;  %v387_v15 = vld [vmem:[%s2978_s23 + $0xe8] sm:$0xff]  }
  0x35   : > { %384 = vst [vmem:[%s305_s25 + $0x70] sm:$0xff] %v383_v14   ;;  %388 = vst [vmem:[%s305_s25 + $0x78] sm:$0xff] %v387_v15  }
  0x36 PF: > { %p2296_p0 = scmp.ge.s32.totalorder %s2822_s18, 1  ;;  %p490_p1 = scmp.lt.s32.totalorder %s2822_s18, 5 }
  0x38   : > { %p491_p2 = pnand %p2296_p0, %p490_p1 }
  0x39   : > { %s497_s30 = sand.u32 (!%p491_p2), 1, %s2798_s12   ;;  %s537_s21 = sand.u32 (!%p491_p2), 1, %s2790_s10  }
  0x3a   : > { %494 = sbr.rel (%p491_p2) target bundleno = 1074 (0x432), region = 93  ;;  %s2297_s22 = sshll.u32 (!%p491_p2), %s497_s30, 7 }
  0x3b   : > { %s3002_s20 = sshll.u32 (!%p491_p2), %s537_s21, 3  ;;  %p542_p3 = scmp.lt.s32.totalorder (!%p491_p2), %s2810_s15, 1 }
  0x3c   : > { %s3014_s12 = scalar_lea.vmem (!%p491_p2), [#allocation4], %s2297_s22  ;;  %s539_s30 = scalar_lea.vmem (!%p491_p2), [#allocation5], %s3002_s20 }
  0x3d   : > { %p2301_p4 = scmp.ne.s32.totalorder (!%p491_p2), %s2806_s14, 0 }
  0x41   : > { %s543_s24 = scalar_select %p542_p3, %s2810_s15, 1 }
  0x42   : > { %554 = sbr.rel (%p2301_p4) target bundleno = 73 (0x49), region = 101  ;;  %v2824_v16 = vmov (!%p2301_p4), 0.0  }
  0x43   : > { %s2299_s28 = sshll.u32 %s543_s24, 3  ;;  %s2300_s29 = sshll.u32 %s543_s24, 2  ;;  %555 = vst [vmem:[#allocation2] sm:$0xff] (!%p2301_p4), %v2824_v16  ;;  %556 = vst [vmem:[#allocation3] sm:$0xff] (!%p2301_p4), %v2824_v16 }
  0x44   : > { %s545_s25 = scalar_lea.vmem %s3636_s1, %s2299_s28  ;;  %s3012_s16 = scalar_lea.vmem %s3637_s2, %s2300_s29 }
  0x49 PF: > { %v3018_v17 = vld [vmem:[%s545_s25] sm:$0xff]  ;;  %v2825_v18 = vmov 0   ;;  %v2602_v20 = vld [vmem:[%s3638_s3 + $0x8] sm:$0xff]   ;;  %vm637_vm0 = vcmask 261120   ;;  %v2603_v21 = vld [vmem:[%s3014_s12] sm:$0xff]   ;;  %v775_v37 = vlaneseq  ;;  %s2321_s28 = sshll.u32 %s2806_s14, 5 }
  0x4a   : > { %2600 = vset.pattern.permute.xlu0 %v2825_v18  ;;  %v2601_v19 = vld [vmem:[%s3638_s3] sm:$0xff]   ;;  %2473 = vmatprep.mubr.msk.bf16.mxu0 %vm637_vm0, %v2603_v21  ;;  %v2605_v23 = vld [vmem:[%s3014_s12 + $0x20] sm:$0xff]   ;;  %v2611_v24 = vld [vmem:[%s3014_s12 + $0x8] sm:$0xff]   ;;  %v779_v39 = vstv %s2321_s28  ;;  %v2826_v44 = vmov 0.0   ;;  %s1258_s29 = sadd.s32 16, %s2321_s28  ;;  %vm956_vm3 = vcmask 1041409  }
  0x4b   : > { %782 = vperm.xlu0 %2600, %v3018_v17   ;;  %2469 = vmatprep.subr.bf16.mxu0 %v2601_v19  ;;  %v2604_v22 = vld [vmem:[%s3014_s12 + $0x10] sm:$0xff]   ;;  %v2612_v25 = vld [vmem:[%s3014_s12 + $0x18] sm:$0xff]   ;;  %v2613_v26 = vld [vmem:[%s3014_s12 + $0x28] sm:$0xff]   ;;  %v776_v38 = vand.u32 127, %v775_v37  ;;  %v3060_v40 = vshrl.u32 %v775_v37, 7  ;;  %v1259_v56 = vstv %s1258_s29  ;;  %vm958_vm4 = vcmask 1042434  }
  0x4c   : > { %2489 = vmatprep.subr.bf16.mxu1 %v2601_v19  ;;  %2470 = vmatpush3.bf16.msra.mxu0 %v2601_v19  ;;  %v2606_v27 = vld [vmem:[%s3014_s12 + $0x30] sm:$0xff]   ;;  %v2607_v28 = vld [vmem:[%s3014_s12 + $0x40] sm:$0xff]   ;;  %v2614_v29 = vld [vmem:[%s3014_s12 + $0x38] sm:$0xff]   ;;  %vm960_vm5 = vcmask 1043459   ;;  %vm962_vm6 = vcmask 1044484   ;;  %vm964_vm7 = vcmask 1045509  }
  0x4d   : > { %2490 = vmatpush3.bf16.msra.mxu1 %v2601_v19  ;;  %2471 = vmatprep.subr.bf16.mxu0 %v2602_v20  ;;  %v2615_v30 = vld [vmem:[%s3014_s12 + $0x48] sm:$0xff]   ;;  %v2608_v31 = vld [vmem:[%s3014_s12 + $0x50] sm:$0xff]   ;;  %v2609_v32 = vld [vmem:[%s3014_s12 + $0x60] sm:$0xff]   ;;  %v780_v41 = vadd.s32 %v779_v39, %v776_v38  ;;  %v3063_v42 = vsub.s32 0, %v3060_v40  ;;  %v3067_v47 = vsub.s32 1, %v3060_v40  ;;  %v811_v49 = vsub.s32 2, %v3060_v40 }
  0x4e   : > { %2491 = vmatprep.subr.bf16.mxu1 %v2602_v20  ;;  %2493 = vmatprep.mubr.msk.bf16.mxu1 %vm637_vm0, %v2611_v24  ;;  %v2616_v33 = vld [vmem:[%s3014_s12 + $0x58] sm:$0xff]   ;;  %v2617_v34 = vld [vmem:[%s3014_s12 + $0x68] sm:$0xff]   ;;  %v2610_v35 = vld [vmem:[%s3014_s12 + $0x70] sm:$0xff]   ;;  %v822_v51 = vsub.s32 3, %v3060_v40  ;;  %v833_v53 = vsub.s32 4, %v3060_v40  ;;  %v844_v55 = vsub.s32 5, %v3060_v40  ;;  %v1260_v59 = vadd.s32 %v1259_v56, %v776_v38 }
  0x4f   : > { %v2618_v36 = vld [vmem:[%s3014_s12 + $0x78] sm:$0xff]   ;;  %v855_v58 = vsub.s32 6, %v3060_v40  ;;  %v866_v61 = vsub.s32 7, %v3060_v40  ;;  %vm966_vm8 = vcmask 1046534   ;;  %vm968_vm9 = vcmask 1047559   ;;  %p2356_p5 = scmp.ne.s32.totalorder %s2806_s14, 1 }
  0x50   : > { %2472 = vmatpush3.bf16.msra.mxu0 %v2602_v20 }
  0x51   : > { %2492 = vmatpush3.bf16.msra.mxu1 %v2602_v20 }
  0x53   : > { %2474 = vmatmul.mubr.msk.bf16.vlgmr.msra.gmra.mrb[0].mxu0 %vm637_vm0, %v2604_v22  ;;  %v3081_v22 = vld [vmem:[%s3639_s4] ss:$0 sm:$0xff] }
  0x54   : > { %2477 = vmatprep.mubr.msk.bf16.mxu0 %vm637_vm0, %v2605_v23  ;;  %2494 = vmatmul.mubr.msk.bf16.vlgmr.msra.gmra.mrb[0].mxu1 %vm637_vm0, %v2612_v25 }
  0x55   : > { %2497 = vmatprep.mubr.msk.bf16.mxu1 %vm637_vm0, %v2613_v26 }
  0x5b   : > { %2478 = vmatmul.mubr.msk.bf16.gmra.mrb[4].mxu0 %vm637_vm0, %v2606_v27 }
  0x5c   : > { %2481 = vmatprep.mubr.msk.bf16.mxu0 %vm637_vm0, %v2607_v28  ;;  %2498 = vmatmul.mubr.msk.bf16.gmra.mrb[4].mxu1 %vm637_vm0, %v2614_v29 }
  0x5d   : > { %2501 = vmatprep.mubr.msk.bf16.mxu1 %vm637_vm0, %v2615_v30 }
  0x63   : > { %2482 = vmatmul.mubr.msk.bf16.gmra.mrb[8].mxu0 %vm637_vm0, %v2608_v31 }
  0x64   : > { %2485 = vmatprep.mubr.msk.bf16.mxu0 %vm637_vm0, %v2609_v32  ;;  %2502 = vmatmul.mubr.msk.bf16.gmra.mrb[8].mxu1 %vm637_vm0, %v2616_v33 }
  0x65   : > { %2505 = vmatprep.mubr.msk.bf16.mxu1 %vm637_vm0, %v2617_v34 }
  0x6b   : > { %2486 = vmatmul.mubr.msk.bf16.gmra.mrb[12].mxu0 %vm637_vm0, %v2610_v35 }
  0x6c   : > { %2506 = vmatmul.mubr.msk.bf16.gmra.mrb[12].mxu1 %vm637_vm0, %v2618_v36 }
  0xca   : > { %v783_v43 = vpop.permute.xlu0 %782 }
  0xcb   : > { %vm784_vm1 = vcmp.lt.s32.totalorder %v780_v41, %v783_v43  ;;  %vm1261_vm2 = vcmp.lt.s32.totalorder %v1260_v59, %v783_v43 }
  0xcc   : > { %v2322_v45 = vsel %vm784_vm1, 1.0, %v2826_v44  ;;  %v2355_v63 = vsel %vm1261_vm2, 1.0, %v2826_v44 }
  0xcd   : > { %v790_v46 = vrot.slane %v2322_v45, %v3063_v42  ;;  %v801_v48 = vrot.slane %v2322_v45, %v3067_v47  ;;  %v812_v50 = vrot.slane %v2322_v45, %v811_v49  ;;  %v823_v52 = vrot.slane %v2322_v45, %v822_v51 }
  0xce   : > { %v834_v54 = vrot.slane %v2322_v45, %v833_v53  ;;  %v845_v57 = vrot.slane %v2322_v45, %v844_v55  ;;  %v856_v60 = vrot.slane %v2322_v45, %v855_v58  ;;  %v867_v62 = vrot.slane %v2322_v45, %v866_v61 }
  0xcf   : > { %796 = vbcast.lane.b32.xlu1 %v790_v46, 264  ;;  %792 = vbcast.lane.b32.xlu0 %v790_v46, 256  ;;  %v1267_v0 = vrot.slane %v2355_v63, %v3063_v42  ;;  %v1278_v1 = vrot.slane %v2355_v63, %v3067_v47  ;;  %v1289_v2 = vrot.slane %v2355_v63, %v811_v49 }
  0xd0   : > { %v1300_v3 = vrot.slane %v2355_v63, %v822_v51  ;;  %v1311_v4 = vrot.slane %v2355_v63, %v833_v53  ;;  %v1322_v5 = vrot.slane %v2355_v63, %v844_v55  ;;  %v1333_v6 = vrot.slane %v2355_v63, %v855_v58 }
  0xd1   : > { %v1344_v7 = vrot.slane %v2355_v63, %v866_v61 }
  0xd3   : > { %803 = vbcast.lane.b32.xlu1 %v801_v48, 256  ;;  %807 = vbcast.lane.b32.xlu0 %v801_v48, 264 }
  0xd7   : > { %814 = vbcast.lane.b32.xlu1 %v812_v50, 256  ;;  %818 = vbcast.lane.b32.xlu0 %v812_v50, 264 }
  0xdb   : > { %825 = vbcast.lane.b32.xlu1 %v823_v52, 256  ;;  %829 = vbcast.lane.b32.xlu0 %v823_v52, 264 }
  0xdf   : > { %836 = vbcast.lane.b32.xlu1 %v834_v54, 256  ;;  %840 = vbcast.lane.b32.xlu0 %v834_v54, 264 }
  0xe3   : > { %847 = vbcast.lane.b32.xlu1 %v845_v57, 256  ;;  %851 = vbcast.lane.b32.xlu0 %v845_v57, 264 }
  0xe7   : > { %858 = vbcast.lane.b32.xlu1 %v856_v60, 256  ;;  %862 = vbcast.lane.b32.xlu0 %v856_v60, 264 }
  0xeb   : > { %869 = vbcast.lane.b32.xlu1 %v867_v62, 256  ;;  %873 = vbcast.lane.b32.xlu0 %v867_v62, 264 }
  0xef   : > { %1269 = vbcast.lane.b32.xlu1 %v1267_v0, 256  ;;  %1273 = vbcast.lane.b32.xlu0 %v1267_v0, 264 }
  0xf3   : > { %1280 = vbcast.lane.b32.xlu1 %v1278_v1, 256  ;;  %1284 = vbcast.lane.b32.xlu0 %v1278_v1, 264 }
  0xf7   : > { %1291 = vbcast.lane.b32.xlu1 %v1289_v2, 256  ;;  %1295 = vbcast.lane.b32.xlu0 %v1289_v2, 264 }
  0xfb   : > { %1302 = vbcast.lane.b32.xlu1 %v1300_v3, 256  ;;  %1306 = vbcast.lane.b32.xlu0 %v1300_v3, 264 }
  0xff   : > { %1313 = vbcast.lane.b32.xlu1 %v1311_v4, 256  ;;  %1317 = vbcast.lane.b32.xlu0 %v1311_v4, 264 }
 0x103   : > { %1324 = vbcast.lane.b32.xlu1 %v1322_v5, 256  ;;  %1328 = vbcast.lane.b32.xlu0 %v1322_v5, 264 }
 0x107   : > { %1335 = vbcast.lane.b32.xlu1 %v1333_v6, 256  ;;  %1339 = vbcast.lane.b32.xlu0 %v1333_v6, 264 }
 0x10b   : > { %1346 = vbcast.lane.b32.xlu1 %v1344_v7, 256  ;;  %1350 = vbcast.lane.b32.xlu0 %v1344_v7, 264 }
 0x126   : > { %v2475_v8 = vpop.f32.mrb[0].mxu0 }
 0x127   : > { %v696_v9 = vpop.f32.mrb[1].mxu0  ;;  %v2495_v12 = vpop.f32.mrb[0].mxu1  ;;  %v3084_v25 = vadd.f32 %v2475_v8, %v3081_v22 }
 0x128   : > { %v2476_v10 = vpop.f32.mrb[2].mxu0  ;;  %v1179_v13 = vpop.f32.mrb[1].mxu1  ;;  %v3087_v27 = vadd.f32 %v3081_v22, %v696_v9  ;;  %v3096_v31 = vadd.f32 %v2495_v12, %v3081_v22 }
 0x129   : > { %v699_v11 = vpop.f32.mrb[3].mxu0  ;;  %v2496_v14 = vpop.f32.mrb[2].mxu1  ;;  %v3090_v28 = vadd.f32 %v2476_v10, %v3081_v22  ;;  %v3099_v33 = vadd.f32 %v3081_v22, %v1179_v13  ;;  %v761_v34 = vmax.f32 %v3084_v25, 0.0 }
 0x12a   : > { %v1182_v15 = vpop.f32.mrb[3].mxu1  ;;  %v3093_v29 = vadd.f32 %v3081_v22, %v699_v11  ;;  %v3103_v36 = vadd.f32 %v2496_v14, %v3081_v22  ;;  %v759_v38 = vmax.f32 %v3087_v27, 0.0 }
 0x12b   : > { %v3106_v37 = vadd.f32 %v3081_v22, %v1182_v15  ;;  %v762_v39 = vmax.f32 %v3090_v28, 0.0 }
 0x12c   : > { %v760_v45 = vmax.f32 %v3093_v29, 0.0 }
 0x12e   : > { %v2479_v16 = vpop.f32.mrb[4].mxu0 }
 0x12f   : > { %v712_v18 = vpop.f32.mrb[5].mxu0  ;;  %v2499_v21 = vpop.f32.mrb[4].mxu1  ;;  %v3111_v40 = vadd.f32 %v2479_v16, %v3081_v22 }
 0x130   : > { %v2480_v19 = vpop.f32.mrb[6].mxu0  ;;  %v1195_v23 = vpop.f32.mrb[5].mxu1  ;;  %v3114_v41 = vadd.f32 %v3081_v22, %v712_v18  ;;  %v3126_v52 = vadd.f32 %v2499_v21, %v3081_v22 }
 0x131   : > { %v715_v20 = vpop.f32.mrb[7].mxu0  ;;  %v2500_v24 = vpop.f32.mrb[6].mxu1  ;;  %v3118_v46 = vadd.f32 %v2480_v19, %v3081_v22  ;;  %v3129_v53 = vadd.f32 %v3081_v22, %v1195_v23  ;;  %v765_v61 = vmax.f32 %v3111_v40, 0.0 }
 0x132   : > { %v1198_v26 = vpop.f32.mrb[7].mxu1  ;;  %v3121_v48 = vadd.f32 %v3081_v22, %v715_v20  ;;  %v3132_v54 = vadd.f32 %v2500_v24, %v3081_v22  ;;  %v763_v62 = vmax.f32 %v3114_v41, 0.0 }
 0x133   : > { %v3140_v59 = vadd.f32 %v3081_v22, %v1198_v26  ;;  %v766_v1 = vmax.f32 %v3118_v46, 0.0 }
 0x134   : > { %v764_v2 = vmax.f32 %v3121_v48, 0.0 }
 0x136   : > { %v2483_v30 = vpop.f32.mrb[8].mxu0 }
 0x137   : > { %v728_v32 = vpop.f32.mrb[9].mxu0  ;;  %v2503_v44 = vpop.f32.mrb[8].mxu1  ;;  %v3135_v56 = vadd.f32 %v2483_v30, %v3081_v22 }
 0x138   : > { %v2484_v35 = vpop.f32.mrb[10].mxu0  ;;  %v1211_v50 = vpop.f32.mrb[9].mxu1  ;;  %v3145_v63 = vadd.f32 %v3081_v22, %v728_v32  ;;  %v3156_v5 = vadd.f32 %v2503_v44, %v3081_v22 }
 0x139   : > { %v731_v43 = vpop.f32.mrb[11].mxu0  ;;  %v2504_v55 = vpop.f32.mrb[10].mxu1  ;;  %v3148_v0 = vadd.f32 %v2484_v35, %v3081_v22  ;;  %v3162_v10 = vadd.f32 %v3081_v22, %v1211_v50  ;;  %v769_v13 = vmax.f32 %v3135_v56, 0.0 }
 0x13a   : > { %v1214_v60 = vpop.f32.mrb[11].mxu1  ;;  %v3153_v3 = vadd.f32 %v3081_v22, %v731_v43  ;;  %v3167_v15 = vadd.f32 %v2504_v55, %v3081_v22  ;;  %v767_v20 = vmax.f32 %v3145_v63, 0.0 }
 0x13b   : > { %v3170_v16 = vadd.f32 %v3081_v22, %v1214_v60  ;;  %v770_v21 = vmax.f32 %v3148_v0, 0.0 }
 0x13c   : > { %v768_v26 = vmax.f32 %v3153_v3, 0.0 }
 0x13e   : > { %v2487_v4 = vpop.f32.mrb[12].mxu0 }
 0x13f   : > { %v744_v6 = vpop.f32.mrb[13].mxu0  ;;  %v2507_v24 = vpop.f32.mrb[12].mxu1  ;;  %v3176_v27 = vadd.f32 %v2487_v4, %v3081_v22 }
 0x140   : > { %v2488_v23 = vpop.f32.mrb[14].mxu0  ;;  %v3179_v29 = vadd.f32 %v3081_v22, %v744_v6  ;;  %v1227_v35 = vpop.f32.mrb[13].mxu1  ;;  %v3189_v7 = vadd.f32 %v2507_v24, %v3081_v22 }
 0x141   : > { %v797_v11 = vpop.permute.xlu1 %796  ;;  %v793_v12 = vpop.permute.xlu0 %792  ;;  %v3184_v9 = vadd.f32 %v2488_v23, %v3081_v22  ;;  %v3201_v6 = vadd.f32 %v3081_v22, %v1227_v35  ;;  %v3664_v0 = vmax.f32 %v3176_v27, 0.0 }
 0x142   : > { %v876_v18 = vmul.f32 %v797_v11, %v760_v45  ;;  %v875_v19 = vmul.f32 %v793_v12, %v759_v38  ;;  %v747_v30 = vpop.f32.mrb[15].mxu0  ;;  %v2508_v60 = vpop.f32.mrb[14].mxu1  ;;  %v771_v23 = vmax.f32 %v3179_v29, 0.0 }
 0x143   : > { %v3198_v4 = vadd.f32 %v3081_v22, %v747_v30  ;;  %v3210_v30 = vadd.f32 %v2508_v60, %v3081_v22 }
 0x144   : > { %v975_v43 = vmul.f32 %v876_v18, %v760_v45  ;;  %v892_v44 = vadd.f32 %v876_v18, %v875_v19  ;;  %v974_v50 = vmul.f32 %v875_v19, %v759_v38  ;;  %v1230_v18 = vpop.f32.mrb[15].mxu1 }
 0x145   : > { %v804_v11 = vpop.permute.xlu1 %803  ;;  %v808_v12 = vpop.permute.xlu0 %807 }
 0x146   : > { %v893_v32 = vrot.slane %v892_v44, 4  ;;  %v990_v14 = vadd.f32 %v975_v43, %v974_v50  ;;  %v877_v38 = vmul.f32 %v804_v11, %v761_v34  ;;  %v878_v45 = vmul.f32 %v808_v12, %v762_v39 }
 0x148   : > { %v894_v24 = vadd.f32 %v893_v32, %v892_v44  ;;  %v991_v55 = vrot.slane %v990_v14, 4  ;;  %v976_v43 = vmul.f32 %v877_v38, %v761_v34  ;;  %v899_v50 = vadd.f32 %v878_v45, %v877_v38 }
 0x149   : > { %v977_v11 = vmul.f32 %v878_v45, %v762_v39  ;;  %v815_v12 = vpop.permute.xlu1 %814  ;;  %v819_v8 = vpop.permute.xlu0 %818  ;;  %v772_v39 = vmax.f32 %v3198_v4, 0.0  ;;  %v3666_v4 = vmax.f32 %v3184_v9, 0.0 }
 0x14a   : > { %v895_v35 = vrot.slane %v894_v24, 2  ;;  %v992_v58 = vadd.f32 %v991_v55, %v990_v14  ;;  %v900_v32 = vrot.slane %v899_v50, 4  ;;  %v879_v25 = vmul.f32 %v815_v12, %v763_v62 }
 0x14b   : > { %v997_v34 = vadd.f32 %v977_v11, %v976_v43  ;;  %v880_v28 = vmul.f32 %v819_v8, %v764_v2  ;;  %v3223_v11 = vadd.f32 %v3081_v22, %v1230_v18 }
 0x14c   : > { %v896_v38 = vadd.f32 %v895_v35, %v894_v24  ;;  %v993_v45 = vrot.slane %v992_v58, 2  ;;  %v901_v49 = vadd.f32 %v900_v32, %v899_v50  ;;  %v978_v60 = vmul.f32 %v879_v25, %v763_v62 }
 0x14d   : > { %v998_v14 = vrot.slane %v997_v34, 4  ;;  %v906_v55 = vadd.f32 %v880_v28, %v879_v25  ;;  %v979_v12 = vmul.f32 %v880_v28, %v764_v2  ;;  %v826_v51 = vpop.permute.xlu1 %825  ;;  %v830_v43 = vpop.permute.xlu0 %829 }
 0x14e   : > { %v897_v8 = vrot.slane %v896_v38, 1  ;;  %v994_v57 = vadd.f32 %v993_v45, %v992_v58  ;;  %v902_v19 = vrot.slane %v901_v49, 2  ;;  %v881_v24 = vmul.f32 %v826_v51, %v765_v61 }
 0x14f   : > { %v999_v50 = vadd.f32 %v998_v14, %v997_v34  ;;  %v907_v35 = vrot.slane %v906_v55, 4  ;;  %v1004_v41 = vadd.f32 %v979_v12, %v978_v60  ;;  %v882_v62 = vmul.f32 %v830_v43, %v766_v1 }
 0x150   : > { %v898_v32 = vadd.f32 %v897_v8, %v896_v38  ;;  %v995_v48 = vrot.slane %v994_v57, 1  ;;  %v903_v2 = vadd.f32 %v902_v19, %v901_v49  ;;  %v980_v22 = vmul.f32 %v881_v24, %v765_v61 }
 0x151   : > { %v1000_v18 = vrot.slane %v999_v50, 2  ;;  %v908_v25 = vadd.f32 %v907_v35, %v906_v55  ;;  %v1005_v58 = vrot.slane %v1004_v41, 4  ;;  %v913_v28 = vadd.f32 %v882_v62, %v881_v24  ;;  %v837_v45 = vpop.permute.xlu1 %836  ;;  %v841_v44 = vpop.permute.xlu0 %840 }
 0x152   : > { %v996_v51 = vadd.f32 %v995_v48, %v994_v57  ;;  %v904_v34 = vrot.slane %v903_v2, 1  ;;  %v981_v60 = vmul.f32 %v882_v62, %v766_v1  ;;  %v883_v38 = vmul.f32 %v837_v45, %v767_v20 }
 0x153   : > { %v1001_v14 = vadd.f32 %v1000_v18, %v999_v50  ;;  %v909_v49 = vrot.slane %v908_v25, 2  ;;  %v1006_v19 = vadd.f32 %v1005_v58, %v1004_v41  ;;  %v914_v12 = vrot.slane %v913_v28, 4 }
 0x154   : > { %v905_v40 = vadd.f32 %v904_v34, %v903_v2  ;;  %v1011_v61 = vadd.f32 %v981_v60, %v980_v22  ;;  %v982_v55 = vmul.f32 %v883_v38, %v767_v20  ;;  %v884_v57 = vmul.f32 %v841_v44, %v768_v26 }
 0x155   : > { %v1002_v43 = vrot.slane %v1001_v14, 1  ;;  %v910_v8 = vadd.f32 %v909_v49, %v908_v25  ;;  %v1007_v46 = vrot.slane %v1006_v19, 2  ;;  %v915_v1 = vadd.f32 %v914_v12, %v913_v28  ;;  %v848_v24 = vpop.permute.xlu1 %847  ;;  %v852_v35 = vpop.permute.xlu0 %851 }
 0x156   : > { %v957_v50 = vsel %vm956_vm3, %v905_v40, %v898_v32  ;;  %v1012_v62 = vrot.slane %v1011_v61, 4  ;;  %v920_v41 = vadd.f32 %v884_v57, %v883_v38  ;;  %v983_v48 = vmul.f32 %v884_v57, %v768_v26 }
 0x157   : > { %v1003_v2 = vadd.f32 %v1002_v43, %v1001_v14  ;;  %v911_v22 = vrot.slane %v910_v8, 1  ;;  %v1008_v63 = vadd.f32 %v1007_v46, %v1006_v19  ;;  %v916_v20 = vrot.slane %v915_v1, 2 }
 0x158   : > { %v1013_v18 = vadd.f32 %v1012_v62, %v1011_v61  ;;  %v921_v58 = vrot.slane %v920_v41, 4  ;;  %v1018_v44 = vadd.f32 %v983_v48, %v982_v55  ;;  %v885_v25 = vmul.f32 %v848_v24, %v769_v13 }
 0x159   : > { %v1054_v28 = vsel %vm956_vm3, %v1003_v2, %v996_v51  ;;  %v912_v45 = vadd.f32 %v911_v22, %v910_v8  ;;  %v1009_v34 = vrot.slane %v1008_v63, 1  ;;  %v917_v32 = vadd.f32 %v916_v20, %v915_v1  ;;  %v859_v60 = vpop.permute.xlu1 %858  ;;  %v863_v38 = vpop.permute.xlu0 %862 }
 0x15a   : > { %v1014_v3 = vrot.slane %v1013_v18, 2  ;;  %v922_v26 = vadd.f32 %v921_v58, %v920_v41  ;;  %v1019_v14 = vrot.slane %v1018_v44, 4  ;;  %v984_v49 = vmul.f32 %v885_v25, %v769_v13 }
 0x15b   : > { %v959_v19 = vsel %vm958_vm4, %v912_v45, %v957_v50  ;;  %v1010_v12 = vadd.f32 %v1009_v34, %v1008_v63  ;;  %v918_v40 = vrot.slane %v917_v32, 1  ;;  %v886_v61 = vmul.f32 %v852_v35, %v770_v21 }
 0x15c   : > { %v1015_v51 = vadd.f32 %v1014_v3, %v1013_v18  ;;  %v923_v55 = vrot.slane %v922_v26, 2  ;;  %v1020_v57 = vadd.f32 %v1019_v14, %v1018_v44  ;;  %v887_v43 = vmul.f32 %v859_v60, %v771_v23 }
 0x15d   : > { %v1055_v8 = vsel %vm958_vm4, %v1010_v12, %v1054_v28  ;;  %v919_v46 = vadd.f32 %v918_v40, %v917_v32  ;;  %v927_v1 = vadd.f32 %v886_v61, %v885_v25  ;;  %v985_v56 = vmul.f32 %v886_v61, %v770_v21  ;;  %v870_v13 = vpop.permute.xlu1 %869  ;;  %v874_v24 = vpop.permute.xlu0 %873 }
 0x15e   : > { %v1016_v50 = vrot.slane %v1015_v51, 1  ;;  %v924_v62 = vadd.f32 %v923_v55, %v922_v26  ;;  %v1021_v41 = vrot.slane %v1020_v57, 2  ;;  %v986_v35 = vmul.f32 %v887_v43, %v771_v23 }
 0x15f   : > { %v961_v48 = vsel %vm960_vm5, %v919_v46, %v959_v19  ;;  %v928_v2 = vrot.slane %v927_v1, 4  ;;  %v1025_v22 = vadd.f32 %v985_v56, %v984_v49  ;;  %v888_v63 = vmul.f32 %v863_v38, %v772_v39 }
 0x160   : > { %v1017_v20 = vadd.f32 %v1016_v50, %v1015_v51  ;;  %v925_v18 = vrot.slane %v924_v62, 1  ;;  %v1022_v58 = vadd.f32 %v1021_v41, %v1020_v57  ;;  %v889_v21 = vmul.f32 %v870_v13, %v3664_v0 }
 0x161   : > { %v929_v44 = vadd.f32 %v928_v2, %v927_v1  ;;  %v1026_v25 = vrot.slane %v1025_v22, 4  ;;  %v934_v28 = vadd.f32 %v888_v63, %v887_v43  ;;  %v987_v29 = vmul.f32 %v888_v63, %v772_v39  ;;  %v1270_v23 = vpop.permute.xlu1 %1269  ;;  %v1274_v45 = vpop.permute.xlu0 %1273 }
 0x162   : > { %v1056_v34 = vsel %vm960_vm5, %v1017_v20, %v1055_v8  ;;  %v926_v32 = vadd.f32 %v925_v18, %v924_v62  ;;  %v1023_v60 = vrot.slane %v1022_v58, 1  ;;  %v3665_v38 = vmov %v3664_v0 }
 0x163   : > { %v988_v3 = vmul.f32 %v889_v21, %v3665_v38  ;;  %v930_v26 = vrot.slane %v929_v44, 2  ;;  %v1027_v14 = vadd.f32 %v1026_v25, %v1025_v22  ;;  %v935_v49 = vrot.slane %v934_v28, 4 }
 0x164   : > { %v1032_v19 = vadd.f32 %v987_v29, %v986_v35  ;;  %v963_v12 = vsel %vm962_vm6, %v926_v32, %v961_v48  ;;  %v1024_v40 = vadd.f32 %v1023_v60, %v1022_v58  ;;  %v890_v39 = vmul.f32 %v874_v24, %v3666_v4 }
 0x165   : > { %v3667_v61 = vmax.f32 %v3099_v33, 0.0  ;;  %v931_v55 = vadd.f32 %v930_v26, %v929_v44  ;;  %v1028_v57 = vrot.slane %v1027_v14, 2  ;;  %v936_v43 = vadd.f32 %v935_v49, %v934_v28  ;;  %v1281_v27 = vpop.permute.xlu1 %1280  ;;  %v1285_v46 = vpop.permute.xlu0 %1284 }
 0x166   : > { %v1033_v8 = vrot.slane %v1032_v19, 4  ;;  %v1057_v1 = vsel %vm962_vm6, %v1024_v40, %v1056_v34  ;;  %v941_v56 = vadd.f32 %v890_v39, %v889_v21  ;;  %v3668_v13 = vmov %v3666_v4 }
 0x167   : > { %v1352_v51 = vmul.f32 %v1270_v23, %v3667_v61  ;;  %v989_v50 = vmul.f32 %v890_v39, %v3668_v13  ;;  %v3669_v62 = vmov %v3667_v61  ;;  %v932_v35 = vrot.slane %v931_v55, 1 }
 0x168   : > { %v1029_v24 = vadd.f32 %v1028_v57, %v1027_v14  ;;  %v937_v48 = vrot.slane %v936_v43, 2  ;;  %v1034_v2 = vadd.f32 %v1033_v8, %v1032_v19  ;;  %v942_v22 = vrot.slane %v941_v56, 4 }
 0x169   : > { %v1444_v41 = vmul.f32 %v1352_v51, %v3669_v62  ;;  %v1039_v63 = vadd.f32 %v989_v50, %v988_v3  ;;  %v3670_v20 = vmax.f32 %v3106_v37, 0.0  ;;  %v3671_v58 = vmax.f32 %v3096_v31, 0.0  ;;  %v1292_v28 = vpop.permute.xlu1 %1291  ;;  %v1296_v26 = vpop.permute.xlu0 %1295 }
 0x16a   : > { %v933_v44 = vadd.f32 %v932_v35, %v931_v55  ;;  %v1030_v21 = vrot.slane %v1029_v24, 1  ;;  %v938_v25 = vadd.f32 %v937_v48, %v936_v43  ;;  %v1035_v9 = vrot.slane %v1034_v2, 2 }
 0x16b   : > { %v1353_v18 = vmul.f32 %v1274_v45, %v3670_v20  ;;  %v1354_v0 = vmul.f32 %v1281_v27, %v3671_v58  ;;  %v943_v33 = vadd.f32 %v942_v22, %v941_v56  ;;  %v1040_v29 = vrot.slane %v1039_v63, 4 }
 0x16c   : > { %v3672_v34 = vmov %v3670_v20  ;;  %v965_v60 = vsel %vm964_vm7, %v933_v44, %v963_v12  ;;  %v1031_v38 = vadd.f32 %v1030_v21, %v1029_v24  ;;  %v939_v3 = vrot.slane %v938_v25, 1 }
 0x16d   : > { %v1369_v23 = vadd.f32 %v1353_v18, %v1352_v51  ;;  %v1445_v32 = vmul.f32 %v1353_v18, %v3672_v34  ;;  %v1036_v45 = vadd.f32 %v1035_v9, %v1034_v2  ;;  %v944_v14 = vrot.slane %v943_v33, 2  ;;  %v1303_v12 = vpop.permute.xlu1 %1302 }
 0x16e   : > { %v1041_v49 = vadd.f32 %v1040_v29, %v1039_v63  ;;  %v1058_v4 = vsel %vm964_vm7, %v1031_v38, %v1057_v1  ;;  %v940_v39 = vadd.f32 %v939_v3, %v938_v25  ;;  %v3673_v55 = vmov %v3671_v58  ;;  %v1307_v58 = vpop.permute.xlu0 %1306 }
 0x16f   : > { %v1370_v19 = vrot.slane %v1369_v23, 4  ;;  %v1460_v40 = vadd.f32 %v1445_v32, %v1444_v41  ;;  %v1037_v61 = vrot.slane %v1036_v45, 1  ;;  %v1446_v51 = vmul.f32 %v1354_v0, %v3673_v55 }
 0x170   : > { %v945_v57 = vadd.f32 %v944_v14, %v943_v33  ;;  %v1042_v37 = vrot.slane %v1041_v49, 2  ;;  %v967_v27 = vsel %vm966_vm8, %v940_v39, %v965_v60  ;;  %v3674_v13 = vmax.f32 %v3103_v36, 0.0 }
 0x171   : > { %v1371_v43 = vadd.f32 %v1370_v19, %v1369_v23  ;;  %v1461_v8 = vrot.slane %v1460_v40, 4  ;;  %v1038_v56 = vadd.f32 %v1037_v61, %v1036_v45  ;;  %v3675_v62 = vmax.f32 %v3129_v53, 0.0  ;;  %v1314_v60 = vpop.permute.xlu1 %1313 }
 0x172   : > { %v1355_v50 = vmul.f32 %v1285_v46, %v3674_v13  ;;  %v946_v1 = vrot.slane %v945_v57, 1  ;;  %v1043_v35 = vadd.f32 %v1042_v37, %v1041_v49  ;;  %v3676_v22 = vmov %v3674_v13 }
 0x173   : > { %v1356_v41 = vmul.f32 %v1292_v28, %v3675_v62  ;;  %v1372_v24 = vrot.slane %v1371_v43, 2  ;;  %v1462_v48 = vadd.f32 %v1461_v8, %v1460_v40  ;;  %v1059_v31 = vsel %vm966_vm8, %v1038_v56, %v1058_v4 }
 0x174   : > { %v1376_v2 = vadd.f32 %v1355_v50, %v1354_v0  ;;  %v1447_v63 = vmul.f32 %v1355_v50, %v3676_v22  ;;  %v3677_v20 = vmov %v3675_v62  ;;  %v947_v44 = vadd.f32 %v946_v1, %v945_v57  ;;  %v1318_v57 = vpop.permute.xlu0 %1317 }
 0x175   : > { %v1448_v18 = vmul.f32 %v1356_v41, %v3677_v20  ;;  %v1044_v21 = vrot.slane %v1043_v35, 1  ;;  %v1373_v46 = vadd.f32 %v1372_v24, %v1371_v43  ;;  %v1463_v25 = vrot.slane %v1462_v48, 2  ;;  %v1325_v22 = vpop.permute.xlu1 %1324 }
 0x176   : > { %v1377_v9 = vrot.slane %v1376_v2, 4  ;;  %v1467_v28 = vadd.f32 %v1447_v63, %v1446_v51  ;;  %v3678_v33 = vmax.f32 %v3140_v59, 0.0  ;;  %v3679_v23 = vmax.f32 %v3126_v52, 0.0 }
 0x177   : > { %v3302_v0 = vsel %vm968_vm9, %v947_v44, %v967_v27  ;;  %v1045_v36 = vadd.f32 %v1044_v21, %v1043_v35  ;;  %v1374_v32 = vrot.slane %v1373_v46, 1  ;;  %v1464_v53 = vadd.f32 %v1463_v25, %v1462_v48 }
 0x178   : > { %v1357_v29 = vmul.f32 %v1296_v26, %v3678_v33  ;;  %v1358_v34 = vmul.f32 %v1303_v12, %v3679_v23  ;;  %v1378_v38 = vadd.f32 %v1377_v9, %v1376_v2  ;;  %v1468_v3 = vrot.slane %v1467_v28, 4 }
 0x179   : > { %v1257_v14 = vmax.f32 %v3210_v30, 0.0  ;;  %v3306_v49 = vsel %vm968_vm9, %v1045_v36, %v1059_v31  ;;  %v1465_v19 = vrot.slane %v1464_v53, 1  ;;  %v3680_v26 = vmov %v3678_v33 }
 0x17a   : > { %v1383_v45 = vadd.f32 %v1357_v29, %v1356_v41  ;;  %v1449_v40 = vmul.f32 %v1357_v29, %v3680_v26  ;;  %v1255_v4 = vmax.f32 %v3223_v11, 0.0  ;;  %v1375_v39 = vadd.f32 %v1374_v32, %v1373_v46 }
 0x17b   : > { %v1379_v61 = vrot.slane %v1378_v38, 2  ;;  %v1469_v55 = vadd.f32 %v1468_v3, %v1467_v28  ;;  %v1466_v37 = vadd.f32 %v1465_v19, %v1464_v53  ;;  %v3681_v8 = vmov %v3679_v23  ;;  %v1329_v23 = vpop.permute.xlu0 %1328 }
 0x17c   : > { %v1384_v51 = vrot.slane %v1383_v45, 4  ;;  %v1474_v43 = vadd.f32 %v1449_v40, %v1448_v18  ;;  %v1450_v12 = vmul.f32 %v1358_v34, %v3681_v8  ;;  %v3682_v27 = vmax.f32 %v3132_v54, 0.0 }
 0x17d   : > { %v1380_v13 = vadd.f32 %v1379_v61, %v1378_v38  ;;  %v1470_v50 = vrot.slane %v1469_v55, 2  ;;  %v3683_v59 = vmax.f32 %v3162_v10, 0.0  ;;  %v3685_v31 = vmax.f32 %v3170_v16, 0.0  ;;  %v1336_v61 = vpop.permute.xlu1 %1335 }
 0x17e   : > { %v1359_v56 = vmul.f32 %v1307_v58, %v3682_v27  ;;  %v1385_v62 = vadd.f32 %v1384_v51, %v1383_v45  ;;  %v1475_v1 = vrot.slane %v1474_v43, 4  ;;  %v3684_v24 = vmov %v3682_v27 }
 0x17f   : > { %v1360_v41 = vmul.f32 %v1314_v60, %v3683_v59  ;;  %v1361_v2 = vmul.f32 %v1318_v57, %v3685_v31  ;;  %v1381_v52 = vrot.slane %v1380_v13, 1  ;;  %v1471_v63 = vadd.f32 %v1470_v50, %v1469_v55 }
 0x180   : > { %v1390_v35 = vadd.f32 %v1359_v56, %v1358_v34  ;;  %v1451_v48 = vmul.f32 %v1359_v56, %v3684_v24  ;;  %v1386_v20 = vrot.slane %v1385_v62, 2  ;;  %v3686_v18 = vmov %v3683_v59 }
 0x181   : > { %v1452_v58 = vmul.f32 %v1360_v41, %v3686_v18  ;;  %v1476_v44 = vadd.f32 %v1475_v1, %v1474_v43  ;;  %v1397_v25 = vadd.f32 %v1361_v2, %v1360_v41  ;;  %v1382_v9 = vadd.f32 %v1381_v52, %v1380_v13  ;;  %v1340_v1 = vpop.permute.xlu0 %1339 }
 0x182   : > { %v1391_v21 = vrot.slane %v1390_v35, 4  ;;  %v1481_v46 = vadd.f32 %v1451_v48, %v1450_v12  ;;  %v1472_v28 = vrot.slane %v1471_v63, 1  ;;  %v1387_v33 = vadd.f32 %v1386_v20, %v1385_v62 }
 0x183   : > { %v3687_v54 = vmov %v3685_v31  ;;  %v1477_v34 = vrot.slane %v1476_v44, 2  ;;  %v1398_v53 = vrot.slane %v1397_v25, 4  ;;  %v1433_v60 = vsel %vm956_vm3, %v1382_v9, %v1375_v39 }
 0x184   : > { %v1453_v29 = vmul.f32 %v1361_v2, %v3687_v54  ;;  %v1392_v36 = vadd.f32 %v1391_v21, %v1390_v35  ;;  %v1482_v32 = vrot.slane %v1481_v46, 4  ;;  %v1473_v38 = vadd.f32 %v1472_v28, %v1471_v63  ;;  %v1347_v21 = vpop.permute.xlu1 %1346 }
 0x185   : > { %v1388_v10 = vrot.slane %v1387_v33, 1  ;;  %v1478_v45 = vadd.f32 %v1477_v34, %v1476_v44  ;;  %v1399_v40 = vadd.f32 %v1398_v53, %v1397_v25  ;;  %v3688_v57 = vmax.f32 %v3156_v5, 0.0 }
 0x186   : > { %v1488_v3 = vadd.f32 %v1453_v29, %v1452_v58  ;;  %v1393_v19 = vrot.slane %v1392_v36, 2  ;;  %v1483_v26 = vadd.f32 %v1482_v32, %v1481_v46  ;;  %v1524_v55 = vsel %vm956_vm3, %v1473_v38, %v1466_v37  ;;  %v1351_v38 = vpop.permute.xlu0 %1350 }
 0x187   : > { %v1389_v51 = vadd.f32 %v1388_v10, %v1387_v33  ;;  %v1362_v43 = vmul.f32 %v1325_v22, %v3688_v57  ;;  %v1479_v8 = vrot.slane %v1478_v45, 1  ;;  %v1400_v56 = vrot.slane %v1399_v40, 2 }
 0x188   : > { %v1489_v16 = vrot.slane %v1488_v3, 4  ;;  %v1394_v12 = vadd.f32 %v1393_v19, %v1392_v36  ;;  %v1484_v27 = vrot.slane %v1483_v26, 2  ;;  %v3689_v50 = vmov %v3688_v57 }
 0x189   : > { %v1434_v39 = vsel %vm958_vm4, %v1389_v51, %v1433_v60  ;;  %v1454_v62 = vmul.f32 %v1362_v43, %v3689_v50  ;;  %v3690_v59 = vmax.f32 %v3167_v15, 0.0  ;;  %v1480_v37 = vadd.f32 %v1479_v8, %v1478_v45 }
 0x18a   : > { %v1490_v13 = vadd.f32 %v1489_v16, %v1488_v3  ;;  %v1395_v35 = vrot.slane %v1394_v12, 1  ;;  %v1485_v24 = vadd.f32 %v1484_v27, %v1483_v26  ;;  %v1401_v48 = vadd.f32 %v1400_v56, %v1399_v40 }
 0x18b   : > { %v1363_v41 = vmul.f32 %v1329_v23, %v3690_v59  ;;  %v3691_v22 = vmov %v3690_v59  ;;  %v3692_v63 = vmax.f32 %v3201_v6, 0.0  ;;  %v1525_v18 = vsel %vm958_vm4, %v1480_v37, %v1524_v55 }
 0x18c   : > { %v1491_v31 = vrot.slane %v1490_v13, 2  ;;  %v1396_v5 = vadd.f32 %v1395_v35, %v1394_v12  ;;  %v1486_v58 = vrot.slane %v1485_v24, 1  ;;  %v1402_v44 = vrot.slane %v1401_v48, 1 }
 0x18d   : > { %v1404_v2 = vadd.f32 %v1363_v41, %v1362_v43  ;;  %v1455_v52 = vmul.f32 %v1363_v41, %v3691_v22  ;;  %v1364_v20 = vmul.f32 %v1336_v61, %v3692_v63  ;;  %v3693_v28 = vmov %v3692_v63 }
 0x18e   : > { %v1492_v46 = vadd.f32 %v1491_v31, %v1490_v13  ;;  %v1435_v54 = vsel %vm960_vm5, %v1396_v5, %v1434_v39  ;;  %v1487_v29 = vadd.f32 %v1486_v58, %v1485_v24  ;;  %v1403_v15 = vadd.f32 %v1402_v44, %v1401_v48  ;;  %v891_v44 = vld [vmem:[#allocation2] sm:$0xff] }
 0x18f   : > { %v1405_v25 = vrot.slane %v1404_v2, 4  ;;  %v1495_v9 = vadd.f32 %v1455_v52, %v1454_v62  ;;  %v1456_v33 = vmul.f32 %v1364_v20, %v3693_v28  ;;  %v1365_v23 = vmul.f32 %v1340_v1, %v1255_v4  ;;  %v973_v28 = vld [vmem:[#allocation3] sm:$0xff] }
 0x190   : > { %v1493_v34 = vrot.slane %v1492_v46, 1  ;;  %v3694_v53 = vmax.f32 %v3189_v7, 0.0  ;;  %v1526_v10 = vsel %vm960_vm5, %v1487_v29, %v1525_v18  ;;  %v1436_v3 = vsel %vm962_vm6, %v1403_v15, %v1435_v54 }
 0x191   : > { %v1406_v36 = vadd.f32 %v1405_v25, %v1404_v2  ;;  %v1496_v32 = vrot.slane %v1495_v9, 4  ;;  %v1411_v6 = vadd.f32 %v1365_v23, %v1364_v20  ;;  %v1457_v45 = vmul.f32 %v1365_v23, %v1255_v4 }
 0x192   : > { %v1366_v60 = vmul.f32 %v1347_v21, %v3694_v53  ;;  %v1494_v19 = vadd.f32 %v1493_v34, %v1492_v46  ;;  %v3695_v51 = vmov %v3694_v53  ;;  %v1367_v57 = vmul.f32 %v1351_v38, %v1257_v14 }
 0x193   : > { %v1407_v26 = vrot.slane %v1406_v36, 2  ;;  %v1497_v40 = vadd.f32 %v1496_v32, %v1495_v9  ;;  %v1412_v61 = vrot.slane %v1411_v6, 4  ;;  %v1502_v55 = vadd.f32 %v1457_v45, %v1456_v33  ;;  %v2626_v45 = vld [vmem:[%s3640_s5 + $0x24] ss:$8 sps:$4 sm:$0xff] (!%p2356_p5)  }
 0x194   : > { %v1458_v16 = vmul.f32 %v1366_v60, %v3695_v51  ;;  %v1527_v43 = vsel %vm962_vm6, %v1494_v19, %v1526_v10  ;;  %v1418_v39 = vadd.f32 %v1367_v57, %v1366_v60  ;;  %v1459_v11 = vmul.f32 %v1367_v57, %v1257_v14  ;;  %v2628_v19 = vld [vmem:[%s3640_s5 + $0x20] ss:$8 sps:$4 sm:$0xff] (!%p2356_p5)   ;;  %v2631_v51 = vld [vmem:[%s3640_s5 + $0x30] ss:$8 sps:$4 sm:$0xff] (!%p2356_p5)   ;;  %v2632_v57 = vld [vmem:[%s3640_s5 + $0x44] ss:$8 sps:$4 sm:$0xff] (!%p2356_p5)  }
 0x195   : > { %v1408_v8 = vadd.f32 %v1407_v26, %v1406_v36  ;;  %v1498_v12 = vrot.slane %v1497_v40, 2  ;;  %v1413_v27 = vadd.f32 %v1412_v61, %v1411_v6  ;;  %v1503_v56 = vrot.slane %v1502_v55, 4  ;;  %v2623_v6 = vld [vmem:[%s3640_s5 + $0x14] ss:$8 sps:$4 sm:$0xff] (!%p2356_p5)   ;;  %v2635_v26 = vld [vmem:[%s3640_s5 + $0x84] ss:$8 sps:$4 sm:$0xff] (!%p2356_p5)  }
 0x196   : > { %v1419_v59 = vrot.slane %v1418_v39, 4  ;;  %v1509_v7 = vadd.f32 %v1459_v11, %v1458_v16  ;;  %v971_v15 = vadd.f32 %v3302_v0, %v891_v44  ;;  %v1062_v36 = vadd.f32 %v3306_v49, %v973_v28  ;;  %v2620_v0 = vld [vmem:[%s3640_s5 + $0x4] ss:$8 sps:$4 sm:$0xff] (!%p2356_p5)   ;;  %v2622_v49 = vld [vmem:[%s3640_s5] ss:$8 sps:$4 sm:$0xff] (!%p2356_p5)   ;;  %1674 = vmatprep.subr.bf16.mxu0 (!%p2356_p5), %v2635_v26 }
 0x197   : > { %v1409_v4 = vrot.slane %v1408_v8, 1  ;;  %v1499_v13 = vadd.f32 %v1498_v12, %v1497_v40  ;;  %v1414_v50 = vrot.slane %v1413_v27, 2  ;;  %v1504_v62 = vadd.f32 %v1503_v56, %v1502_v55  ;;  %1795 = vmatprep.subr.bf16.mxu1 (!%p2356_p5), %v2620_v0  ;;  %v2629_v40 = vld [vmem:[%s3640_s5 + $0x34] ss:$8 sps:$4 sm:$0xff] (!%p2356_p5)   ;;  %v2639_v61 = vld [vmem:[%s3640_s5 + $0x80] ss:$8 sps:$4 sm:$0xff] (!%p2356_p5)  }
 0x198   : > { %v1420_v24 = vadd.f32 %v1419_v59, %v1418_v39  ;;  %v1510_v48 = vrot.slane %v1509_v7, 4  ;;  %v1538_v38 = vcvt.s32.f32 (!%p2356_p5), %v3018_v17  ;;  %v2827_v10 = vmov (!%p2356_p5), 0   ;;  %1796 = vmatpush1.bf16.msra.mxu1 (!%p2356_p5), %v2622_v49  ;;  %v2625_v17 = vld [vmem:[%s3640_s5 + $0x10] ss:$8 sps:$4 sm:$0xff] (!%p2356_p5)   ;;  %1675 = vmatpush1.bf16.msra.mxu0 (!%p2356_p5), %v2639_v61  ;;  %v2641_v55 = vld [vmem:[%s3640_s5 + $0x94] ss:$8 sps:$4 sm:$0xff] (!%p2356_p5)  }
 0x199   : > { %v1410_v41 = vadd.f32 %v1409_v4, %v1408_v8  ;;  %v1500_v1 = vrot.slane %v1499_v13, 1  ;;  %v1415_v37 = vadd.f32 %v1414_v50, %v1413_v27  ;;  %v1505_v35 = vrot.slane %v1504_v62, 2  ;;  %2619 = vset.pattern.permute.xlu0 (!%p2356_p5), %v2827_v10  ;;  %1827 = vmatprep.mubr.bf16.mxu1 (!%p2356_p5), %v2827_v10  ;;  %v2645_v16 = vld [vmem:[%s3640_s5 + $0x90] ss:$8 sps:$4 sm:$0xff] (!%p2356_p5)   ;;  %v2634_v12 = vld [vmem:[%s3640_s5 + $0x40] ss:$8 sps:$4 sm:$0xff] (!%p2356_p5)  }
 0x19a   : > { %v1421_v63 = vrot.slane %v1420_v24, 2  ;;  %v1511_v30 = vadd.f32 %v1510_v48, %v1509_v7  ;;  %1706 = vmatprep.mubr.bf16.mxu0 (!%p2356_p5), %v2827_v10  ;;  %1797 = vmatprep.subr.bf16.mxu1 (!%p2356_p5), %v2623_v6  ;;  %v2651_v27 = vld [vmem:[%s3640_s5 + $0xa0] ss:$8 sps:$4 sm:$0xff] (!%p2356_p5)   ;;  %v2637_v56 = vld [vmem:[%s3640_s5 + $0x54] ss:$8 sps:$4 sm:$0xff] (!%p2356_p5)  }
 0x19b   : > { %v1437_v31 = vsel %vm964_vm7, %v1410_v41, %v1436_v3  ;;  %v1501_v2 = vadd.f32 %v1500_v1, %v1499_v13  ;;  %v1416_v22 = vrot.slane %v1415_v37, 1  ;;  %v1506_v52 = vadd.f32 %v1505_v35, %v1504_v62  ;;  %1676 = vmatprep.subr.bf16.mxu0 (!%p2356_p5), %v2641_v55  ;;  %v2640_v39 = vld [vmem:[%s3640_s5 + $0x50] ss:$8 sps:$4 sm:$0xff] (!%p2356_p5)   ;;  %v2653_v11 = vld [vmem:[%s3640_s5 + $0xb4] ss:$8 sps:$4 sm:$0xff] (!%p2356_p5)   ;;  %v2695_v26 = vld [vmem:[%s3642_s7 + $0x8] sm:$0xff] (!%p2356_p5)  }
 0x19c   : > { %v1422_v5 = vadd.f32 %v1421_v63, %v1420_v24  ;;  %v1512_v58 = vrot.slane %v1511_v30, 2  ;;  %v1539_v3 = vmax.f32 (!%p2356_p5), %v1538_v38, 1.0  ;;  %1798 = vmatpush1.bf16.msra.mxu1 (!%p2356_p5), %v2625_v17  ;;  %1677 = vmatpush1.bf16.msra.mxu0 (!%p2356_p5), %v2645_v16  ;;  %v2643_v4 = vld [vmem:[%s3640_s5 + $0x64] ss:$8 sps:$4 sm:$0xff] (!%p2356_p5)   ;;  %v2655_v13 = vld [vmem:[%s3640_s5 + $0xb0] ss:$8 sps:$4 sm:$0xff] (!%p2356_p5)  }
 0x19d   : > { %v1528_v14 = vsel %vm964_vm7, %v1501_v2, %v1527_v43  ;;  %v1417_v20 = vadd.f32 %v1416_v22, %v1415_v37  ;;  %v1507_v18 = vrot.slane %v1506_v52, 1  ;;  %1799 = vmatprep.subr.bf16.mxu1 (!%p2356_p5), %v2626_v45  ;;  %v2647_v43 = vld [vmem:[%s3640_s5 + $0xa4] ss:$8 sps:$4 sm:$0xff] (!%p2356_p5)   ;;  %v2658_v62 = vld [vmem:[%s3640_s5 + $0xc0] ss:$8 sps:$4 sm:$0xff] (!%p2356_p5)   ;;  %v2697_v61 = vld [vmem:[%s3642_s7 + $0x10] sm:$0xff] (!%p2356_p5)  }
 0x19e   : > { %v1423_v25 = vrot.slane %v1422_v5, 1  ;;  %v1513_v9 = vadd.f32 %v1512_v58, %v1511_v30  ;;  %2708 = vrcp.f32 (!%p2356_p5), %v1539_v3  ;;  %1678 = vmatprep.subr.bf16.mxu0 (!%p2356_p5), %v2647_v43  ;;  %v2656_v50 = vld [vmem:[%s3640_s5 + $0xc4] ss:$8 sps:$4 sm:$0xff] (!%p2356_p5)   ;;  %v2646_v59 = vld [vmem:[%s3640_s5 + $0x60] ss:$8 sps:$4 sm:$0xff] (!%p2356_p5)   ;;  %v2698_v55 = vld [vmem:[%s3642_s7 + $0x58] sm:$0xff] (!%p2356_p5)  }
 0x19f   : > { %v1438_v21 = vsel %vm966_vm8, %v1417_v20, %v1437_v31  ;;  %v1508_v46 = vadd.f32 %v1507_v18, %v1506_v52  ;;  %v2659_v7 = vld [vmem:[%s3640_s5 + $0xd4] ss:$8 sps:$4 sm:$0xff] (!%p2356_p5)   ;;  %v2652_v1 = vld [vmem:[%s3640_s5 + $0x70] ss:$8 sps:$4 sm:$0xff] (!%p2356_p5)   ;;  %v2662_v35 = vld [vmem:[%s3640_s5 + $0xe4] ss:$8 sps:$4 sm:$0xff] (!%p2356_p5)  }
 0x1a0   : > { %v1424_v54 = vadd.f32 %v1423_v25, %v1422_v5  ;;  %v1514_v29 = vrot.slane %v1513_v9, 1  ;;  %1800 = vmatpush1.bf16.msra.mxu1 (!%p2356_p5), %v2628_v19  ;;  %1679 = vmatpush1.bf16.msra.mxu0 (!%p2356_p5), %v2651_v27  ;;  %v2649_v41 = vld [vmem:[%s3640_s5 + $0x74] ss:$8 sps:$4 sm:$0xff] (!%p2356_p5)   ;;  %v2661_v37 = vld [vmem:[%s3640_s5 + $0xd0] ss:$8 sps:$4 sm:$0xff] (!%p2356_p5)   ;;  %v2692_v17 = vld [vmem:[%s3642_s7 + $0x40] sm:$0xff] (!%p2356_p5)  }
 0x1a1   : > { %v1529_v33 = vsel %vm966_vm8, %v1508_v46, %v1528_v14  ;;  %1537 = sbr.rel (%p2356_p5) target bundleno = 1050 (0x41a), region = 105  ;;  %1801 = vmatprep.subr.bf16.mxu1 (!%p2356_p5), %v2629_v40  ;;  %1680 = vmatprep.subr.bf16.mxu0 (!%p2356_p5), %v2653_v11  ;;  %v2664_v24 = vld [vmem:[%s3640_s5 + $0xe0] ss:$8 sps:$4 sm:$0xff] (!%p2356_p5)   ;;  %v2665_v48 = vld [vmem:[%s3640_s5 + $0xf4] ss:$8 sps:$4 sm:$0xff] (!%p2356_p5)  }
 0x1a2   : > { %v1439_v23 = vsel %vm968_vm9, %v1424_v54, %v1438_v21  ;;  %v1515_v34 = vadd.f32 %v1514_v29, %v1513_v9  ;;  %v2667_v31 = vld [vmem:[%s3640_s5 + $0xf0] ss:$8 sps:$4 sm:$0xff] (!%p2356_p5)   ;;  %v2670_v2 = vld [vmem:[%s3640_s5 + $0x104] ss:$8 sps:$4 sm:$0xff] (!%p2356_p5)   ;;  %v2668_v9 = vld [vmem:[%s3640_s5 + $0x100] ss:$8 sps:$4 sm:$0xff] (!%p2356_p5)  }
 0x1a3   : > { %v1441_v32 = vadd.f32 %v1439_v23, %v971_v15  ;;  %v2673_v54 = vld [vmem:[%s3640_s5 + $0x114] ss:$8 sps:$4 sm:$0xff] (!%p2356_p5)   ;;  %v2671_v29 = vld [vmem:[%s3640_s5 + $0x110] ss:$8 sps:$4 sm:$0xff] (!%p2356_p5)   ;;  %v2676_v15 = vld [vmem:[%s3640_s5 + $0x124] ss:$8 sps:$4 sm:$0xff] (!%p2356_p5)  }
 0x1a4   : > { %v1530_v53 = vsel %vm968_vm9, %v1515_v34, %v1529_v33  ;;  %1802 = vmatpush1.bf16.msra.mxu1 (!%p2356_p5), %v2631_v51  ;;  %1681 = vmatpush1.bf16.msra.mxu0 (!%p2356_p5), %v2655_v13  ;;  %v2674_v23 = vld [vmem:[%s3640_s5 + $0x120] ss:$8 sps:$4 sm:$0xff] (!%p2356_p5)   ;;  %v2679_v34 = vld [vmem:[%s3640_s5 + $0x134] ss:$8 sps:$4 sm:$0xff] (!%p2356_p5)   ;;  %v2683_v38 = vld [vmem:[%s3640_s5 + $0x150] ss:$8 sps:$4 sm:$0xff] (!%p2356_p5)  }
 0x1a5   : > { %1442 = vst [vmem:[#allocation2] sm:$0xff] %v1441_v32  ;;  %v1532_v60 = vadd.f32 %v1530_v53, %v1062_v36  ;;  %1803 = vmatprep.subr.bf16.mxu1 (!%p2356_p5), %v2632_v57  ;;  %1682 = vmatprep.subr.bf16.mxu0 (!%p2356_p5), %v2656_v50  ;;  %v2677_v36 = vld [vmem:[%s3640_s5 + $0x130] ss:$8 sps:$4 sm:$0xff] (!%p2356_p5)   ;;  %v2682_v32 = vld [vmem:[%s3640_s5 + $0x144] ss:$8 sps:$4 sm:$0xff] (!%p2356_p5)  }
 0x1a6   : > { %v2680_v53 = vld [vmem:[%s3640_s5 + $0x140] ss:$8 sps:$4 sm:$0xff] (!%p2356_p5)   ;;  %v2688_v0 = vld [vmem:[%s3640_s5 + $0x164] ss:$8 sps:$4 sm:$0xff] (!%p2356_p5)   ;;  %v2691_v49 = vld [vmem:[%s3640_s5 + $0x174] ss:$8 sps:$4 sm:$0xff] (!%p2356_p5)  }
 0x1a7   : > { %1533 = vst [vmem:[#allocation3] sm:$0xff] %v1532_v60  ;;  %v2685_v60 = vld [vmem:[%s3640_s5 + $0x154] ss:$8 sps:$4 sm:$0xff] (!%p2356_p5)   ;;  %v2689_v3 = vld [vmem:[%s3640_s5 + $0x170] ss:$8 sps:$4 sm:$0xff] (!%p2356_p5)   ;;  %v2693_v45 = vld [vmem:[%s3642_s7] sm:$0xff] (!%p2356_p5)  }
 0x1a8   : > { %v2709_v8 = vpop.eup %2708  ;;  %1804 = vmatpush1.bf16.msra.mxu1 %v2634_v12  ;;  %1683 = vmatpush1.bf16.msra.mxu0 %v2658_v62  ;;  %v1836_v6 = vld [vmem:[%s3012_s16] sm:$0xf]  ;;  %v2694_v19 = vld [vmem:[%s3642_s7 + $0x48] sm:$0xff]   ;;  %v2696_v40 = vld [vmem:[%s3642_s7 + $0x50] sm:$0xff]  }
 0x1a9   : > { %1544 = vperm.xlu0 %2619, %v2709_v8   ;;  %1805 = vmatprep.subr.bf16.mxu1 %v2637_v56  ;;  %v2699_v51 = vld [vmem:[%s3642_s7 + $0x18] sm:$0xff]   ;;  %v2700_v16 = vld [vmem:[%s3642_s7 + $0x60] sm:$0xff]   ;;  %v2702_v43 = vld [vmem:[%s3642_s7 + $0x68] sm:$0xff]  }
 0x1aa   : > { %1684 = vmatprep.subr.bf16.mxu0 %v2659_v7  ;;  %v2701_v57 = vld [vmem:[%s3642_s7 + $0x20] sm:$0xff]   ;;  %v2703_v8 = vld [vmem:[%s3642_s7 + $0x28] sm:$0xff]   ;;  %v2704_v12 = vld [vmem:[%s3642_s7 + $0x70] sm:$0xff]  }
 0x1ab   : > { %v2705_v27 = vld [vmem:[%s3642_s7 + $0x30] sm:$0xff]   ;;  %v2706_v56 = vld [vmem:[%s3642_s7 + $0x78] sm:$0xff]  }
 0x1ac   : > { %1806 = vmatpush1.bf16.msra.mxu1 %v2640_v39  ;;  %1685 = vmatpush1.bf16.msra.mxu0 %v2661_v37  ;;  %v1541_v22 = vld [vmem:[#allocation2] sm:$0xff]  ;;  %v2707_v39 = vld [vmem:[%s3642_s7 + $0x38] sm:$0xff]  }
 0x1ad   : > { %1807 = vmatprep.subr.bf16.mxu1 %v2643_v4  ;;  %1686 = vmatprep.subr.bf16.mxu0 %v2662_v35  ;;  %v1976_v35 = vld [vmem:[%s3641_s6] sm:$0x3] }
 0x1ae   : > { %v1548_v52 = vld [vmem:[#allocation3] sm:$0xff] }
 0x1b0   : > { %1808 = vmatpush1.bf16.msra.mxu1 %v2646_v59  ;;  %1687 = vmatpush1.bf16.msra.mxu0 %v2664_v24  ;;  %v1981_v24 = vrot.slane %v1976_v35, %v3063_v42  ;;  %v2405_v42 = vld [vmem:[%s3643_s8] ss:$0 sm:$0xff] }
 0x1b1   : > { %1809 = vmatprep.subr.bf16.mxu1 %v2649_v41  ;;  %1688 = vmatprep.subr.bf16.mxu0 %v2665_v48 }
 0x1b4   : > { %1810 = vmatpush1.bf16.msra.mxu1 %v2652_v1  ;;  %1689 = vmatpush1.bf16.msra.mxu0 %v2667_v31  ;;  %v1985_v31 = vrot.slane %v1976_v35, %v3067_v47 }
 0x1b5   : > { %1933 = vmatprep.subr.bf16.mxu0 %v2670_v2  ;;  %2447 = vmatprep.subr.bf16.mxu1 %v2692_v17 }
 0x228   : > { %v1545_v63 = vpop.permute.xlu0 %1544 }
 0x229   : > { %v1547_v30 = vmul.f32 %v1545_v63, %v1541_v22  ;;  %v1549_v14 = vmul.f32 %v1548_v52, %v1545_v63 }
 0x22b   : > { %v1550_v20 = vmul.f32 %v1547_v30, %v1547_v30  ;;  %v1560_v18 = vpack.c.bf16 %v1547_v30, %v1547_v30 }
 0x22d   : > { %v1551_v5 = vsub.f32 %v1549_v14, %v1550_v20  ;;  %1828 = vmatmul.mubr.bf16.vlgmr.msra.gmra.mrb[0].mxu1 %v1560_v18 }
 0x22e   : > { %2448 = vmatpush3.bf16.msra.mxu1 %v2693_v45 }
 0x22f   : > { %v1552_v58 = vmax.f32 %v1551_v5, 1e-06  ;;  %2449 = vmatprep.subr.bf16.mxu1 %v2694_v19 }
 0x231   : > { %2710 = vrsqrt.f32 %v1552_v58  ;;  %vm1555_vm10 = vcmp.eq.f32.partialorder %v1552_v58, inf  ;;  %v1558_v46 = vand.u32 2147483648, %v1552_v58  ;;  %vm1557_vm11 = vcmp.eq.f32.partialorder %v1552_v58, 0.0 }
 0x232   : > { %2450 = vmatpush3.bf16.msra.mxu1 %v2695_v26 }
 0x233   : > { %2451 = vmatprep.subr.bf16.mxu1 %v2696_v40 }
 0x236   : > { %2452 = vmatpush3.bf16.msra.mxu1 %v2697_v61 }
 0x237   : > { %2453 = vmatprep.subr.bf16.mxu1 %v2698_v55 }
 0x23a   : > { %2454 = vmatpush3.bf16.msra.mxu1 %v2699_v51 }
 0x23b   : > { %v2711_v44 = vpop.eup %2710  ;;  %2455 = vmatprep.subr.bf16.mxu1 %v2700_v16 }
 0x23c   : > { %v1554_v21 = vmul.f32 %v2711_v44, %v1552_v58 }
 0x23e   : > { %v1556_v25 = vsel %vm1555_vm10, %v1552_v58, %v1554_v21  ;;  %2456 = vmatpush3.bf16.msra.mxu1 %v2701_v57 }
 0x23f   : > { %v1559_v28 = vsel %vm1557_vm11, %v1558_v46, %v1556_v25  ;;  %2457 = vmatprep.subr.bf16.mxu1 %v2702_v43 }
 0x240   : > { %v1577_v33 = vpack.c.bf16 %v1559_v28, %v1559_v28 }
 0x242   : > { %1707 = vmatmul.mubr.bf16.vlgmr.msra.gmra.mrb[0].mxu0 %v1577_v33  ;;  %2458 = vmatpush3.bf16.msra.mxu1 %v2703_v8 }
 0x243   : > { %1934 = vmatpush1.bf16.msra.mxu0 %v2668_v9  ;;  %1965 = vmatprep.mubr.bf16.mxu0 %v2827_v10  ;;  %v2686_v10 = vld [vmem:[%s3640_s5 + $0x160] ss:$8 sps:$4 sm:$0xff]  }
 0x244   : > { %1935 = vmatprep.subr.bf16.mxu0 %v2673_v54  ;;  %2459 = vmatprep.subr.bf16.mxu1 %v2704_v12 }
 0x246   : > { %2460 = vmatpush3.bf16.msra.mxu1 %v2705_v27 }
 0x247   : > { %1936 = vmatpush1.bf16.msra.mxu0 %v2671_v29  ;;  %2461 = vmatprep.subr.bf16.mxu1 %v2706_v56 }
 0x248   : > { %1937 = vmatprep.subr.bf16.mxu0 %v2676_v15 }
 0x24a   : > { %2462 = vmatpush3.bf16.msra.mxu1 %v2707_v39 }
 0x24b   : > { %1938 = vmatpush1.bf16.msra.mxu0 %v2674_v23 }
 0x24c   : > { %1939 = vmatprep.subr.bf16.mxu0 %v2679_v34 }
 0x24f   : > { %1940 = vmatpush1.bf16.msra.mxu0 %v2677_v36 }
 0x250   : > { %1941 = vmatprep.subr.bf16.mxu0 %v2682_v32 }
 0x253   : > { %1942 = vmatpush1.bf16.msra.mxu0 %v2680_v53 }
 0x254   : > { %1943 = vmatprep.subr.bf16.mxu0 %v2685_v60 }
 0x257   : > { %1944 = vmatpush1.bf16.msra.mxu0 %v2683_v38 }
 0x258   : > { %1945 = vmatprep.subr.bf16.mxu0 %v2688_v0 }
 0x25b   : > { %1946 = vmatpush1.bf16.msra.mxu0 %v2686_v10 }
 0x25c   : > { %1947 = vmatprep.subr.bf16.mxu0 %v2691_v49 }
 0x25f   : > { %1948 = vmatpush1.bf16.msra.mxu0 %v2689_v3 }
 0x262   : > { %1966 = vmatmul.mubr.bf16.vlgmr.msra.gmra.mrb[4].mxu0 %v1836_v6 }
 0x300   : > { %v1829_v11 = vpop.f32.mrb[0].mxu1 }
 0x301   : > { %v1831_v4 = vpop.f32.mrb[1].mxu1 }
 0x302   : > { %v1833_v13 = vpop.f32.mrb[2].mxu1 }
 0x303   : > { %v1834_v50 = vpop.f32.mrb[3].mxu1 }
 0x315   : > { %v1708_v62 = vpop.f32.mrb[0].mxu0 }
 0x316   : > { %v1830_v59 = vadd.f32 %v1829_v11, %v1708_v62  ;;  %v1710_v7 = vpop.f32.mrb[1].mxu0 }
 0x317   : > { %v1832_v41 = vadd.f32 %v1831_v4, %v1710_v7  ;;  %v1712_v1 = vpop.f32.mrb[2].mxu0 }
 0x318   : > { %v1713_v37 = vpop.f32.mrb[3].mxu0 }
 0x335   : > { %v1967_v48 = vpop.f32.mrb[4].mxu0 }
 0x336   : > { %v1974_v2 = vadd.f32 %v1967_v48, %v1830_v59  ;;  %v1969_v22 = vpop.f32.mrb[5].mxu0 }
 0x337   : > { %v1975_v52 = vadd.f32 %v1969_v22, %v1832_v41  ;;  %v1971_v63 = vpop.f32.mrb[6].mxu0 }
 0x338   : > { %v1988_v30 = vadd.f32 %v1981_v24, %v1974_v2  ;;  %v1972_v14 = vpop.f32.mrb[7].mxu0 }
 0x339   : > { %v1989_v20 = vadd.f32 %v1985_v31, %v1975_v52 }
 0x33a   : > { %v1990_v18 = vmax.f32 %v1988_v30, 0.0 }
 0x33b   : > { %v1991_v5 = vmax.f32 %v1989_v20, 0.0 }
 0x33c   : > { %v1992_v44 = vpack.c.bf16 %v1990_v18, %v1990_v18 }
 0x33d   : > { %v1993_v58 = vpack.c.bf16 %v1991_v5, %v1991_v5 }
 0x33f   : > { %2161 = vmatprep.mubr.bf16.mxu1 %v1993_v58 }
 0x340   : > { %2162 = vmatmul.mubr.bf16.vlgmr.msra.gmra.mrb[4].mxu1 %v1992_v44 }
 0x413   : > { %v2463_v21 = vpop.f32.mrb[4].mxu1 }
 0x414   : > { %v2464_v47 = vpop.f32.mrb[5].mxu1 }
 0x415   : > { %v2465_v46 = vadd.f32 %v2464_v47, %v2463_v21  ;;  %v2466_v25 = vpop.f32.mrb[6].mxu1 }
 0x416   : > { %v2467_v9 = vpop.f32.mrb[7].mxu1 }
 0x417   : > { %v2164_v28 = vadd.f32 %v2465_v46, %v2405_v42 }
 0x419   : > { %2169 = vst [vmem:[%s539_s30] sm:$0xff] %v2164_v28 }
 0x41a PF: > { %s2423_s29 = sshll.u32 %s2810_s15, 7  ;;  %s3696_s25 = sld [smem:[#allocation15_spill]] }
 0x41b   : > { %s2184_s0 = sshll.u32 %s539_s30, 4  ;;  %s2171_s17 = scalar_lea.sflag [#allocation6], %s537_s21  ;;  %s2185_s0 = int_to_ptr.vmem [resolvable:$true] %s2184_s0 }
 0x41c   : > { %s2712_s22 = scalar_lea.vmem %s2185_s0, 128  ;;  %s2828_s16 = smov [#allocation5]  }
 0x41d   : > { %p2713_p6 = scmp.ne.s32.totalorder %s2185_s0, %s2712_s22  ;;  %s2716_s14 = sshll.u32 %s2828_s16, 4  ;;  %s2717_s14 = int_to_ptr.vmem [resolvable:$false] %s2716_s14 }
 0x41e   : > { %s2718_s24 = scalar_lea.vmem %s2717_s14, 256  ;;  %p2719_p10 = scmp.lt.s32.totalorder %s2185_s0, %s2717_s14 }
 0x41f   : > { %p2714_p8 = pnand %p2713_p6, %p2951_p7  ;;  %p2720_p11 = scmp.lt.s32.totalorder %s2718_s24, %s2712_s22 }
 0x420   : > { %s3578_s12 = scalar_lea.hbm %s3696_s25, %s2423_s29 }
 0x421   : > { %p2715_p9 = pneg %p2714_p8  ;;  %p2721_p13 = por %p2720_p11, %p2719_p10 }
 0x423   : > { %p2722_p0 = pnand %p2721_p13, %p2715_p9 }
 0x425   : > { %2725 = shalt.err (!%p2722_p0)
}
 0x426   : > { %s2726_s15 = scalar_lea.hbm %s3578_s12, 128  ;;  %s2730_s30 = scalar_lea.hbm %s3696_s25, 256 }
 0x427   : > { %p2727_p1 = scmp.ne.s32.totalorder %s3578_s12, %s2726_s15  ;;  %p2731_p4 = scmp.lt.u32.totalorder %s3578_s12, %s3696_s25 }
 0x428   : > { %p2732_p5 = scmp.lt.u32.totalorder %s2730_s30, %s2726_s15  ;;  %p2734_p8 = scmp.lt.u32.totalorder %s2726_s15, %s3578_s12 }
 0x429   : > { %p2728_p2 = pnand %p2727_p1, %p2951_p7 }
 0x42a   : > { %p2733_p6 = por %p2732_p5, %p2731_p4 }
 0x42b   : > { %p2729_p3 = pneg %p2728_p2 }
 0x42c   : > { %p2735_p9 = por %p2734_p8, %p2733_p6 }
 0x42e   : > { %p2736_p10 = pnand %p2735_p9, %p2729_p3 }
 0x430   : > { %2739 = shalt.err (!%p2736_p10)
}
 0x431   : > { %2509 = dma.vmem_to_hbm [thread:$0]  (%p2951_p7), %s2185_s0, 128, %s3578_s12, %s2171_s17  }
 0x432 PF: > { %s3697_s26 = sld [smem:[#allocation8_spill]]  ;;  %p2515_p11 = scmp.ge.s32.totalorder %s2822_s18, 2 }
 0x434   : > { %p2512_p13 = pnand %p2515_p11, %p2959_p12 }
 0x438   : > { %s2196_s22 = sand.u32 1, %s3697_s26  }
 0x439   : > { %s2197_s16 = scalar_lea.sflag [#allocation6], %s2196_s22 }
 0x43a   : > { %2781 = dma.done.wait (!%p2512_p13), %s2197_s16, 128  }
 0x43b   : > { %2783 = vsyncadd (!%p2512_p13), %s2197_s16, 4294967168  ;;  %s22_s18 = sadd.s32 1, %s2822_s18   ;;  %s3699_s14 = sld [smem:[#allocation9_spill]] }
 0x43c   : > { %p19_p0 = scmp.ge.s32.totalorder %s22_s18, 6   ;;  %s3700_s15 = sld [smem:[#allocation10_spill]] }
 0x43d   : > { %s3701_s16 = sld [smem:[#allocation11_spill]]  ;;  %s3702_s17 = sld [smem:[#allocation12_spill]] }
 0x43e   : > { %s3703_s30 = smov %s2790_s10  ;;  %s3704_s10 = smov %s2794_s11 }
 0x43f   : > { %s3705_s11 = smov %s2964_s9  ;;  %s3706_s12 = smov %s2802_s13 }
 0x440   : > { %s3707_s13 = smov %s2967_s19  ;;  %21 = sbr.rel (!%p19_p0) target bundleno = 9 (0x9), region = 152 }
 0x447   :  { %2202 = vsyncpa [#allocation6], 1 }
 0x448   :  { %2204 = vsyncpa [#allocation6 + $0x1], 1 }

</bundles_post_ra>
